<compile_context>
chip_gen: v7x
topology: tpu7x:2x2x1
jax: 0.10.0
libtpu: 0.0.40
codegen_flags: <defaults>
</compile_context>

<pallas_src>
import jax
import jax.numpy as jnp
from jax import lax
from jax.experimental import pallas as pl
from jax.experimental.pallas import tpu as pltpu


def _fused_mpn_kernel(
    # inputs
    row_ref, col_ref, colsub_ref, e_ref, invc_ref, x_ref,
    prc_ref, w1e_ref, b1_ref, w2_ref, b2_ref,
    pm_ref, wme_ref, bm_ref, att_ref,
    wnx_ref, wna_ref, bn_ref,
    # outputs (feature-major: last dim = edges / nodes)
    e_out_ref, a_out_ref, x_out_ref,
    # scratch
    agg_ref,
):
    i = pl.program_id(0)
    n_tiles = pl.num_programs(0)
    N = invc_ref.shape[1]
    TM = e_ref.shape[1]
    bf = jnp.bfloat16
    f32 = jnp.float32

    # ---- step 0: zero the per-node accumulator (projections are precomputed in wrapper) ----
    @pl.when(i == 0)
    def _():
        agg_ref[...] = jnp.zeros_like(agg_ref)

    # ---- per-tile one-hot gather / scatter matrices (no dense [N, M] adjacency in HBM) ----
    row_lane = row_ref[...]                                   # (1, TM) int32
    col_lane = col_ref[...]                                   # (1, TM) int32
    col_sub = colsub_ref[...]                                 # (TM, 1) int32

    sub2n = lax.broadcasted_iota(jnp.int32, (2 * N, TM), 0)
    # rows 0..N-1 one-hot the edge's source node, rows N..2N-1 the destination node
    g_rcT = ((sub2n == row_lane) | (sub2n == col_lane + N)).astype(bf)   # (2N, TM)
    subn = lax.broadcasted_iota(jnp.int32, (N, TM), 0)
    g_rowT = (subn == row_lane).astype(bf)                               # (N, TM)
    lane_n = lax.broadcasted_iota(jnp.int32, (TM, N), 1)
    scat = (col_sub == lane_n).astype(bf)                                # (TM, N)

    e_in = e_ref[...]                                         # (E, TM) bf16

    # ---- edge model (single fused gather matmul with K = 2N) ----
    h1 = (jnp.dot(prc_ref[...], g_rcT, preferred_element_type=f32)       # (H, TM)
          + jnp.dot(w1e_ref[...], e_in, preferred_element_type=f32)
          + b1_ref[...])
    h1 = jnp.maximum(h1, 0.0)
    e_new = (jnp.dot(w2_ref[...], h1.astype(bf), preferred_element_type=f32)
             + b2_ref[...])
    e_new = jnp.maximum(e_new, 0.0)                           # (E, TM) f32
    e_out_ref[...] = e_new                                    # lane-dense store (TM mult of 128)

    # ---- node messages + attention ----
    msg = (jnp.dot(pm_ref[...], g_rowT, preferred_element_type=f32)      # (H, TM)
           + jnp.dot(wme_ref[...], e_new.astype(bf), preferred_element_type=f32)
           + bm_ref[...])
    msg = jnp.maximum(msg, 0.0)

    # width-1 MXU matmul replaced by VPU multiply + cross-sublane (XLU) reduction
    score = jnp.sum(msg * att_ref[...], axis=0, keepdims=True)           # (1, TM)
    a = jax.nn.sigmoid(score)
    a_out_ref[...] = a                                        # lane-dense store

    weighted = (msg * a).astype(bf)                           # (H, TM)

    # ---- scatter-add into per-node accumulator via per-tile one-hot (TM, N) ----
    agg_ref[...] += jnp.dot(weighted, scat, preferred_element_type=f32)  # (H, N)

    # ---- last step: mean-normalize, node MLP, write x' (tiny one-time store) ----
    @pl.when(i == n_tiles - 1)
    def _():
        agg_mean = (agg_ref[...] * invc_ref[...]).astype(bf)             # (H, N)
        x_new = (jnp.dot(wnx_ref[...], x_ref[...], preferred_element_type=f32)
                 + jnp.dot(wna_ref[...], agg_mean, preferred_element_type=f32)
                 + bn_ref[...])
        x_out_ref[...] = jnp.maximum(x_new, 0.0)                         # (D, N)


def _vmem_limit_bytes():
    # ~3/4 of physical VMEM, capped at 96 MiB: ~48 MiB on v7x (64 MiB VMEM),
    # 96 MiB on v5e/v6e (128 MiB VMEM). Conservative fallback if the query fails.
    try:
        cap = int(pltpu.get_tpu_info().vmem_capacity_bytes)
    except Exception:
        cap = 64 * 1024 * 1024
    return max(32 * 1024 * 1024, min(96 * 1024 * 1024, (cap * 3) // 4))


def meta_layer_forward(x, edge_index, edge_attr, params, *, tm=512):
    """Pallas implementation of MetaLayer.forward with use_attention=True."""
    N, D = x.shape
    M, E = edge_attr.shape
    (w1r, w1c, w1e, b1, w2, b2, wmx, wme, bm, att, wnx, wna, bn) = params
    H = w1r.shape[1]

    bf = jnp.bfloat16
    f32 = jnp.float32

    row = edge_index[0].astype(jnp.int32)
    col = edge_index[1].astype(jnp.int32)

    # Pad edge dim to a tile multiple. Padded col = N never matches a real node id,
    # so padded edges contribute nothing to the aggregation; their e'/a rows are trimmed.
    n_tiles = pl.cdiv(M, tm)
    Mp = n_tiles * tm
    pad = Mp - M
    row_p = jnp.concatenate([row, jnp.zeros((pad,), jnp.int32)])
    col_p = jnp.concatenate([col, jnp.full((pad,), N, jnp.int32)])

    # Edge stream, feature-major (edges in the lane dim), bf16 -> lane-dense + half the bytes.
    e_T = jnp.concatenate([edge_attr.T.astype(bf), jnp.zeros((E, pad), bf)], axis=1)

    counts = jnp.zeros((N,), f32).at[col].add(1.0)
    invcT = (1.0 / jnp.maximum(counts, 1.0)).reshape(1, N)

    x32 = x.astype(f32)
    # Hoisted x-projections (computed once by XLA), stacked so the edge-model gather is a
    # single K=2N matmul: proj_rcT = [ (xW1r)^T | (xW1c)^T ]  -> (H, 2N)
    proj_rcT = jnp.concatenate([(x32 @ w1r).T, (x32 @ w1c).T], axis=1).astype(bf)
    proj_mT = (x32 @ wmx).T.astype(bf)                                   # (H, N)

    args = (
        row_p.reshape(1, Mp),                   # row ids, lane layout
        col_p.reshape(1, Mp),                   # col ids, lane layout
        col_p.reshape(Mp, 1),                   # col ids, sublane layout (scatter)
        e_T,                                    # (E, Mp) bf16
        invcT,                                  # (1, N)
        x32.T.astype(bf),                       # (D, N)
        proj_rcT,                               # (H, 2N)
        w1e.T.astype(bf), b1.reshape(H, 1).astype(f32),
        w2.T.astype(bf), b2.reshape(E, 1).astype(f32),
        proj_mT, wme.T.astype(bf), bm.reshape(H, 1).astype(f32),
        att.reshape(H, 1).astype(f32),
        wnx.T.astype(bf), wna.T.astype(bf), bn.reshape(D, 1).astype(f32),
    )

    def const(shape):
        nd = len(shape)
        return pl.BlockSpec(shape, lambda i, _nd=nd: (0,) * _nd)  # VMEM-resident across tiles

    in_specs = [
        pl.BlockSpec((1, tm), lambda i: (0, i)),         # row (lane)
        pl.BlockSpec((1, tm), lambda i: (0, i)),         # col (lane)
        pl.BlockSpec((tm, 1), lambda i: (i, 0)),         # col (sublane)
        pl.BlockSpec((E, tm), lambda i: (0, i)),         # edge_attr tile (lane-dense)
        const((1, N)),                                   # inv_count
        const((D, N)),                                   # x^T
        const((H, 2 * N)),                               # stacked projections
        const((H, E)), const((H, 1)),                    # W1e^T, b1
        const((E, H)), const((E, 1)),                    # W2^T, b2
        const((H, N)), const((H, E)), const((H, 1)),     # proj_m^T, Wme^T, bm
        const((H, 1)),                                   # att
        const((D, D)), const((D, H)), const((D, 1)),     # Wnx^T, Wna^T, bn
    ]
    out_specs = (
        pl.BlockSpec((E, tm), lambda i: (0, i)),         # e'^T   (lane-dense)
        pl.BlockSpec((1, tm), lambda i: (0, i)),         # a^T    (lane-dense)
        const((D, N)),                                   # x'^T
    )
    out_shape = (
        jax.ShapeDtypeStruct((E, Mp), f32),
        jax.ShapeDtypeStruct((1, Mp), f32),
        jax.ShapeDtypeStruct((D, N), f32),
    )
    scratch_shapes = [pltpu.VMEM((H, N), f32)]           # agg accumulator (f32)

    e_outT, a_outT, x_outT = pl.pallas_call(
        _fused_mpn_kernel,
        out_shape=out_shape,
        grid=(n_tiles,),
        in_specs=in_specs,
        out_specs=out_specs,
        scratch_shapes=scratch_shapes,
        compiler_params=pltpu.CompilerParams(
            dimension_semantics=("arbitrary",),          # agg reduction over edge tiles
            vmem_limit_bytes=_vmem_limit_bytes(),
        ),
    )(*args)

    # Layout plumbing back to the module's row-major outputs.
    return x_outT.T, e_outT.T[:M], a_outT.T[:M]


def meta_layer_reference(x, edge_index, edge_attr, params):
    """Pure-JAX (f32) reference for correctness checking."""
    (w1r, w1c, w1e, b1, w2, b2, wmx, wme, bm, att, wnx, wna, bn) = params
    N = x.shape[0]
    row, col = edge_index[0], edge_index[1]
    xr, xc = x[row], x[col]

    h = jnp.maximum(xr @ w1r + xc @ w1c + edge_attr @ w1e + b1, 0.0)
    e_new = jnp.maximum(h @ w2 + b2, 0.0)

    msg = jnp.maximum(xr @ wmx + e_new @ wme + bm, 0.0)
    a = jax.nn.sigmoid(jnp.sum(msg * att, axis=-1, keepdims=True))
    one_hot = (col[None, :] == jnp.arange(N)[:, None]).astype(jnp.float32)
    counts = jnp.maximum(one_hot.sum(axis=1, keepdims=True), 1.0)
    agg = (one_hot / counts) @ (msg * a)
    x_new = jnp.maximum(x @ wnx + agg @ wna + bn, 0.0)
    return x_new, e_new, a


def init_params(key, node_dim, edge_dim, hidden_dim):
    ks = jax.random.split(key, 13)

    def w(k, shape, fan_in):
        return (jax.random.normal(k, shape, jnp.float32) / jnp.sqrt(fan_in)).astype(jnp.float32)

    concat_in = 2 * node_dim + edge_dim
    msg_in = node_dim + edge_dim
    node_in = node_dim + hidden_dim
    w1r = w(ks[0], (node_dim, hidden_dim), concat_in)
    w1c = w(ks[1], (node_dim, hidden_dim), concat_in)
    w1e = w(ks[2], (edge_dim, hidden_dim), concat_in)
    b1 = jnp.zeros((1, hidden_dim), jnp.float32)
    w2 = w(ks[3], (hidden_dim, edge_dim), hidden_dim)
    b2 = jnp.zeros((1, edge_dim), jnp.float32)
    wmx = w(ks[4], (node_dim, hidden_dim), msg_in)
    wme = w(ks[5], (edge_dim, hidden_dim), msg_in)
    bm = jnp.zeros((1, hidden_dim), jnp.float32)
    att = w(ks[6], (1, hidden_dim), hidden_dim)
    wnx = w(ks[7], (node_dim, node_dim), node_in)
    wna = w(ks[8], (hidden_dim, node_dim), node_in)
    bn = jnp.zeros((1, node_dim), jnp.float32)
    return (w1r, w1c, w1e, b1, w2, b2, wmx, wme, bm, att, wnx, wna, bn)


if __name__ == "__main__":
    key = jax.random.PRNGKey(0)
    k_x, k_e, k_ei, k_p = jax.random.split(key, 4)

    N, M = 64, 1200                # nodes, edges (3 edge tiles at tm=512 -> init/acc/finalize + padding)
    D_NODE, D_EDGE, H = 32, 16, 64
    TM = 512                       # larger tiles per the perf review

    x = jax.random.normal(k_x, (N, D_NODE), jnp.float32)
    edge_attr = jax.random.normal(k_e, (M, D_EDGE), jnp.float32)
    edge_index = jax.random.randint(k_ei, (2, M), 0, N, dtype=jnp.int32)
    params = init_params(k_p, D_NODE, D_EDGE, H)

    x_out, e_out, a_out = meta_layer_forward(x, edge_index, edge_attr, params, tm=TM)
    jax.block_until_ready((x_out, e_out, a_out))

    x_ref, e_ref, a_ref = meta_layer_reference(x, edge_index, edge_attr, params)
    assert x_out.shape == (N, D_NODE) and e_out.shape == (M, D_EDGE) and a_out.shape == (M, 1)
    # Tolerances loosened because MXU operands are bf16 (f32 accumulate); f32 reference.
    assert jnp.allclose(x_out, x_ref, atol=1e-1, rtol=1e-1), float(jnp.max(jnp.abs(x_out - x_ref)))
    assert jnp.allclose(e_out, e_ref, atol=1e-1, rtol=1e-1), float(jnp.max(jnp.abs(e_out - e_ref)))
    assert jnp.allclose(a_out, a_ref, atol=5e-2, rtol=5e-2), float(jnp.max(jnp.abs(a_out - a_ref)))

    print("KERNEL_OK")
</pallas_src>

<mosaic_0001>
module attributes {stable_mosaic.version = 11 : i64} {
  func.func @_fused_mpn_kernel(%arg0: i32, %arg1: memref<1x512xi32, #tpu.memory_space<vmem>>, %arg2: memref<1x512xi32, #tpu.memory_space<vmem>>, %arg3: memref<512x1xi32, #tpu.memory_space<vmem>>, %arg4: memref<16x512xbf16, #tpu.memory_space<vmem>>, %arg5: memref<1x64xf32, #tpu.memory_space<vmem>>, %arg6: memref<32x64xbf16, #tpu.memory_space<vmem>>, %arg7: memref<64x128xbf16, #tpu.memory_space<vmem>>, %arg8: memref<64x16xbf16, #tpu.memory_space<vmem>>, %arg9: memref<64x1xf32, #tpu.memory_space<vmem>>, %arg10: memref<16x64xbf16, #tpu.memory_space<vmem>>, %arg11: memref<16x1xf32, #tpu.memory_space<vmem>>, %arg12: memref<64x64xbf16, #tpu.memory_space<vmem>>, %arg13: memref<64x16xbf16, #tpu.memory_space<vmem>>, %arg14: memref<64x1xf32, #tpu.memory_space<vmem>>, %arg15: memref<64x1xf32, #tpu.memory_space<vmem>>, %arg16: memref<32x32xbf16, #tpu.memory_space<vmem>>, %arg17: memref<32x64xbf16, #tpu.memory_space<vmem>>, %arg18: memref<32x1xf32, #tpu.memory_space<vmem>>, %arg19: memref<16x512xf32, #tpu.memory_space<vmem>>, %arg20: memref<1x512xf32, #tpu.memory_space<vmem>>, %arg21: memref<32x64xf32, #tpu.memory_space<vmem>>, %arg22: memref<64x64xf32, #tpu.memory_space<vmem>>) attributes {dimension_semantics = [#tpu.dimension_semantics<arbitrary>], iteration_bounds = array<i64: 3>, scalar_prefetch = 0 : i64, scratch_operands = 1 : i64, tpu.core_type = #tpu.core_type<tc>, window_params = [{transform_indices = @transform_0, window_bounds = array<i64: 1, 512>}, {transform_indices = @transform_1, window_bounds = array<i64: 1, 512>}, {transform_indices = @transform_2, window_bounds = array<i64: 512, 1>}, {transform_indices = @transform_3, window_bounds = array<i64: 16, 512>}, {pipeline_mode = #tpu.pipeline_mode<synchronous>, transform_indices = @transform_4, window_bounds = array<i64: 1, 64>}, {pipeline_mode = #tpu.pipeline_mode<synchronous>, transform_indices = @transform_5, window_bounds = array<i64: 32, 64>}, {pipeline_mode = #tpu.pipeline_mode<synchronous>, transform_indices = @transform_6, window_bounds = array<i64: 64, 128>}, {pipeline_mode = #tpu.pipeline_mode<synchronous>, transform_indices = @transform_7, window_bounds = array<i64: 64, 16>}, {pipeline_mode = #tpu.pipeline_mode<synchronous>, transform_indices = @transform_8, window_bounds = array<i64: 64, 1>}, {pipeline_mode = #tpu.pipeline_mode<synchronous>, transform_indices = @transform_9, window_bounds = array<i64: 16, 64>}, {pipeline_mode = #tpu.pipeline_mode<synchronous>, transform_indices = @transform_10, window_bounds = array<i64: 16, 1>}, {pipeline_mode = #tpu.pipeline_mode<synchronous>, transform_indices = @transform_11, window_bounds = array<i64: 64, 64>}, {pipeline_mode = #tpu.pipeline_mode<synchronous>, transform_indices = @transform_12, window_bounds = array<i64: 64, 16>}, {pipeline_mode = #tpu.pipeline_mode<synchronous>, transform_indices = @transform_13, window_bounds = array<i64: 64, 1>}, {pipeline_mode = #tpu.pipeline_mode<synchronous>, transform_indices = @transform_14, window_bounds = array<i64: 64, 1>}, {pipeline_mode = #tpu.pipeline_mode<synchronous>, transform_indices = @transform_15, window_bounds = array<i64: 32, 32>}, {pipeline_mode = #tpu.pipeline_mode<synchronous>, transform_indices = @transform_16, window_bounds = array<i64: 32, 64>}, {pipeline_mode = #tpu.pipeline_mode<synchronous>, transform_indices = @transform_17, window_bounds = array<i64: 32, 1>}, {transform_indices = @transform_18, window_bounds = array<i64: 16, 512>}, {transform_indices = @transform_19, window_bounds = array<i64: 1, 512>}, {pipeline_mode = #tpu.pipeline_mode<synchronous>, transform_indices = @transform_20, window_bounds = array<i64: 32, 64>}]} {
    %c0_i32 = arith.constant 0 : i32
    %0 = arith.cmpi eq, %arg0, %c0_i32 : i32
    %1 = arith.extui %0 : i1 to i32
    %c0_i32_0 = arith.constant 0 : i32
    %2 = arith.cmpi ne, %1, %c0_i32_0 : i32
    scf.if %2 {
      %cst_45 = arith.constant 0.000000e+00 : f32
      %81 = vector.broadcast %cst_45 : f32 to vector<64x64xf32>
      %c0_46 = arith.constant 0 : index
      %c0_47 = arith.constant 0 : index
      %82 = vector.load %arg22[%c0_46, %c0_47] : memref<64x64xf32, #tpu.memory_space<vmem>>, vector<64x64xf32>
      tpu.vector_store %arg22[%c0_46, %c0_47], %81 {strides = array<i32>} : memref<64x64xf32, #tpu.memory_space<vmem>>, vector<64x64xf32>,
    } else {
    }
    %c0 = arith.constant 0 : index
    %c0_1 = arith.constant 0 : index
    %3 = vector.load %arg1[%c0, %c0_1] : memref<1x512xi32, #tpu.memory_space<vmem>>, vector<1x512xi32>
    %c0_2 = arith.constant 0 : index
    %c0_3 = arith.constant 0 : index
    %4 = vector.load %arg2[%c0_2, %c0_3] : memref<1x512xi32, #tpu.memory_space<vmem>>, vector<1x512xi32>
    %c0_4 = arith.constant 0 : index
    %c0_5 = arith.constant 0 : index
    %5 = vector.load %arg3[%c0_4, %c0_5] : memref<512x1xi32, #tpu.memory_space<vmem>>, vector<512x1xi32>
    %6 = tpu.iota {dimensions = array<i32: 0>} : vector<128x512xi32>
    %7 = vector.broadcast %3 : vector<1x512xi32> to vector<128x512xi32>
    %8 = arith.cmpi eq, %6, %7 : vector<128x512xi32>
    %c64_i32 = arith.constant 64 : i32
    %9 = vector.broadcast %c64_i32 : i32 to vector<1x512xi32>
    %10 = arith.addi %4, %9 : vector<1x512xi32>
    %11 = vector.broadcast %10 : vector<1x512xi32> to vector<128x512xi32>
    %12 = arith.cmpi eq, %6, %11 : vector<128x512xi32>
    %13 = arith.ori %8, %12 : vector<128x512xi1>
    %14 = arith.extui %13 : vector<128x512xi1> to vector<128x512xi32>
    %15 = arith.sitofp %14 : vector<128x512xi32> to vector<128x512xf32>
    %16 = arith.truncf %15 : vector<128x512xf32> to vector<128x512xbf16>
    %17 = tpu.iota {dimensions = array<i32: 0>} : vector<64x512xi32>
    %18 = vector.broadcast %3 : vector<1x512xi32> to vector<64x512xi32>
    %19 = arith.cmpi eq, %17, %18 : vector<64x512xi32>
    %20 = arith.extui %19 : vector<64x512xi1> to vector<64x512xi32>
    %21 = arith.sitofp %20 : vector<64x512xi32> to vector<64x512xf32>
    %22 = arith.truncf %21 : vector<64x512xf32> to vector<64x512xbf16>
    %23 = tpu.iota {dimensions = array<i32: 1>} : vector<512x64xi32>
    %24 = vector.broadcast %5 : vector<512x1xi32> to vector<512x64xi32>
    %25 = arith.cmpi eq, %24, %23 : vector<512x64xi32>
    %26 = arith.extui %25 : vector<512x64xi1> to vector<512x64xi32>
    %27 = arith.sitofp %26 : vector<512x64xi32> to vector<512x64xf32>
    %28 = arith.truncf %27 : vector<512x64xf32> to vector<512x64xbf16>
    %c0_6 = arith.constant 0 : index
    %c0_7 = arith.constant 0 : index
    %29 = vector.load %arg4[%c0_6, %c0_7] : memref<16x512xbf16, #tpu.memory_space<vmem>>, vector<16x512xbf16>
    %c0_8 = arith.constant 0 : index
    %c0_9 = arith.constant 0 : index
    %30 = vector.load %arg7[%c0_8, %c0_9] : memref<64x128xbf16, #tpu.memory_space<vmem>>, vector<64x128xbf16>
    %cst = arith.constant dense<0.000000e+00> : vector<64x512xf32>
    %31 = tpu.matmul %30, %16, %cst {dimension_numbers = #tpu.dot_dimension_numbers<[1], [0], [0], [1], [0, 0, 1, 1], [], []>} : vector<64x128xbf16>, vector<128x512xbf16>, vector<64x512xf32> -> vector<64x512xf32>
    %c0_10 = arith.constant 0 : index
    %c0_11 = arith.constant 0 : index
    %32 = vector.load %arg8[%c0_10, %c0_11] : memref<64x16xbf16, #tpu.memory_space<vmem>>, vector<64x16xbf16>
    %cst_12 = arith.constant dense<0.000000e+00> : vector<64x512xf32>
    %33 = tpu.matmul %32, %29, %cst_12 {dimension_numbers = #tpu.dot_dimension_numbers<[1], [0], [0], [1], [0, 0, 1, 1], [], []>} : vector<64x16xbf16>, vector<16x512xbf16>, vector<64x512xf32> -> vector<64x512xf32>
    %34 = arith.addf %31, %33 : vector<64x512xf32>
    %c0_13 = arith.constant 0 : index
    %c0_14 = arith.constant 0 : index
    %35 = vector.load %arg9[%c0_13, %c0_14] : memref<64x1xf32, #tpu.memory_space<vmem>>, vector<64x1xf32>
    %36 = vector.broadcast %35 : vector<64x1xf32> to vector<64x512xf32>
    %37 = arith.addf %34, %36 : vector<64x512xf32>
    %cst_15 = arith.constant 0.000000e+00 : f32
    %38 = vector.broadcast %cst_15 : f32 to vector<64x512xf32>
    %39 = arith.maximumf %37, %38 : vector<64x512xf32>
    %c0_16 = arith.constant 0 : index
    %c0_17 = arith.constant 0 : index
    %40 = vector.load %arg10[%c0_16, %c0_17] : memref<16x64xbf16, #tpu.memory_space<vmem>>, vector<16x64xbf16>
    %41 = arith.truncf %39 : vector<64x512xf32> to vector<64x512xbf16>
    %cst_18 = arith.constant dense<0.000000e+00> : vector<16x512xf32>
    %42 = tpu.matmul %40, %41, %cst_18 {dimension_numbers = #tpu.dot_dimension_numbers<[1], [0], [0], [1], [0, 0, 1, 1], [], []>} : vector<16x64xbf16>, vector<64x512xbf16>, vector<16x512xf32> -> vector<16x512xf32>
    %c0_19 = arith.constant 0 : index
    %c0_20 = arith.constant 0 : index
    %43 = vector.load %arg11[%c0_19, %c0_20] : memref<16x1xf32, #tpu.memory_space<vmem>>, vector<16x1xf32>
    %44 = vector.broadcast %43 : vector<16x1xf32> to vector<16x512xf32>
    %45 = arith.addf %42, %44 : vector<16x512xf32>
    %cst_21 = arith.constant 0.000000e+00 : f32
    %46 = vector.broadcast %cst_21 : f32 to vector<16x512xf32>
    %47 = arith.maximumf %45, %46 : vector<16x512xf32>
    %c0_22 = arith.constant 0 : index
    %c0_23 = arith.constant 0 : index
    %48 = vector.load %arg19[%c0_22, %c0_23] : memref<16x512xf32, #tpu.memory_space<vmem>>, vector<16x512xf32>
    tpu.vector_store %arg19[%c0_22, %c0_23], %47 {strides = array<i32>} : memref<16x512xf32, #tpu.memory_space<vmem>>, vector<16x512xf32>,
    %c0_24 = arith.constant 0 : index
    %c0_25 = arith.constant 0 : index
    %49 = vector.load %arg12[%c0_24, %c0_25] : memref<64x64xbf16, #tpu.memory_space<vmem>>, vector<64x64xbf16>
    %cst_26 = arith.constant dense<0.000000e+00> : vector<64x512xf32>
    %50 = tpu.matmul %49, %22, %cst_26 {dimension_numbers = #tpu.dot_dimension_numbers<[1], [0], [0], [1], [0, 0, 1, 1], [], []>} : vector<64x64xbf16>, vector<64x512xbf16>, vector<64x512xf32> -> vector<64x512xf32>
    %c0_27 = arith.constant 0 : index
    %c0_28 = arith.constant 0 : index
    %51 = vector.load %arg13[%c0_27, %c0_28] : memref<64x16xbf16, #tpu.memory_space<vmem>>, vector<64x16xbf16>
    %52 = arith.truncf %47 : vector<16x512xf32> to vector<16x512xbf16>
    %cst_29 = arith.constant dense<0.000000e+00> : vector<64x512xf32>
    %53 = tpu.matmul %51, %52, %cst_29 {dimension_numbers = #tpu.dot_dimension_numbers<[1], [0], [0], [1], [0, 0, 1, 1], [], []>} : vector<64x16xbf16>, vector<16x512xbf16>, vector<64x512xf32> -> vector<64x512xf32>
    %54 = arith.addf %50, %53 : vector<64x512xf32>
    %c0_30 = arith.constant 0 : index
    %c0_31 = arith.constant 0 : index
    %55 = vector.load %arg14[%c0_30, %c0_31] : memref<64x1xf32, #tpu.memory_space<vmem>>, vector<64x1xf32>
    %56 = vector.broadcast %55 : vector<64x1xf32> to vector<64x512xf32>
    %57 = arith.addf %54, %56 : vector<64x512xf32>
    %cst_32 = arith.constant 0.000000e+00 : f32
    %58 = vector.broadcast %cst_32 : f32 to vector<64x512xf32>
    %59 = arith.maximumf %57, %58 : vector<64x512xf32>
    %c0_33 = arith.constant 0 : index
    %c0_34 = arith.constant 0 : index
    %60 = vector.load %arg15[%c0_33, %c0_34] : memref<64x1xf32, #tpu.memory_space<vmem>>, vector<64x1xf32>
    %61 = vector.broadcast %60 : vector<64x1xf32> to vector<64x512xf32>
    %62 = arith.mulf %59, %61 : vector<64x512xf32>
    %cst_35 = arith.constant dense<0.000000e+00> : vector<512xf32>
    %63 = vector.multi_reduction <add>, %62, %cst_35 [0] : vector<64x512xf32> to vector<512xf32>
    %64 = vector.shape_cast %63 : vector<512xf32> to vector<1x512xf32>
    %65 = arith.negf %64 : vector<1x512xf32>
    %66 = math.exp %65 : vector<1x512xf32>
    %cst_36 = arith.constant 1.000000e+00 : f32
    %67 = vector.broadcast %cst_36 : f32 to vector<1x512xf32>
    %68 = arith.addf %67, %66 : vector<1x512xf32>
    %69 = arith.divf %67, %68 : vector<1x512xf32>
    %c0_37 = arith.constant 0 : index
    %c0_38 = arith.constant 0 : index
    %70 = vector.load %arg20[%c0_37, %c0_38] : memref<1x512xf32, #tpu.memory_space<vmem>>, vector<1x512xf32>
    tpu.vector_store %arg20[%c0_37, %c0_38], %69 {strides = array<i32>} : memref<1x512xf32, #tpu.memory_space<vmem>>, vector<1x512xf32>,
    %71 = vector.broadcast %69 : vector<1x512xf32> to vector<64x512xf32>
    %72 = arith.mulf %59, %71 : vector<64x512xf32>
    %73 = arith.truncf %72 : vector<64x512xf32> to vector<64x512xbf16>
    %c0_39 = arith.constant 0 : index
    %c0_40 = arith.constant 0 : index
    %74 = vector.load %arg22[%c0_39, %c0_40] : memref<64x64xf32, #tpu.memory_space<vmem>>, vector<64x64xf32>
    %cst_41 = arith.constant dense<0.000000e+00> : vector<64x64xf32>
    %75 = tpu.matmul %73, %28, %cst_41 {dimension_numbers = #tpu.dot_dimension_numbers<[1], [0], [0], [1], [0, 0, 1, 1], [], []>} : vector<64x512xbf16>, vector<512x64xbf16>, vector<64x64xf32> -> vector<64x64xf32>
    %76 = arith.addf %74, %75 : vector<64x64xf32>
    %c0_42 = arith.constant 0 : index
    %c0_43 = arith.constant 0 : index
    %77 = vector.load %arg22[%c0_42, %c0_43] : memref<64x64xf32, #tpu.memory_space<vmem>>, vector<64x64xf32>
    tpu.vector_store %arg22[%c0_42, %c0_43], %76 {strides = array<i32>} : memref<64x64xf32, #tpu.memory_space<vmem>>, vector<64x64xf32>,
    %c2_i32 = arith.constant 2 : i32
    %78 = arith.cmpi eq, %arg0, %c2_i32 : i32
    %79 = arith.extui %78 : i1 to i32
    %c0_i32_44 = arith.constant 0 : i32
    %80 = arith.cmpi ne, %79, %c0_i32_44 : i32
    scf.if %80 {
      %c0_45 = arith.constant 0 : index
      %c0_46 = arith.constant 0 : index
      %81 = vector.load %arg22[%c0_45, %c0_46] : memref<64x64xf32, #tpu.memory_space<vmem>>, vector<64x64xf32>
      %c0_47 = arith.constant 0 : index
      %c0_48 = arith.constant 0 : index
      %82 = vector.load %arg5[%c0_47, %c0_48] : memref<1x64xf32, #tpu.memory_space<vmem>>, vector<1x64xf32>
      %83 = vector.broadcast %82 : vector<1x64xf32> to vector<64x64xf32>
      %84 = arith.mulf %81, %83 : vector<64x64xf32>
      %85 = arith.truncf %84 : vector<64x64xf32> to vector<64x64xbf16>
      %c0_49 = arith.constant 0 : index
      %c0_50 = arith.constant 0 : index
      %86 = vector.load %arg16[%c0_49, %c0_50] : memref<32x32xbf16, #tpu.memory_space<vmem>>, vector<32x32xbf16>
      %c0_51 = arith.constant 0 : index
      %c0_52 = arith.constant 0 : index
      %87 = vector.load %arg6[%c0_51, %c0_52] : memref<32x64xbf16, #tpu.memory_space<vmem>>, vector<32x64xbf16>
      %cst_53 = arith.constant dense<0.000000e+00> : vector<32x64xf32>
      %88 = tpu.matmul %86, %87, %cst_53 {dimension_numbers = #tpu.dot_dimension_numbers<[1], [0], [0], [1], [0, 0, 1, 1], [], []>} : vector<32x32xbf16>, vector<32x64xbf16>, vector<32x64xf32> -> vector<32x64xf32>
      %c0_54 = arith.constant 0 : index
      %c0_55 = arith.constant 0 : index
      %89 = vector.load %arg17[%c0_54, %c0_55] : memref<32x64xbf16, #tpu.memory_space<vmem>>, vector<32x64xbf16>
      %cst_56 = arith.constant dense<0.000000e+00> : vector<32x64xf32>
      %90 = tpu.matmul %89, %85, %cst_56 {dimension_numbers = #tpu.dot_dimension_numbers<[1], [0], [0], [1], [0, 0, 1, 1], [], []>} : vector<32x64xbf16>, vector<64x64xbf16>, vector<32x64xf32> -> vector<32x64xf32>
      %91 = arith.addf %88, %90 : vector<32x64xf32>
      %c0_57 = arith.constant 0 : index
      %c0_58 = arith.constant 0 : index
      %92 = vector.load %arg18[%c0_57, %c0_58] : memref<32x1xf32, #tpu.memory_space<vmem>>, vector<32x1xf32>
      %93 = vector.broadcast %92 : vector<32x1xf32> to vector<32x64xf32>
      %94 = arith.addf %91, %93 : vector<32x64xf32>
      %cst_59 = arith.constant 0.000000e+00 : f32
      %95 = vector.broadcast %cst_59 : f32 to vector<32x64xf32>
      %96 = arith.maximumf %94, %95 : vector<32x64xf32>
      %c0_60 = arith.constant 0 : index
      %c0_61 = arith.constant 0 : index
      %97 = vector.load %arg21[%c0_60, %c0_61] : memref<32x64xf32, #tpu.memory_space<vmem>>, vector<32x64xf32>
      tpu.vector_store %arg21[%c0_60, %c0_61], %96 {strides = array<i32>} : memref<32x64xf32, #tpu.memory_space<vmem>>, vector<32x64xf32>,
    } else {
    }
    return
  }
  func.func @transform_0(%arg0: i32) -> (i32, i32) {
    %c0_i32 = arith.constant 0 : i32
    %c0_i32_0 = arith.constant 0 : i32
    return %c0_i32, %arg0 : i32, i32
  }
  func.func @transform_1(%arg0: i32) -> (i32, i32) {
    %c0_i32 = arith.constant 0 : i32
    %c0_i32_0 = arith.constant 0 : i32
    return %c0_i32, %arg0 : i32, i32
  }
  func.func @transform_2(%arg0: i32) -> (i32, i32) {
    %c0_i32 = arith.constant 0 : i32
    %c0_i32_0 = arith.constant 0 : i32
    return %arg0, %c0_i32 : i32, i32
  }
  func.func @transform_3(%arg0: i32) -> (i32, i32) {
    %c0_i32 = arith.constant 0 : i32
    %c0_i32_0 = arith.constant 0 : i32
    return %c0_i32, %arg0 : i32, i32
  }
  func.func @transform_4(%arg0: i32) -> (i32, i32) {
    %c0_i32 = arith.constant 0 : i32
    %c0_i32_0 = arith.constant 0 : i32
    %c0_i32_1 = arith.constant 0 : i32
    return %c0_i32, %c0_i32_0 : i32, i32
  }
  func.func @transform_5(%arg0: i32) -> (i32, i32) {
    %c0_i32 = arith.constant 0 : i32
    %c0_i32_0 = arith.constant 0 : i32
    %c0_i32_1 = arith.constant 0 : i32
    return %c0_i32, %c0_i32_0 : i32, i32
  }
  func.func @transform_6(%arg0: i32) -> (i32, i32) {
    %c0_i32 = arith.constant 0 : i32
    %c0_i32_0 = arith.constant 0 : i32
    %c0_i32_1 = arith.constant 0 : i32
    return %c0_i32, %c0_i32_0 : i32, i32
  }
  func.func @transform_7(%arg0: i32) -> (i32, i32) {
    %c0_i32 = arith.constant 0 : i32
    %c0_i32_0 = arith.constant 0 : i32
    %c0_i32_1 = arith.constant 0 : i32
    return %c0_i32, %c0_i32_0 : i32, i32
  }
  func.func @transform_8(%arg0: i32) -> (i32, i32) {
    %c0_i32 = arith.constant 0 : i32
    %c0_i32_0 = arith.constant 0 : i32
    %c0_i32_1 = arith.constant 0 : i32
    return %c0_i32, %c0_i32_0 : i32, i32
  }
  func.func @transform_9(%arg0: i32) -> (i32, i32) {
    %c0_i32 = arith.constant 0 : i32
    %c0_i32_0 = arith.constant 0 : i32
    %c0_i32_1 = arith.constant 0 : i32
    return %c0_i32, %c0_i32_0 : i32, i32
  }
  func.func @transform_10(%arg0: i32) -> (i32, i32) {
    %c0_i32 = arith.constant 0 : i32
    %c0_i32_0 = arith.constant 0 : i32
    %c0_i32_1 = arith.constant 0 : i32
    return %c0_i32, %c0_i32_0 : i32, i32
  }
  func.func @transform_11(%arg0: i32) -> (i32, i32) {
    %c0_i32 = arith.constant 0 : i32
    %c0_i32_0 = arith.constant 0 : i32
    %c0_i32_1 = arith.constant 0 : i32
    return %c0_i32, %c0_i32_0 : i32, i32
  }
  func.func @transform_12(%arg0: i32) -> (i32, i32) {
    %c0_i32 = arith.constant 0 : i32
    %c0_i32_0 = arith.constant 0 : i32
    %c0_i32_1 = arith.constant 0 : i32
    return %c0_i32, %c0_i32_0 : i32, i32
  }
  func.func @transform_13(%arg0: i32) -> (i32, i32) {
    %c0_i32 = arith.constant 0 : i32
    %c0_i32_0 = arith.constant 0 : i32
    %c0_i32_1 = arith.constant 0 : i32
    return %c0_i32, %c0_i32_0 : i32, i32
  }
  func.func @transform_14(%arg0: i32) -> (i32, i32) {
    %c0_i32 = arith.constant 0 : i32
    %c0_i32_0 = arith.constant 0 : i32
    %c0_i32_1 = arith.constant 0 : i32
    return %c0_i32, %c0_i32_0 : i32, i32
  }
  func.func @transform_15(%arg0: i32) -> (i32, i32) {
    %c0_i32 = arith.constant 0 : i32
    %c0_i32_0 = arith.constant 0 : i32
    %c0_i32_1 = arith.constant 0 : i32
    return %c0_i32, %c0_i32_0 : i32, i32
  }
  func.func @transform_16(%arg0: i32) -> (i32, i32) {
    %c0_i32 = arith.constant 0 : i32
    %c0_i32_0 = arith.constant 0 : i32
    %c0_i32_1 = arith.constant 0 : i32
    return %c0_i32, %c0_i32_0 : i32, i32
  }
  func.func @transform_17(%arg0: i32) -> (i32, i32) {
    %c0_i32 = arith.constant 0 : i32
    %c0_i32_0 = arith.constant 0 : i32
    %c0_i32_1 = arith.constant 0 : i32
    return %c0_i32, %c0_i32_0 : i32, i32
  }
  func.func @transform_18(%arg0: i32) -> (i32, i32) {
    %c0_i32 = arith.constant 0 : i32
    %c0_i32_0 = arith.constant 0 : i32
    return %c0_i32, %arg0 : i32, i32
  }
  func.func @transform_19(%arg0: i32) -> (i32, i32) {
    %c0_i32 = arith.constant 0 : i32
    %c0_i32_0 = arith.constant 0 : i32
    return %c0_i32, %arg0 : i32, i32
  }
  func.func @transform_20(%arg0: i32) -> (i32, i32) {
    %c0_i32 = arith.constant 0 : i32
    %c0_i32_0 = arith.constant 0 : i32
    %c0_i32_1 = arith.constant 0 : i32
    return %c0_i32, %c0_i32_0 : i32, i32
  }
}

</mosaic_0001>

<bundles_post_ra>
// kernel: tpu_custom_call.1
= control target key start
LH: loop header
LB: loop body
LE: loop exit
PB: predicated region body
PF: predicated region fallthrough
CT: control target
= control target key end

     0   :  { %s6276_s0 = inlined_call_operand.vmem [shape: s32[1,1536], index: 0, kind: input, shape index: {}]   ;;  %s6277_s1 = inlined_call_operand.vmem [shape: s32[1,1536], index: 1, kind: input, shape index: {}]   ;;  %s6278_s2 = inlined_call_operand.vmem [shape: s32[1536,1], index: 2, kind: input, shape index: {}]   ;;  %s6279_s3 = inlined_call_operand.vmem [shape: bf16[16,1536], index: 3, kind: input, shape index: {}]   ;;  %s6280_s4 = inlined_call_operand.vmem [shape: f32[1,64], index: 4, kind: input, shape index: {}]   ;;  %s6281_s5 = inlined_call_operand.vmem [shape: bf16[32,64], index: 5, kind: input, shape index: {}]   ;;  %s6282_s6 = inlined_call_operand.vmem [shape: bf16[64,128], index: 6, kind: input, shape index: {}]   ;;  %s6283_s7 = inlined_call_operand.vmem [shape: bf16[64,16], index: 7, kind: input, shape index: {}]   ;;  %s6284_s8 = inlined_call_operand.vmem [shape: f32[64,1], index: 8, kind: input, shape index: {}]   ;;  %s6285_s9 = inlined_call_operand.vmem [shape: bf16[16,64], index: 9, kind: input, shape index: {}]   ;;  %s6286_s10 = inlined_call_operand.vmem [shape: f32[16,1], index: 10, kind: input, shape index: {}]   ;;  %s6287_s11 = inlined_call_operand.vmem [shape: bf16[64,64], index: 11, kind: input, shape index: {}]   ;;  %s6288_s12 = inlined_call_operand.vmem [shape: bf16[64,16], index: 12, kind: input, shape index: {}]   ;;  %s6289_s13 = inlined_call_operand.vmem [shape: f32[64,1], index: 13, kind: input, shape index: {}]   ;;  %s6290_s14 = inlined_call_operand.vmem [shape: f32[64,1], index: 14, kind: input, shape index: {}]   ;;  %s6291_s15 = inlined_call_operand.vmem [shape: bf16[32,32], index: 15, kind: input, shape index: {}]   ;;  %s6292_s16 = inlined_call_operand.vmem [shape: bf16[32,64], index: 16, kind: input, shape index: {}]   ;;  %s6293_s17 = inlined_call_operand.vmem [shape: f32[32,1], index: 17, kind: input, shape index: {}]   ;;  %s6294_s18 = inlined_call_operand.hbm [shape: f32[16,1536], index: 18, kind: output, shape index: {0}]   ;;  %s6295_s19 = inlined_call_operand.hbm [shape: f32[1,1536], index: 19, kind: output, shape index: {1}]   ;;  %s6296_s20 = inlined_call_operand.hbm [shape: f32[32,64], index: 20, kind: output, shape index: {2}]  }
   0x1   :  { %6400 = sst [smem:[#allocation38_spill]] %s6276_s0 }
   0x2   :  { %6401 = sst [smem:[#allocation39_spill]] %s6277_s1 }
   0x3   :  { %6402 = sst [smem:[#allocation40_spill]] %s6278_s2 }
   0x4   :  { %6403 = sst [smem:[#allocation41_spill]] %s6279_s3 }
   0x5   :  { %6404 = sst [smem:[#allocation42_spill]] %s6280_s4 }
   0x6   :  { %6405 = sst [smem:[#allocation43_spill]] %s6281_s5 }
   0x7   :  { %6406 = sst [smem:[#allocation44_spill]] %s6287_s11 }
   0x8   :  { %6407 = sst [smem:[#allocation45_spill]] %s6291_s15 }
   0x9   :  { %6408 = sst [smem:[#allocation46_spill]] %s6292_s16 }
   0xa   :  { %6409 = sst [smem:[#allocation47_spill]] %s6293_s17 }
   0xb   :  { %6410 = sst [smem:[#allocation48_spill]] %s6294_s18 }
   0xc   :  { %6411 = sst [smem:[#allocation49_spill]] %s6295_s19 }
   0xd   :  { %6412 = sst [smem:[#allocation50_spill]] %s6296_s20 }
   0xe   :  { %26 = vsyncpa [#allocation5], 0 }
   0xf   :  { %28 = vsyncpa [#allocation5 + $0x1], 0 }
  0x10   :  { %29 = vsyncpa [#allocation7], 0 }
  0x11   :  { %31 = vsyncpa [#allocation7 + $0x1], 0  ;;  %s4578_s1 = smov 0   ;;  %s4580_s22 = smov 0  }
  0x12   :  { %s4582_s23 = smov 0   ;;  %s4584_s24 = smov 0  }
  0x13 LB: > { %6413 = sst [smem:[#allocation12_spill]] %s4446_s1  ;;  %s4599_s2 = sadd.s32 4294967295, %s4458_s24   ;;  %s4458_s24 = sphi %s4584_s24, %s6597_s24   ;;  %s4454_s23 = sphi %s4582_s23, %s6600_s23   ;;  %s4450_s22 = sphi %s4580_s22, %s6599_s22   ;;  %s4446_s1 = sphi %s4578_s1, %s6598_s1  }
  0x14   : > { %6414 = sst [smem:[#allocation13_spill]] %s4450_s22  ;;  %s6299_s25 = sadd.s32 4294967294, %s4458_s24  }
  0x15   : > { %6415 = sst [smem:[#allocation14_spill]] %s4454_s23  ;;  %s4603_s3 = sadd.s32 1, %s4458_s24  }
  0x16   : > { %6416 = sst [smem:[#allocation15_spill]] %s4458_s24  ;;  %s122_s26 = sadd.s32 1, %s4454_s23 }
  0x17   : > { %6417 = sst [smem:[#allocation16_spill]] %s4603_s3  ;;  %s119_s27 = ssub.s32 %s4458_s24, %s4603_s3 }
  0x18   : > { %p129_p0 = scmp.ne.s32.totalorder %s4454_s23, %s4450_s22  ;;  %p120_p1 = scmp.eq.s32.totalorder %s119_s27, 0 }
  0x19   : > { %p130_p2 = scmp.eq.s32.totalorder %s4458_s24, 0  ;;  %p453_p3 = scmp.eq.s32.totalorder %s4599_s2, 2 }
  0x1a   : > { %p458_p4 = scmp.ne.s32.totalorder %s4450_s22, %s4446_s1  ;;  %p459_p7 = scmp.eq.s32.totalorder %s6299_s25, 2 }
  0x1b   : > { %s4615_s28 = scalar_select %p120_p1, %s4454_s23, %s122_s26  }
  0x1c   : > { %p131_p5 = por %p130_p2, %p129_p0  ;;  %p4619_p6 = por %p453_p3, %p129_p0 }
  0x1d   : > { %6418 = sst [smem:[#allocation17_spill]] %s4615_s28  ;;  %p4625_p8 = por %p459_p7, %p458_p4 }
  0x1e   : > { %s6419_s4 = scalar_select %p4619_p6, 1, 0 }
  0x1f   : > { %s6421_s29 = scalar_select %p4625_p8, 1, 0 }
  0x20   : > { %6420 = sst [smem:[#allocation18_spill]] %s6419_s4  ;;  %p3637_p9 = scmp.ge.s32.totalorder %s4458_s24, 3 }
  0x21   : > { %6422 = sst [smem:[#allocation19_spill]] %s6421_s29 }
  0x22   : > { %564 = sbr.rel (%p3637_p9) target bundleno = 53 (0x35), region = 72 }
  0x29   : > { %592 = sbr.rel (!%p131_p5) target bundleno = 53 (0x35), region = 88  ;;  %s594_s30 = sand.u32 (%p131_p5), 1, %s4454_s23  }
  0x2a   : > { %s4043_s0 = sshll.u32 (%p131_p5), %s4458_s24, 4  ;;  %s3638_s21 = sshll.u32 (%p131_p5), %s594_s30, 5 }
  0x2b   : > { %s6423_s28 = sld [smem:[#allocation41_spill]] (%p131_p5)  ;;  %s596_s25 = scalar_lea.vmem (%p131_p5), [#allocation3], %s3638_s21 }
  0x31   : > { %s599_s3 = scalar_lea.vmem %s6423_s28, %s4043_s0 }
  0x32   : > { %v612_v0 = vld [vmem:[%s599_s3] sm:$0xff]  ;;  %v614_v1 = vld [vmem:[%s599_s3 + $0x8] sm:$0xff]  ;;  %v616_v2 = vld [vmem:[%s599_s3 + $0x30] sm:$0xff] }
  0x33   : > { %613 = vst [vmem:[%s596_s25] sm:$0xff] %v612_v0  ;;  %615 = vst [vmem:[%s596_s25 + $0x8] sm:$0xff] %v614_v1  ;;  %v618_v3 = vld [vmem:[%s599_s3 + $0x38] sm:$0xff] }
  0x34   : > { %617 = vst [vmem:[%s596_s25 + $0x10] sm:$0xff] %v616_v2  ;;  %619 = vst [vmem:[%s596_s25 + $0x18] sm:$0xff] %v618_v3 }
  0x35 PF: > { %p3641_p10 = scmp.ge.s32.totalorder %s4458_s24, 1  ;;  %p624_p11 = scmp.lt.s32.totalorder %s4458_s24, 4 }
  0x37   : > { %p625_p12 = pnand %p3641_p10, %p624_p11 }
  0x39   : > { %628 = sbr.rel (%p625_p12) target bundleno = 1552 (0x610), region = 111 }
  0x40   : > { %s4638_s28 = sand.u32 1, %s4450_s22   ;;  %s3645_s30 = sshll.u32 %s4599_s2, 2 }
  0x41   : > { %6424 = sst [smem:[#allocation20_spill]] %s4638_s28  ;;  %s3642_s0 = sshll.u32 %s4638_s28, 5 }
  0x42   : > { %s3643_s3 = sshll.u32 %s4638_s28, 6  ;;  %s3644_s25 = sshll.u32 %s4638_s28, 2 }
  0x43   : > { %p707_p13 = scmp.lt.s32.totalorder %s3645_s30, 11  ;;  %s4645_s21 = sshll.u32 %s4599_s2, 6 }
  0x44   : > { %p717_p0 = scmp.lt.s32.totalorder %s4645_s21, 191  ;;  %s6425_s23 = sld [smem:[#allocation38_spill]] }
  0x45   : > { %s6602_s30 = smov (!%p707_p13, %s3645_s30), 11  ;;  %s6426_s24 = sld [smem:[#allocation39_spill]] }
  0x46   : > { %s718_s18 = scalar_select %p717_p0, %s4645_s21, 191 }
  0x47   : > { %s6427_s17 = sld [smem:[#allocation40_spill]]  ;;  %s633_s15 = scalar_lea.vmem [#allocation3], %s3642_s0 }
  0x48   : > { %s3648_s28 = sshll.u32 %s718_s18, 3  ;;  %s4664_s5 = scalar_lea.vmem [#allocation4], %s3643_s3 }
  0x49   : > { %s4666_s11 = scalar_lea.vmem [#allocation6], %s3644_s25  ;;  %p3649_p1 = scmp.ne.s32.totalorder %s4599_s2, 0 }
  0x4a   : > { %s709_s22 = scalar_lea.vmem %s6425_s23, %s6602_s30  ;;  %vm730_vm0 = vcmask (!%p3649_p1), 523264   ;;  %v4460_v4 = vmov (!%p3649_p1), 0.0  }
  0x4b   : > { %s714_s20 = scalar_lea.vmem %s6426_s24, %s6602_s30  ;;  %729 = sbr.rel (%p3649_p1) target bundleno = 82 (0x52), region = 119  ;;  %731 = vst.msk [vmem:[#allocation2] sm:$0xff] (!%p3649_p1), %vm730_vm0, %v4460_v4  ;;  %732 = vst.msk [vmem:[#allocation2 + $0x8] sm:$0xff] (!%p3649_p1), %vm730_vm0, %v4460_v4 }
  0x4c   : > { %733 = vst.msk [vmem:[#allocation2 + $0x10] sm:$0xff] (!%p3649_p1), %vm730_vm0, %v4460_v4  ;;  %734 = vst.msk [vmem:[#allocation2 + $0x18] sm:$0xff] (!%p3649_p1), %vm730_vm0, %v4460_v4 }
  0x4d   : > { %s4662_s16 = scalar_lea.vmem %s6427_s17, %s3648_s28  ;;  %735 = vst.msk [vmem:[#allocation2 + $0x20] sm:$0xff] (!%p3649_p1), %vm730_vm0, %v4460_v4  ;;  %736 = vst.msk [vmem:[#allocation2 + $0x28] sm:$0xff] (!%p3649_p1), %vm730_vm0, %v4460_v4 }
  0x4e   : > { %737 = vst.msk [vmem:[#allocation2 + $0x30] sm:$0xff] (!%p3649_p1), %vm730_vm0, %v4460_v4  ;;  %738 = vst.msk [vmem:[#allocation2 + $0x38] sm:$0xff] (!%p3649_p1), %vm730_vm0, %v4460_v4 }
  0x52 PF: > { %v2096_v5 = vld [vmem:[%s6284_s8 + $0x10] sm:$0xff]  ;;  %v2094_v6 = vld [vmem:[%s6284_s8] sm:$0xff]  ;;  %v6350_v7 = vlaneseq  ;;  %v6353_v8 = vmov 0   ;;  %v2097_v9 = vld [vmem:[%s6284_s8 + $0x18] sm:$0xff]  ;;  %vm6344_vm1 = vcmask 130048   ;;  %p4021_p2 = scmp.ne.s32.totalorder %s4599_s2, 2 }
  0x53   : > { %4286 = vset.pattern.permute.xlu1 %v6353_v8  ;;  %4285 = vset.pattern.permute.xlu0 %v6353_v8  ;;  %v2095_v10 = vld [vmem:[%s6284_s8 + $0x8] sm:$0xff]  ;;  %v4287_v11 = vld [vmem:[%s633_s15 + $0x4] ss:$16 sps:$4 sm:$0xff]   ;;  %v4291_v14 = vld [vmem:[%s633_s15] ss:$16 sps:$4 sm:$0xff]   ;;  %s6576_s30 = sld [smem:[#allocation42_spill]] (!%p4021_p2) }
  0x54   : > { %2114 = vperm.xlu1 %4286, %v2096_v5   ;;  %2104 = vperm.xlu0 %4285, %v2094_v6   ;;  %v4684_v12 = vshrl.u32 %v6350_v7, 7  ;;  %v4289_v13 = vld [vmem:[%s633_s15 + $0xc] ss:$16 sps:$4 sm:$0xff]   ;;  %v4292_v15 = vld [vmem:[%s633_s15 + $0x8] ss:$16 sps:$4 sm:$0xff]   ;;  %v4293_v17 = vld [vmem:[%s6283_s7] sm:$0xff]  }
  0x55   : > { %1810 = vmatprep.mubr.bf16.mxu0 %v6353_v8  ;;  %1883 = vmatprep.mubr.bf16.mxu1 %v6353_v8  ;;  %v739_v18 = vld [vmem:[%s709_s22] sm:$0xf]  ;;  %v2099_v23 = vld [vmem:[%s6284_s8 + $0x28] sm:$0xff]  ;;  %v2101_v33 = vld [vmem:[%s6284_s8 + $0x38] sm:$0xff]  ;;  %v6351_v38 = vmov 1.0|1.0  }
  0x56   : > { %1778 = vmatprep.subr.bf16.mxu0 %v4287_v11  ;;  %v828_v16 = vsub.s32 1, %v4684_v12  ;;  %1851 = vmatprep.subr.bf16.mxu1 %v4289_v13  ;;  %v836_v19 = vsub.s32 3, %v4684_v12  ;;  %v740_v20 = vld [vmem:[%s714_s20] sm:$0xf]  ;;  %v4704_v21 = vadd.s32 8, %v4684_v12  ;;  %v824_v26 = vsub.s32 0, %v4684_v12 }
  0x57   : > { %1779 = vmatpush1.bf16.msra.mxu0 %v4291_v14  ;;  %1852 = vmatpush1.bf16.msra.mxu1 %v4292_v15  ;;  %v2098_v24 = vld [vmem:[%s6284_s8 + $0x20] sm:$0xff]  ;;  %v902_v25 = vadd.s32 64, %v740_v20  ;;  %v832_v30 = vsub.s32 2, %v4684_v12  ;;  %v2100_v34 = vld [vmem:[%s6284_s8 + $0x30] sm:$0xff]  ;;  %v4294_v35 = vld [vmem:[%s6283_s7 + $0x8] sm:$0xff]   ;;  %v4788_v41 = vadd.s32 16, %v4684_v12 }
  0x58   : > { %2119 = vperm.xlu1 %4286, %v2097_v9   ;;  %2109 = vperm.xlu0 %4285, %v2095_v10   ;;  %v4706_v22 = vrot.slane %v739_v18, %v828_v16  ;;  %v4716_v27 = vrot.slane %v739_v18, %v836_v19  ;;  %v4733_v31 = vrot.slane %v739_v18, %v824_v26  ;;  %v2225_v39 = vld [vmem:[%s6286_s10 + $0x8] sm:$0xff]  ;;  %v2224_v40 = vld [vmem:[%s6286_s10] sm:$0xff]  ;;  %v4800_v42 = vadd.s32 24, %v4684_v12  ;;  %v4295_v45 = vld [vmem:[%s6283_s7 + $0x10] sm:$0xff]   ;;  %s6508_s15 = sld [smem:[#allocation44_spill]]  ;;  %s6577_s4 = sld [smem:[#allocation43_spill]] (!%p4021_p2) }
  0x59   : > { %v4720_v28 = vrot.slane %v902_v25, %v828_v16  ;;  %v4722_v29 = vrot.slane %v902_v25, %v836_v19  ;;  %v4735_v32 = vrot.slane %v902_v25, %v824_v26  ;;  %v4761_v36 = vrot.slane %v739_v18, %v832_v30  ;;  %v2724_v43 = vld [vmem:[%s6289_s13 + $0x8] sm:$0xff]  ;;  %v2723_v44 = vld [vmem:[%s6289_s13] sm:$0xff]  ;;  %v2726_v46 = vld [vmem:[%s6289_s13 + $0x18] sm:$0xff]  ;;  %s6578_s25 = sld [smem:[#allocation45_spill]] (!%p4021_p2)  ;;  %s6579_s17 = sld [smem:[#allocation46_spill]] (!%p4021_p2) }
  0x5a   : > { %3818 = vmatmul.mubr.msk.bf16.vlgmr.msra.gmra.mrb[0].mxu0 %vm6344_vm1, %v4293_v17  ;;  %vm839_vm2 = vcmp.eq.s32.totalorder %v4684_v12, %v4706_v22  ;;  %vm6349_vm3 = vcmp.eq.s32.totalorder %v4704_v21, %v4706_v22  ;;  %3822 = vmatmul.mubr.msk.bf16.vlgmr.msra.gmra.mrb[0].mxu1 %vm6344_vm1, %v4293_v17  ;;  %vm6347_vm7 = vcmp.eq.s32.totalorder %v4684_v12, %v4716_v27  ;;  %v2725_v47 = vld [vmem:[%s6289_s13 + $0x10] sm:$0xff]  ;;  %v2836_v48 = vld [vmem:[%s6290_s14 + $0x8] sm:$0xff]  ;;  %v4878_v49 = vadd.s32 32, %v4684_v12  ;;  %v2835_v50 = vld [vmem:[%s6290_s14] sm:$0xff] }
  0x5b   : > { %1820 = vmatprep.mubr.bf16.mxu0 %v6353_v8  ;;  %vm920_vm4 = vcmp.eq.s32.totalorder %v4684_v12, %v4720_v28  ;;  %vm924_vm5 = vcmp.eq.s32.totalorder %v4704_v21, %v4720_v28  ;;  %vm922_vm8 = vcmp.eq.s32.totalorder %v4684_v12, %v4722_v29  ;;  %1893 = vmatprep.mubr.bf16.mxu1 %v6353_v8  ;;  %v4893_v51 = vadd.s32 40, %v4684_v12  ;;  %v4296_v52 = vld [vmem:[%s6283_s7 + $0x18] sm:$0xff]   ;;  %v2837_v53 = vld [vmem:[%s6290_s14 + $0x10] sm:$0xff]  ;;  %v2727_v54 = vld [vmem:[%s6289_s13 + $0x20] sm:$0xff] }
  0x5c   : > { %2129 = vperm.xlu1 %4286, %v2099_v23   ;;  %2124 = vperm.xlu0 %4285, %v2098_v24   ;;  %vm984_vm6 = vmor %vm839_vm2, %vm920_vm4  ;;  %vm6346_vm10 = vcmp.eq.s32.totalorder %v4704_v21, %v4716_v27  ;;  %vm926_vm11 = vcmp.eq.s32.totalorder %v4704_v21, %v4722_v29  ;;  %v4763_v37 = vrot.slane %v902_v25, %v832_v30  ;;  %v2838_v55 = vld [vmem:[%s6290_s14 + $0x18] sm:$0xff]  ;;  %v2728_v56 = vld [vmem:[%s6289_s13 + $0x28] sm:$0xff]  ;;  %v4966_v57 = vadd.s32 48, %v4684_v12 }
  0x5d   : > { %vm988_vm9 = vmor %vm6349_vm3, %vm924_vm5  ;;  %vm6328_vm14 = vcmp.eq.s32.totalorder %v4684_v12, %v4733_v31  ;;  %vm919_vm15 = vcmp.eq.s32.totalorder %v4684_v12, %v4735_v32  ;;  %vm6318_vm4 = vcmp.eq.s32.totalorder %v4704_v21, %v4733_v31  ;;  %vm923_vm5 = vcmp.eq.s32.totalorder %v4704_v21, %v4735_v32  ;;  %v2839_v58 = vld [vmem:[%s6290_s14 + $0x20] sm:$0xff]  ;;  %v2729_v59 = vld [vmem:[%s6289_s13 + $0x30] sm:$0xff] }
  0x5e   : > { %vm3830_vm12 = vmpackc.low %vm988_vm9, %vm984_vm6  ;;  %vm6319_vm9 = vcmp.eq.s32.totalorder %v4684_v12, %v4761_v36  ;;  %v4984_v60 = vadd.s32 56, %v4684_v12  ;;  %v2840_v61 = vld [vmem:[%s6290_s14 + $0x28] sm:$0xff]  ;;  %v2730_v62 = vld [vmem:[%s6289_s13 + $0x38] sm:$0xff]  ;;  %v814_v1 = vadd.s32 64, %v4684_v12  ;;  %v815_v3 = vadd.s32 72, %v4684_v12 }
  0x5f   : > { %3831 = vmatprep.subr.msk.bf16.mxu0 %vm3830_vm12, %v6351_v38  ;;  %vm986_vm13 = vmor %vm6347_vm7, %vm922_vm8  ;;  %v2842_v63 = vld [vmem:[%s6290_s14 + $0x38] sm:$0xff]  ;;  %v2841_v0 = vld [vmem:[%s6290_s14 + $0x30] sm:$0xff]  ;;  %v816_v11 = vadd.s32 80, %v4684_v12  ;;  %v817_v14 = vadd.s32 88, %v4684_v12  ;;  %v818_v20 = vadd.s32 96, %v4684_v12  ;;  %v819_v24 = vadd.s32 104, %v4684_v12 }
  0x60   : > { %2139 = vperm.xlu1 %4286, %v2101_v33   ;;  %2134 = vperm.xlu0 %4285, %v2100_v34   ;;  %vm990_vm0 = vmor %vm6346_vm10, %vm926_vm11  ;;  %vm921_vm11 = vcmp.eq.s32.totalorder %v4684_v12, %v4763_v37  ;;  %v758_v2 = vld [vmem:[%s4662_s16 + $0x88] sm:$0xff]  ;;  %v757_v4 = vld [vmem:[%s4662_s16 + $0x80] sm:$0xff]  ;;  %vm877_vm7 = vcmp.eq.s32.totalorder %v815_v3, %v4716_v27 }
  0x61   : > { %vm3862_vm6 = vmpackc.low %vm990_vm0, %vm986_vm13  ;;  %vm6320_vm13 = vcmp.eq.s32.totalorder %v4704_v21, %v4761_v36  ;;  %v790_v5 = vld [vmem:[%s4662_s16 + $0x188] sm:$0xff]  ;;  %v789_v6 = vld [vmem:[%s4662_s16 + $0x180] sm:$0xff] }
  0x62   : > { %3819 = vmatmul.mubr.msk.bf16.gmra.mrb[4].mxu0 %vm6344_vm1, %v4294_v35  ;;  %3863 = vmatprep.subr.msk.bf16.mxu1 %vm3862_vm6, %v6351_v38  ;;  %vm983_vm8 = vmor %vm6328_vm14, %vm919_vm15  ;;  %vm925_vm15 = vcmp.eq.s32.totalorder %v4704_v21, %v4763_v37  ;;  %vm6321_vm6 = vcmp.eq.s32.totalorder %v4788_v41, %v4706_v22  ;;  %vm6334_vm14 = vcmp.eq.s32.totalorder %v4878_v49, %v4716_v27  ;;  %v742_v9 = vld [vmem:[%s4662_s16 + $0x8] sm:$0xff]  ;;  %v741_v10 = vld [vmem:[%s4662_s16] sm:$0xff] }
  0x63   : > { %1830 = vmatprep.mubr.bf16.mxu0 %v6353_v8  ;;  %vm987_vm12 = vmor %vm6318_vm4, %vm923_vm5  ;;  %3823 = vmatmul.mubr.msk.bf16.gmra.mrb[4].mxu1 %vm6344_vm1, %v4294_v35  ;;  %vm928_vm4 = vcmp.eq.s32.totalorder %v4788_v41, %v4720_v28  ;;  %v774_v13 = vld [vmem:[%s4662_s16 + $0x108] sm:$0xff]  ;;  %v773_v15 = vld [vmem:[%s4662_s16 + $0x100] sm:$0xff]  ;;  %v820_v35 = vadd.s32 112, %v4684_v12 }
  0x64   : > { %2233 = vperm.xlu1 %4286, %v2225_v39   ;;  %2228 = vperm.xlu0 %4285, %v2224_v40   ;;  %vm3832_vm0 = vmpackc.low %vm987_vm12, %vm983_vm8  ;;  %vm6322_vm12 = vcmp.eq.s32.totalorder %v4800_v42, %v4706_v22  ;;  %v760_v16 = vld [vmem:[%s4662_s16 + $0x98] sm:$0xff]  ;;  %v759_v17 = vld [vmem:[%s4662_s16 + $0x90] sm:$0xff]  ;;  %v821_v40 = vadd.s32 120, %v4684_v12 }
  0x65   : > { %1903 = vmatprep.mubr.bf16.mxu1 %v6353_v8  ;;  %3833 = vmatpush1.bf16.msk.msra.mxu0 %vm3832_vm0, %v6351_v38  ;;  %vm985_vm5 = vmor %vm6319_vm9, %vm921_vm11  ;;  %vm932_vm11 = vcmp.eq.s32.totalorder %v4800_v42, %v4720_v28  ;;  %v792_v18 = vld [vmem:[%s4662_s16 + $0x198] sm:$0xff]  ;;  %v791_v19 = vld [vmem:[%s4662_s16 + $0x190] sm:$0xff] }
  0x66   : > { %vm989_vm8 = vmor %vm6320_vm13, %vm925_vm15  ;;  %vm6325_vm15 = vcmp.eq.s32.totalorder %v4788_v41, %v4716_v27  ;;  %vm930_vm13 = vcmp.eq.s32.totalorder %v4788_v41, %v4722_v29  ;;  %v744_v23 = vld [vmem:[%s4662_s16 + $0x18] sm:$0xff]  ;;  %v743_v25 = vld [vmem:[%s4662_s16 + $0x10] sm:$0xff] }
  0x67   : > { %vm3864_vm0 = vmpackc.low %vm989_vm8, %vm985_vm5  ;;  %vm6323_vm8 = vcmp.eq.s32.totalorder %v4800_v42, %v4716_v27  ;;  %v776_v26 = vld [vmem:[%s4662_s16 + $0x118] sm:$0xff]  ;;  %v775_v30 = vld [vmem:[%s4662_s16 + $0x110] sm:$0xff] }
  0x68   : > { %2738 = vperm.xlu1 %4286, %v2724_v43   ;;  %2733 = vperm.xlu0 %4285, %v2723_v44   ;;  %vm992_vm9 = vmor %vm6321_vm6, %vm928_vm4  ;;  %vm934_vm4 = vcmp.eq.s32.totalorder %v4800_v42, %v4722_v29  ;;  %v762_v33 = vld [vmem:[%s4662_s16 + $0xa8] sm:$0xff]  ;;  %v761_v34 = vld [vmem:[%s4662_s16 + $0xa0] sm:$0xff] }
  0x69   : > { %3865 = vmatpush1.bf16.msk.msra.mxu1 %vm3864_vm0, %v6351_v38  ;;  %vm996_vm5 = vmor %vm6322_vm12, %vm932_vm11  ;;  %vm6324_vm11 = vcmp.eq.s32.totalorder %v4788_v41, %v4733_v31  ;;  %vm927_vm12 = vcmp.eq.s32.totalorder %v4788_v41, %v4735_v32  ;;  %v794_v39 = vld [vmem:[%s4662_s16 + $0x1a8] sm:$0xff]  ;;  %v793_v43 = vld [vmem:[%s4662_s16 + $0x1a0] sm:$0xff] }
  0x6a   : > { %3820 = vmatmul.mubr.msk.bf16.gmra.mrb[8].mxu0 %vm6344_vm1, %v4295_v45  ;;  %vm3834_vm0 = vmpackc.low %vm996_vm5, %vm992_vm9  ;;  %vm6326_vm5 = vcmp.eq.s32.totalorder %v4800_v42, %v4733_v31  ;;  %v746_v44 = vld [vmem:[%s4662_s16 + $0x28] sm:$0xff] }
  0x6b   : > { %1840 = vmatprep.mubr.bf16.mxu0 %v6353_v8  ;;  %3835 = vmatprep.subr.msk.bf16.mxu0 %vm3834_vm0, %v6351_v38  ;;  %vm994_vm6 = vmor %vm6325_vm15, %vm930_vm13  ;;  %vm931_vm0 = vcmp.eq.s32.totalorder %v4800_v42, %v4735_v32 }
  0x6c   : > { %2748 = vperm.xlu1 %4286, %v2726_v46   ;;  %2743 = vperm.xlu0 %4285, %v2725_v47   ;;  %vm998_vm9 = vmor %vm6323_vm8, %vm934_vm4  ;;  %vm6327_vm8 = vcmp.eq.s32.totalorder %v4788_v41, %v4761_v36  ;;  %v778_v46 = vld [vmem:[%s4662_s16 + $0x128] sm:$0xff]  ;;  %v763_v47 = vld [vmem:[%s4662_s16 + $0xb0] sm:$0xff] }
  0x6d   : > { %3824 = vmatmul.mubr.msk.bf16.gmra.mrb[8].mxu1 %vm6344_vm1, %v4295_v45  ;;  %vm3866_vm13 = vmpackc.low %vm998_vm9, %vm994_vm6  ;;  %vm929_vm6 = vcmp.eq.s32.totalorder %v4788_v41, %v4763_v37  ;;  %v745_v45 = vld [vmem:[%s4662_s16 + $0x20] sm:$0xff] }
  0x6e   : > { %1913 = vmatprep.mubr.bf16.mxu1 %v6353_v8  ;;  %3867 = vmatprep.subr.msk.bf16.mxu1 %vm3866_vm13, %v6351_v38  ;;  %vm991_vm4 = vmor %vm6324_vm11, %vm927_vm12  ;;  %vm6329_vm12 = vcmp.eq.s32.totalorder %v4800_v42, %v4761_v36  ;;  %vm933_vm13 = vcmp.eq.s32.totalorder %v4800_v42, %v4763_v37 }
  0x6f   : > { %vm995_vm9 = vmor %vm6326_vm5, %vm931_vm0  ;;  %vm6331_vm0 = vcmp.eq.s32.totalorder %v4878_v49, %v4706_v22  ;;  %vm936_vm5 = vcmp.eq.s32.totalorder %v4878_v49, %v4720_v28 }
  0x70   : > { %2850 = vperm.xlu1 %4286, %v2836_v48   ;;  %vm3836_vm11 = vmpackc.low %vm995_vm9, %vm991_vm4  ;;  %2845 = vperm.xlu0 %4285, %v2835_v50   ;;  %v796_v48 = vld [vmem:[%s4662_s16 + $0x1b8] sm:$0xff]  ;;  %v795_v50 = vld [vmem:[%s4662_s16 + $0x1b0] sm:$0xff] }
  0x71   : > { %3837 = vmatpush1.bf16.msk.msra.mxu0 %vm3836_vm11, %v6351_v38  ;;  %vm993_vm15 = vmor %vm6327_vm8, %vm929_vm6  ;;  %vm6330_vm11 = vcmp.eq.s32.totalorder %v4893_v51, %v4706_v22  ;;  %vm940_vm6 = vcmp.eq.s32.totalorder %v4893_v51, %v4720_v28 }
  0x72   : > { %vm997_vm4 = vmor %vm6329_vm12, %vm933_vm13  ;;  %3821 = vmatmul.mubr.msk.bf16.gmra.mrb[12].mxu0 %vm6344_vm1, %v4296_v52  ;;  %vm938_vm13 = vcmp.eq.s32.totalorder %v4878_v49, %v4722_v29 }
  0x73   : > { %vm3868_vm9 = vmpackc.low %vm997_vm4, %vm993_vm15  ;;  %vm6332_vm15 = vcmp.eq.s32.totalorder %v4893_v51, %v4716_v27  ;;  %vm942_vm4 = vcmp.eq.s32.totalorder %v4893_v51, %v4722_v29  ;;  %1980 = vmatprep.mubr.bf16.mxu0 %v6353_v8 }
  0x74   : > { %2855 = vperm.xlu1 %4286, %v2837_v53   ;;  %3869 = vmatpush1.bf16.msk.msra.mxu1 %vm3868_vm9, %v6351_v38  ;;  %vm1000_vm8 = vmor %vm6331_vm0, %vm936_vm5  ;;  %vm6333_vm9 = vcmp.eq.s32.totalorder %v4878_v49, %v4733_v31  ;;  %v4298_v53 = vld [vmem:[%s6282_s6 + $0x8] sm:$0xff]  }
  0x75   : > { %2753 = vperm.xlu0 %4285, %v2727_v54   ;;  %vm1004_vm12 = vmor %vm6330_vm11, %vm940_vm6  ;;  %3825 = vmatmul.mubr.msk.bf16.gmra.mrb[12].mxu1 %vm6344_vm1, %v4296_v52  ;;  %vm935_vm11 = vcmp.eq.s32.totalorder %v4878_v49, %v4735_v32  ;;  %v747_v52 = vld [vmem:[%s4662_s16 + $0x30] sm:$0xff]  ;;  %v780_v54 = vld [vmem:[%s4662_s16 + $0x138] sm:$0xff] }
  0x76   : > { %vm3838_vm5 = vmpackc.low %vm1004_vm12, %vm1000_vm8  ;;  %vm6337_vm8 = vcmp.eq.s32.totalorder %v4893_v51, %v4733_v31  ;;  %vm939_vm12 = vcmp.eq.s32.totalorder %v4893_v51, %v4735_v32  ;;  %2053 = vmatprep.mubr.bf16.mxu1 %v6353_v8 }
  0x77   : > { %3839 = vmatprep.subr.msk.bf16.mxu0 %vm3838_vm5, %v6351_v38  ;;  %vm1002_vm6 = vmor %vm6334_vm14, %vm938_vm13  ;;  %vm6343_vm14 = vcmp.eq.s32.totalorder %v4966_v57, %v4706_v22 }
  0x78   : > { %vm1006_vm0 = vmor %vm6332_vm15, %vm942_vm4  ;;  %2860 = vperm.xlu1 %4286, %v2838_v55   ;;  %vm937_vm4 = vcmp.eq.s32.totalorder %v4878_v49, %v4763_v37  ;;  %vm941_vm15 = vcmp.eq.s32.totalorder %v4893_v51, %v4763_v37  ;;  %v779_v55 = vld [vmem:[%s4662_s16 + $0x130] sm:$0xff] }
  0x79   : > { %2758 = vperm.xlu0 %4285, %v2728_v56   ;;  %vm3870_vm5 = vmpackc.low %vm1006_vm0, %vm1002_vm6  ;;  %vm6335_vm0 = vcmp.eq.s32.totalorder %v4878_v49, %v4761_v36  ;;  %v766_v56 = vld [vmem:[%s4662_s16 + $0xc8] sm:$0xff] }
  0x7a   : > { %3871 = vmatprep.subr.msk.bf16.mxu1 %vm3870_vm5, %v6351_v38  ;;  %vm999_vm13 = vmor %vm6333_vm9, %vm935_vm11  ;;  %vm6336_vm5 = vcmp.eq.s32.totalorder %v4893_v51, %v4761_v36 }
  0x7b   : > { %vm1003_vm6 = vmor %vm6337_vm8, %vm939_vm12  ;;  %vm944_vm12 = vcmp.eq.s32.totalorder %v4966_v57, %v4720_v28 }
  0x7c   : > { %vm3840_vm11 = vmpackc.low %vm1003_vm6, %vm999_vm13  ;;  %2865 = vperm.xlu1 %4286, %v2839_v58   ;;  %vm6338_vm6 = vcmp.eq.s32.totalorder %v4984_v60, %v4706_v22  ;;  %v765_v58 = vld [vmem:[%s4662_s16 + $0xc0] sm:$0xff] }
  0x7d   : > { %2763 = vperm.xlu0 %4285, %v2729_v59   ;;  %3841 = vmatpush1.bf16.msk.msra.mxu0 %vm3840_vm11, %v6351_v38  ;;  %vm1001_vm9 = vmor %vm6335_vm0, %vm937_vm4  ;;  %vm948_vm4 = vcmp.eq.s32.totalorder %v4984_v60, %v4720_v28  ;;  %v4299_v59 = vld [vmem:[%s6282_s6 + $0x10] sm:$0xff]  }
  0x7e   : > { %vm1005_vm13 = vmor %vm6336_vm5, %vm941_vm15  ;;  %vm6340_vm15 = vcmp.eq.s32.totalorder %v4966_v57, %v4716_v27  ;;  %vm946_vm5 = vcmp.eq.s32.totalorder %v4966_v57, %v4722_v29 }
  0x7f   : > { %vm3872_vm11 = vmpackc.low %vm1005_vm13, %vm1001_vm9  ;;  %vm6339_vm9 = vcmp.eq.s32.totalorder %v4984_v60, %v4716_v27  ;;  %vm950_vm13 = vcmp.eq.s32.totalorder %v4984_v60, %v4722_v29 }
  0x80   : > { %3873 = vmatpush1.bf16.msk.msra.mxu1 %vm3872_vm11, %v6351_v38  ;;  %vm1008_vm0 = vmor %vm6343_vm14, %vm944_vm12  ;;  %2870 = vperm.xlu1 %4286, %v2840_v61   ;;  %vm6341_vm11 = vcmp.eq.s32.totalorder %v4966_v57, %v4733_v31  ;;  %v798_v61 = vld [vmem:[%s4662_s16 + $0x1c8] sm:$0xff] }
  0x81   : > { %vm1012_vm8 = vmor %vm6338_vm6, %vm948_vm4  ;;  %2768 = vperm.xlu0 %4285, %v2730_v62   ;;  %vm943_vm6 = vcmp.eq.s32.totalorder %v4966_v57, %v4735_v32  ;;  %v797_v62 = vld [vmem:[%s4662_s16 + $0x1c0] sm:$0xff] }
  0x82   : > { %vm3842_vm12 = vmpackc.low %vm1012_vm8, %vm1008_vm0  ;;  %vm6342_vm0 = vcmp.eq.s32.totalorder %v4984_v60, %v4733_v31 }
  0x83   : > { %3843 = vmatprep.subr.msk.bf16.mxu0 %vm3842_vm12, %v6351_v38  ;;  %vm1010_vm4 = vmor %vm6340_vm15, %vm946_vm5  ;;  %vm947_vm12 = vcmp.eq.s32.totalorder %v4984_v60, %v4735_v32  ;;  %vm945_vm15 = vcmp.eq.s32.totalorder %v4966_v57, %v4763_v37 }
  0x84   : > { %vm1014_vm8 = vmor %vm6339_vm9, %vm950_vm13  ;;  %2880 = vperm.xlu1 %4286, %v2842_v63   ;;  %vm6345_vm9 = vcmp.eq.s32.totalorder %v4966_v57, %v4761_v36  ;;  %v750_v63 = vld [vmem:[%s4662_s16 + $0x48] sm:$0xff] }
  0x85   : > { %vm3874_vm5 = vmpackc.low %vm1014_vm8, %vm1010_vm4  ;;  %2875 = vperm.xlu0 %4285, %v2841_v0   ;;  %vm6348_vm8 = vcmp.eq.s32.totalorder %v4984_v60, %v4761_v36  ;;  %v749_v0 = vld [vmem:[%s4662_s16 + $0x40] sm:$0xff] }
  0x86   : > { %3875 = vmatprep.subr.msk.bf16.mxu1 %vm3874_vm5, %v6351_v38  ;;  %vm1007_vm13 = vmor %vm6341_vm11, %vm943_vm6  ;;  %vm949_vm6 = vcmp.eq.s32.totalorder %v4984_v60, %v4763_v37 }
  0x87   : > { %vm1011_vm4 = vmor %vm6342_vm0, %vm947_vm12  ;;  %vm871_vm12 = vcmp.eq.s32.totalorder %v814_v1, %v4706_v22  ;;  %vm952_vm0 = vcmp.eq.s32.totalorder %v814_v1, %v4720_v28 }
  0x88   : > { %vm3844_vm5 = vmpackc.low %vm1011_vm4, %vm1007_vm13  ;;  %1341 = vperm.xlu1 %4286, %v758_v2   ;;  %vm875_vm13 = vcmp.eq.s32.totalorder %v815_v3, %v4706_v22  ;;  %vm956_vm4 = vcmp.eq.s32.totalorder %v815_v3, %v4720_v28 }
  0x89   : > { %3845 = vmatpush1.bf16.msk.msra.mxu0 %vm3844_vm5, %v6351_v38  ;;  %vm1009_vm11 = vmor %vm6345_vm9, %vm945_vm15  ;;  %1338 = vperm.xlu0 %4285, %v757_v4   ;;  %vm873_vm15 = vcmp.eq.s32.totalorder %v814_v1, %v4716_v27  ;;  %vm954_vm9 = vcmp.eq.s32.totalorder %v814_v1, %v4722_v29  ;;  %v782_v4 = vld [vmem:[%s4662_s16 + $0x148] sm:$0xff] }
  0x8a   : > { %vm1013_vm14 = vmor %vm6348_vm8, %vm949_vm6  ;;  %vm958_vm6 = vcmp.eq.s32.totalorder %v815_v3, %v4722_v29 }
  0x8b   : > { %vm3876_vm1 = vmpackc.low %vm1013_vm14, %vm1009_vm11  ;;  %vm951_vm11 = vcmp.eq.s32.totalorder %v814_v1, %v4735_v32 }
  0x8c   : > { %3877 = vmatpush1.bf16.msk.msra.mxu1 %vm3876_vm1, %v6351_v38  ;;  %vm1016_vm5 = vmor %vm871_vm12, %vm952_vm0  ;;  %1437 = vperm.xlu1 %4286, %v790_v5   ;;  %vm870_vm1 = vcmp.eq.s32.totalorder %v814_v1, %v4733_v31  ;;  %vm874_vm12 = vcmp.eq.s32.totalorder %v815_v3, %v4733_v31  ;;  %v781_v5 = vld [vmem:[%s4662_s16 + $0x140] sm:$0xff] }
  0x8d   : > { %vm1020_vm10 = vmor %vm875_vm13, %vm956_vm4  ;;  %1434 = vperm.xlu0 %4285, %v789_v6   ;;  %vm955_vm13 = vcmp.eq.s32.totalorder %v815_v3, %v4735_v32 }
  0x8e   : > { %vm3846_vm8 = vmpackc.low %vm1020_vm10, %vm1016_vm5  ;;  %vm876_vm5 = vcmp.eq.s32.totalorder %v815_v3, %v4761_v36 }
  0x8f   : > { %3847 = vmatprep.subr.msk.bf16.mxu0 %vm3846_vm8, %v6351_v38  ;;  %vm1018_vm14 = vmor %vm873_vm15, %vm954_vm9  ;;  %vm872_vm9 = vcmp.eq.s32.totalorder %v814_v1, %v4761_v36  ;;  %vm953_vm8 = vcmp.eq.s32.totalorder %v814_v1, %v4763_v37  ;;  %vm957_vm15 = vcmp.eq.s32.totalorder %v815_v3, %v4763_v37  ;;  %v4300_v1 = vld [vmem:[%s6282_s6 + $0x18] sm:$0xff]  }
  0x90   : > { %vm1022_vm0 = vmor %vm877_vm7, %vm958_vm6  ;;  %1293 = vperm.xlu1 %4286, %v742_v9  }
  0x91   : > { %vm3878_vm4 = vmpackc.low %vm1022_vm0, %vm1018_vm14  ;;  %1290 = vperm.xlu0 %4285, %v741_v10   ;;  %v768_v10 = vld [vmem:[%s4662_s16 + $0xd8] sm:$0xff] }
  0x92   : > { %3879 = vmatprep.subr.msk.bf16.mxu1 %vm3878_vm4, %v6351_v38  ;;  %vm1015_vm10 = vmor %vm870_vm1, %vm951_vm11  ;;  %vm879_vm1 = vcmp.eq.s32.totalorder %v816_v11, %v4706_v22  ;;  %vm960_vm11 = vcmp.eq.s32.totalorder %v816_v11, %v4720_v28 }
  0x93   : > { %vm1019_vm7 = vmor %vm874_vm12, %vm955_vm13  ;;  %vm883_vm12 = vcmp.eq.s32.totalorder %v817_v14, %v4706_v22  ;;  %vm964_vm13 = vcmp.eq.s32.totalorder %v817_v14, %v4720_v28 }
  0x94   : > { %vm3848_vm6 = vmpackc.low %vm1019_vm7, %vm1015_vm10  ;;  %1389 = vperm.xlu1 %4286, %v774_v13  }
  0x95   : > { %3849 = vmatpush1.bf16.msk.msra.mxu0 %vm3848_vm6, %v6351_v38  ;;  %vm1017_vm14 = vmor %vm872_vm9, %vm953_vm8  ;;  %1386 = vperm.xlu0 %4285, %v773_v15   ;;  %vm881_vm9 = vcmp.eq.s32.totalorder %v816_v11, %v4716_v27  ;;  %vm962_vm8 = vcmp.eq.s32.totalorder %v816_v11, %v4722_v29  ;;  %vm885_vm6 = vcmp.eq.s32.totalorder %v817_v14, %v4716_v27  ;;  %v800_v15 = vld [vmem:[%s4662_s16 + $0x1d8] sm:$0xff] }
  0x96   : > { %vm1021_vm0 = vmor %vm876_vm5, %vm957_vm15  ;;  %vm966_vm5 = vcmp.eq.s32.totalorder %v817_v14, %v4722_v29 }
  0x97   : > { %vm3880_vm4 = vmpackc.low %vm1021_vm0, %vm1017_vm14 }
  0x98   : > { %3881 = vmatpush1.bf16.msk.msra.mxu1 %vm3880_vm4, %v6351_v38  ;;  %vm1024_vm10 = vmor %vm879_vm1, %vm960_vm11  ;;  %1347 = vperm.xlu1 %4286, %v760_v16   ;;  %vm878_vm1 = vcmp.eq.s32.totalorder %v816_v11, %v4733_v31  ;;  %vm959_vm11 = vcmp.eq.s32.totalorder %v816_v11, %v4735_v32  ;;  %v799_v16 = vld [vmem:[%s4662_s16 + $0x1d0] sm:$0xff] }
  0x99   : > { %vm1028_vm7 = vmor %vm883_vm12, %vm964_vm13  ;;  %1344 = vperm.xlu0 %4285, %v759_v17   ;;  %vm882_vm12 = vcmp.eq.s32.totalorder %v817_v14, %v4733_v31  ;;  %vm963_vm13 = vcmp.eq.s32.totalorder %v817_v14, %v4735_v32 }
  0x9a   : > { %vm3850_vm15 = vmpackc.low %vm1028_vm7, %vm1024_vm10 }
  0x9b   : > { %3851 = vmatprep.subr.msk.bf16.mxu0 %vm3850_vm15, %v6351_v38  ;;  %vm1026_vm14 = vmor %vm881_vm9, %vm962_vm8  ;;  %vm880_vm9 = vcmp.eq.s32.totalorder %v816_v11, %v4761_v36  ;;  %vm961_vm8 = vcmp.eq.s32.totalorder %v816_v11, %v4763_v37  ;;  %v767_v11 = vld [vmem:[%s4662_s16 + $0xd0] sm:$0xff] }
  0x9c   : > { %vm1030_vm0 = vmor %vm885_vm6, %vm966_vm5  ;;  %1443 = vperm.xlu1 %4286, %v792_v18   ;;  %vm884_vm6 = vcmp.eq.s32.totalorder %v817_v14, %v4761_v36  ;;  %vm965_vm5 = vcmp.eq.s32.totalorder %v817_v14, %v4763_v37 }
  0x9d   : > { %vm3882_vm4 = vmpackc.low %vm1030_vm0, %vm1026_vm14  ;;  %1440 = vperm.xlu0 %4285, %v791_v19   ;;  %v752_v19 = vld [vmem:[%s4662_s16 + $0x58] sm:$0xff] }
  0x9e   : > { %3883 = vmatprep.subr.msk.bf16.mxu1 %vm3882_vm4, %v6351_v38  ;;  %vm1023_vm10 = vmor %vm878_vm1, %vm959_vm11  ;;  %vm887_vm1 = vcmp.eq.s32.totalorder %v818_v20, %v4706_v22  ;;  %vm968_vm11 = vcmp.eq.s32.totalorder %v818_v20, %v4720_v28 }
  0x9f   : > { %vm1027_vm7 = vmor %vm882_vm12, %vm963_vm13  ;;  %vm891_vm12 = vcmp.eq.s32.totalorder %v819_v24, %v4706_v22  ;;  %vm972_vm13 = vcmp.eq.s32.totalorder %v819_v24, %v4720_v28 }
  0xa0   : > { %vm3852_vm15 = vmpackc.low %vm1027_vm7, %vm1023_vm10  ;;  %1299 = vperm.xlu1 %4286, %v744_v23  }
  0xa1   : > { %3853 = vmatpush1.bf16.msk.msra.mxu0 %vm3852_vm15, %v6351_v38  ;;  %vm1025_vm14 = vmor %vm880_vm9, %vm961_vm8  ;;  %1296 = vperm.xlu0 %4285, %v743_v25   ;;  %vm889_vm9 = vcmp.eq.s32.totalorder %v818_v20, %v4716_v27  ;;  %vm970_vm8 = vcmp.eq.s32.totalorder %v818_v20, %v4722_v29  ;;  %vm893_vm15 = vcmp.eq.s32.totalorder %v819_v24, %v4716_v27  ;;  %v784_v25 = vld [vmem:[%s4662_s16 + $0x158] sm:$0xff] }
  0xa2   : > { %vm1029_vm0 = vmor %vm884_vm6, %vm965_vm5  ;;  %vm974_vm6 = vcmp.eq.s32.totalorder %v819_v24, %v4722_v29 }
  0xa3   : > { %vm3884_vm4 = vmpackc.low %vm1029_vm0, %vm1025_vm14 }
  0xa4   : > { %3885 = vmatpush1.bf16.msk.msra.mxu1 %vm3884_vm4, %v6351_v38  ;;  %vm1032_vm10 = vmor %vm887_vm1, %vm968_vm11  ;;  %1395 = vperm.xlu1 %4286, %v776_v26   ;;  %vm886_vm1 = vcmp.eq.s32.totalorder %v818_v20, %v4733_v31  ;;  %vm967_vm11 = vcmp.eq.s32.totalorder %v818_v20, %v4735_v32  ;;  %v783_v26 = vld [vmem:[%s4662_s16 + $0x150] sm:$0xff] }
  0xa5   : > { %vm1036_vm7 = vmor %vm891_vm12, %vm972_vm13  ;;  %1392 = vperm.xlu0 %4285, %v775_v30   ;;  %vm890_vm12 = vcmp.eq.s32.totalorder %v819_v24, %v4733_v31  ;;  %vm971_vm13 = vcmp.eq.s32.totalorder %v819_v24, %v4735_v32 }
  0xa6   : > { %vm3854_vm5 = vmpackc.low %vm1036_vm7, %vm1032_vm10 }
  0xa7   : > { %3855 = vmatprep.subr.msk.bf16.mxu0 %vm3854_vm5, %v6351_v38  ;;  %vm1034_vm14 = vmor %vm889_vm9, %vm970_vm8  ;;  %vm888_vm9 = vcmp.eq.s32.totalorder %v818_v20, %v4761_v36  ;;  %vm969_vm8 = vcmp.eq.s32.totalorder %v818_v20, %v4763_v37  ;;  %v751_v20 = vld [vmem:[%s4662_s16 + $0x50] sm:$0xff] }
  0xa8   : > { %vm1038_vm0 = vmor %vm893_vm15, %vm974_vm6  ;;  %1353 = vperm.xlu1 %4286, %v762_v33   ;;  %vm892_vm15 = vcmp.eq.s32.totalorder %v819_v24, %v4761_v36  ;;  %vm973_vm6 = vcmp.eq.s32.totalorder %v819_v24, %v4763_v37 }
  0xa9   : > { %vm3886_vm4 = vmpackc.low %vm1038_vm0, %vm1034_vm14  ;;  %1350 = vperm.xlu0 %4285, %v761_v34   ;;  %v770_v34 = vld [vmem:[%s4662_s16 + $0xe8] sm:$0xff] }
  0xaa   : > { %3887 = vmatprep.subr.msk.bf16.mxu1 %vm3886_vm4, %v6351_v38  ;;  %vm1031_vm10 = vmor %vm886_vm1, %vm967_vm11  ;;  %vm895_vm1 = vcmp.eq.s32.totalorder %v820_v35, %v4706_v22  ;;  %vm976_vm11 = vcmp.eq.s32.totalorder %v820_v35, %v4720_v28 }
  0xab   : > { %vm1035_vm7 = vmor %vm890_vm12, %vm971_vm13  ;;  %vm899_vm12 = vcmp.eq.s32.totalorder %v821_v40, %v4706_v22  ;;  %vm980_vm13 = vcmp.eq.s32.totalorder %v821_v40, %v4720_v28  ;;  %v777_v28 = vld [vmem:[%s4662_s16 + $0x120] sm:$0xff] }
  0xac   : > { %vm3856_vm5 = vmpackc.low %vm1035_vm7, %vm1031_vm10  ;;  %1449 = vperm.xlu1 %4286, %v794_v39  }
  0xad   : > { %3857 = vmatpush1.bf16.msk.msra.mxu0 %vm3856_vm5, %v6351_v38  ;;  %vm1033_vm14 = vmor %vm888_vm9, %vm969_vm8  ;;  %1446 = vperm.xlu0 %4285, %v793_v43   ;;  %vm897_vm9 = vcmp.eq.s32.totalorder %v820_v35, %v4716_v27  ;;  %vm978_vm8 = vcmp.eq.s32.totalorder %v820_v35, %v4722_v29  ;;  %vm901_vm5 = vcmp.eq.s32.totalorder %v821_v40, %v4716_v27  ;;  %v802_v43 = vld [vmem:[%s4662_s16 + $0x1e8] sm:$0xff] }
  0xae   : > { %vm1037_vm0 = vmor %vm892_vm15, %vm973_vm6  ;;  %vm982_vm15 = vcmp.eq.s32.totalorder %v821_v40, %v4722_v29  ;;  %v764_v29 = vld [vmem:[%s4662_s16 + $0xb8] sm:$0xff] }
  0xaf   : > { %vm3888_vm4 = vmpackc.low %vm1037_vm0, %vm1033_vm14 }
  0xb0   : > { %3889 = vmatpush1.bf16.msk.msra.mxu1 %vm3888_vm4, %v6351_v38  ;;  %vm1040_vm10 = vmor %vm895_vm1, %vm976_vm11  ;;  %1305 = vperm.xlu1 %4286, %v746_v44   ;;  %vm894_vm1 = vcmp.eq.s32.totalorder %v820_v35, %v4733_v31  ;;  %vm975_vm11 = vcmp.eq.s32.totalorder %v820_v35, %v4735_v32  ;;  %v801_v44 = vld [vmem:[%s4662_s16 + $0x1e0] sm:$0xff] }
  0xb1   : > { %vm1044_vm7 = vmor %vm899_vm12, %vm980_vm13  ;;  %1302 = vperm.xlu0 %4285, %v745_v45   ;;  %vm898_vm12 = vcmp.eq.s32.totalorder %v821_v40, %v4733_v31  ;;  %vm979_vm13 = vcmp.eq.s32.totalorder %v821_v40, %v4735_v32  ;;  %v4297_v32 = vld [vmem:[%s6282_s6] sm:$0xff]  }
  0xb2   : > { %vm3858_vm6 = vmpackc.low %vm1044_vm7, %vm1040_vm10 }
  0xb3   : > { %3859 = vmatprep.subr.msk.bf16.mxu0 %vm3858_vm6, %v6351_v38  ;;  %vm1042_vm14 = vmor %vm897_vm9, %vm978_vm8  ;;  %vm896_vm9 = vcmp.eq.s32.totalorder %v820_v35, %v4761_v36  ;;  %vm977_vm8 = vcmp.eq.s32.totalorder %v820_v35, %v4763_v37  ;;  %v769_v35 = vld [vmem:[%s4662_s16 + $0xe0] sm:$0xff] }
  0xb4   : > { %vm1046_vm0 = vmor %vm901_vm5, %vm982_vm15  ;;  %1401 = vperm.xlu1 %4286, %v778_v46   ;;  %vm900_vm5 = vcmp.eq.s32.totalorder %v821_v40, %v4761_v36  ;;  %vm981_vm15 = vcmp.eq.s32.totalorder %v821_v40, %v4763_v37  ;;  %v748_v37 = vld [vmem:[%s4662_s16 + $0x38] sm:$0xff]  ;;  %v754_v46 = vld [vmem:[%s4662_s16 + $0x68] sm:$0xff] }
  0xb5   : > { %vm3890_vm4 = vmpackc.low %vm1046_vm0, %vm1042_vm14  ;;  %1398 = vperm.xlu0 %4285, %v777_v28  }
  0xb6   : > { %3891 = vmatprep.subr.msk.bf16.mxu1 %vm3890_vm4, %v6351_v38  ;;  %vm1039_vm10 = vmor %vm894_vm1, %vm975_vm11 }
  0xb7   : > { %vm1043_vm7 = vmor %vm898_vm12, %vm979_vm13 }
  0xb8   : > { %vm3860_vm6 = vmpackc.low %vm1043_vm7, %vm1039_vm10  ;;  %1359 = vperm.xlu1 %4286, %v764_v29   ;;  %v753_v29 = vld [vmem:[%s4662_s16 + $0x60] sm:$0xff] }
  0xb9   : > { %3861 = vmatpush1.bf16.msk.msra.mxu0 %vm3860_vm6, %v6351_v38  ;;  %vm1041_vm14 = vmor %vm896_vm9, %vm977_vm8  ;;  %1356 = vperm.xlu0 %4285, %v763_v47  }
  0xba   : > { %vm1045_vm1 = vmor %vm900_vm5, %vm981_vm15 }
  0xbb   : > { %vm3892_vm11 = vmpackc.low %vm1045_vm1, %vm1041_vm14 }
  0xbc   : > { %3893 = vmatpush1.bf16.msk.msra.mxu1 %vm3892_vm11, %v6351_v38  ;;  %1981 = vmatmul.mubr.bf16.vlgmr.msra.gmra.mrb[0].mxu0 %v4297_v32 }
  0xbd   : > { %1990 = vmatprep.mubr.bf16.mxu0 %v6353_v8  ;;  %1455 = vperm.xlu1 %4286, %v796_v48  }
  0xbe   : > { %1452 = vperm.xlu0 %4285, %v795_v50   ;;  %v785_v50 = vld [vmem:[%s4662_s16 + $0x160] sm:$0xff] }
  0xbf   : > { %2054 = vmatmul.mubr.bf16.vlgmr.msra.gmra.mrb[0].mxu1 %v4297_v32  ;;  %v786_v32 = vld [vmem:[%s4662_s16 + $0x168] sm:$0xff] }
  0xc0   : > { %2063 = vmatprep.mubr.bf16.mxu1 %v6353_v8 }
  0xc1   : > { %1311 = vperm.xlu1 %4286, %v748_v37   ;;  %v772_v37 = vld [vmem:[%s4662_s16 + $0xf8] sm:$0xff] }
  0xc2   : > { %1308 = vperm.xlu0 %4285, %v747_v52  }
  0xc4   : > { %1991 = vmatmul.mubr.bf16.gmra.mrb[4].mxu0 %v4298_v53 }
  0xc5   : > { %2000 = vmatprep.mubr.bf16.mxu0 %v6353_v8  ;;  %1407 = vperm.xlu1 %4286, %v780_v54   ;;  %v771_v54 = vld [vmem:[%s4662_s16 + $0xf0] sm:$0xff] }
  0xc6   : > { %1404 = vperm.xlu0 %4285, %v779_v55   ;;  %v804_v55 = vld [vmem:[%s4662_s16 + $0x1f8] sm:$0xff] }
  0xc7   : > { %2064 = vmatmul.mubr.bf16.gmra.mrb[4].mxu1 %v4298_v53 }
  0xc8   : > { %2073 = vmatprep.mubr.bf16.mxu1 %v6353_v8 }
  0xc9   : > { %1365 = vperm.xlu1 %4286, %v766_v56  }
  0xca   : > { %1362 = vperm.xlu0 %4285, %v765_v58  }
  0xcc   : > { %2001 = vmatmul.mubr.bf16.gmra.mrb[8].mxu0 %v4299_v59 }
  0xcd   : > { %2010 = vmatprep.mubr.bf16.mxu0 %v6353_v8  ;;  %1461 = vperm.xlu1 %4286, %v798_v61   ;;  %v756_v61 = vld [vmem:[%s4662_s16 + $0x78] sm:$0xff] }
  0xce   : > { %1458 = vperm.xlu0 %4285, %v797_v62  }
  0xcf   : > { %2074 = vmatmul.mubr.bf16.gmra.mrb[8].mxu1 %v4299_v59  ;;  %v803_v59 = vld [vmem:[%s4662_s16 + $0x1f0] sm:$0xff] }
  0xd0   : > { %2083 = vmatprep.mubr.bf16.mxu1 %v6353_v8 }
  0xd1   : > { %1317 = vperm.xlu1 %4286, %v750_v63   ;;  %v755_v63 = vld [vmem:[%s4662_s16 + $0x70] sm:$0xff] }
  0xd2   : > { %1314 = vperm.xlu0 %4285, %v749_v0  }
  0xd3   : > { %v5217_v2 = vpop.permute.xlu1 %2114  ;;  %v5219_v3 = vpop.permute.xlu0 %2104 }
  0xd4   : > { %2011 = vmatmul.mubr.bf16.gmra.mrb[12].mxu0 %v4300_v1 }
  0xd5   : > { %1413 = vperm.xlu1 %4286, %v782_v4   ;;  %2277 = vmatprep.mubr.bf16.mxu0 %v6353_v8 }
  0xd6   : > { %1410 = vperm.xlu0 %4285, %v781_v5   ;;  %v787_v5 = vld [vmem:[%s4662_s16 + $0x170] sm:$0xff] }
  0xd7   : > { %v5223_v6 = vpop.permute.xlu1 %2119  ;;  %v5225_v9 = vpop.permute.xlu0 %2109  ;;  %2084 = vmatmul.mubr.bf16.gmra.mrb[12].mxu1 %v4300_v1  ;;  %v788_v1 = vld [vmem:[%s4662_s16 + $0x178] sm:$0xff]  ;;  %s6581_s16 = sld [smem:[#allocation47_spill]] (!%p4021_p2) }
  0xd8   : > { %2320 = vmatprep.mubr.bf16.mxu1 %v6353_v8 }
  0xd9   : > { %1371 = vperm.xlu1 %4286, %v768_v10   ;;  %v5296_v10 = vand.u32 127, %v6350_v7 }
  0xda   : > { %1368 = vperm.xlu0 %4285, %v767_v11  }
  0xdb   : > { %v5231_v13 = vpop.permute.xlu1 %2129  ;;  %v5233_v14 = vpop.permute.xlu0 %2124 }
  0xdd   : > { %1467 = vperm.xlu1 %4286, %v800_v15  }
  0xde   : > { %1464 = vperm.xlu0 %4285, %v799_v16  }
  0xdf   : > { %v5237_v17 = vpop.permute.xlu1 %2139  ;;  %v5239_v18 = vpop.permute.xlu0 %2134 }
  0xe1   : > { %1323 = vperm.xlu1 %4286, %v752_v19   ;;  %v4306_v19 = vld [vmem:[%s6508_s15] sm:$0xff]  }
  0xe2   : > { %1320 = vperm.xlu0 %4285, %v751_v20  }
  0xe3   : > { %v5243_v23 = vpop.permute.xlu1 %2233  ;;  %v5245_v24 = vpop.permute.xlu0 %2228 }
  0xe5   : > { %1419 = vperm.xlu1 %4286, %v784_v25  }
  0xe6   : > { %1416 = vperm.xlu0 %4285, %v783_v26  }
  0xe7   : > { %v5249_v30 = vpop.permute.xlu1 %2738  ;;  %v5251_v33 = vpop.permute.xlu0 %2733 }
  0xe8   : > { %6430 = vst [vmem:[#allocation21_spill] sm:$0xff] %v5249_v30  ;;  %6431 = vst [vmem:[#allocation22_spill] sm:$0xff] %v5251_v33 }
  0xe9   : > { %1377 = vperm.xlu1 %4286, %v770_v34  }
  0xea   : > { %1374 = vperm.xlu0 %4285, %v769_v35  }
  0xeb   : > { %v5255_v39 = vpop.permute.xlu1 %2748  ;;  %v5257_v40 = vpop.permute.xlu0 %2743 }
  0xec   : > { %6432 = vst [vmem:[#allocation23_spill] sm:$0xff] %v5255_v39  ;;  %6433 = vst [vmem:[#allocation24_spill] sm:$0xff] %v5257_v40 }
  0xed   : > { %1473 = vperm.xlu1 %4286, %v802_v43  }
  0xee   : > { %1470 = vperm.xlu0 %4285, %v801_v44  }
  0xef   : > { %v5261_v45 = vpop.permute.xlu1 %2850  ;;  %v5264_v28 = vpop.permute.xlu0 %2845 }
  0xf0   : > { %6434 = vst [vmem:[#allocation25_spill] sm:$0xff] %v5261_v45  ;;  %6435 = vst [vmem:[#allocation26_spill] sm:$0xff] %v5264_v28 }
  0xf1   : > { %1329 = vperm.xlu1 %4286, %v754_v46  }
  0xf2   : > { %1326 = vperm.xlu0 %4285, %v753_v29   ;;  %v6452_v29 = vmov 0 }
  0xf3   : > { %v5267_v47 = vpop.permute.xlu1 %2855 }
  0xf4   : > { %6436 = vst [vmem:[#allocation27_spill] sm:$0xff] %v5267_v47  ;;  %v5270_v48 = vpop.permute.xlu0 %2753 }
  0xf5   : > { %6437 = vst [vmem:[#allocation28_spill] sm:$0xff] %v5270_v48  ;;  %1425 = vperm.xlu1 %4286, %v786_v32  }
  0xf6   : > { %1422 = vperm.xlu0 %4285, %v785_v50  }
  0xf7   : > { %v5274_v52 = vpop.permute.xlu1 %2860 }
  0xf8   : > { %6438 = vst [vmem:[#allocation29_spill] sm:$0xff] %v5274_v52  ;;  %v5276_v53 = vpop.permute.xlu0 %2758 }
  0xf9   : > { %6439 = vst [vmem:[#allocation30_spill] sm:$0xff] %v5276_v53  ;;  %1383 = vperm.xlu1 %4286, %v772_v37   ;;  %v4308_v37 = vld [vmem:[%s6508_s15 + $0x10] sm:$0xff]  }
  0xfa   : > { %1380 = vperm.xlu0 %4285, %v771_v54  }
  0xfb   : > { %v5280_v56 = vpop.permute.xlu1 %2865 }
  0xfc   : > { %6440 = vst [vmem:[#allocation31_spill] sm:$0xff] %v5280_v56  ;;  %v5282_v58 = vpop.permute.xlu0 %2763 }
  0xfd   : > { %6441 = vst [vmem:[#allocation32_spill] sm:$0xff] %v5282_v58  ;;  %1479 = vperm.xlu1 %4286, %v804_v55  }
  0xfe   : > { %1476 = vperm.xlu0 %4285, %v803_v59   ;;  %v6456_v59 = vmov 0 }
  0xff   : > { %v5286_v62 = vpop.permute.xlu1 %2870 }
 0x100   : > { %6442 = vst [vmem:[#allocation33_spill] sm:$0xff] %v5286_v62  ;;  %v5289_v0 = vpop.permute.xlu0 %2768 }
 0x101   : > { %6443 = vst [vmem:[#allocation34_spill] sm:$0xff] %v5289_v0  ;;  %1335 = vperm.xlu1 %4286, %v756_v61  }
 0x102   : > { %1332 = vperm.xlu0 %4285, %v755_v63  }
 0x103   : > { %v5292_v4 = vpop.permute.xlu1 %2880 }
 0x104   : > { %6444 = vst [vmem:[#allocation35_spill] sm:$0xff] %v5292_v4  ;;  %v5298_v11 = vpop.permute.xlu0 %2875 }
 0x105   : > { %6445 = vst [vmem:[#allocation36_spill] sm:$0xff] %v5298_v11  ;;  %1431 = vperm.xlu1 %4286, %v788_v1   ;;  %v6458_v1 = vmov 0 }
 0x106   : > { %1428 = vperm.xlu0 %4285, %v787_v5  }
 0x107   : > { %v1342_v15 = vpop.permute.xlu1 %1341 }
 0x108   : > { %vm1498_vm0 = vcmp.eq.s32.totalorder %v1342_v15, %v5296_v10  ;;  %v1339_v16 = vpop.permute.xlu0 %1338 }
 0x109   : > { %vm1497_vm12 = vcmp.eq.s32.totalorder %v1339_v16, %v5296_v10  ;;  %v6460_v16 = vmov 0 }
 0x10a   : > { %vm5302_vm13 = vmpackc.low %vm1498_vm0, %vm1497_vm12 }
 0x10b   : > { %v1438_v20 = vpop.permute.xlu1 %1437 }
 0x10c   : > { %vm1530_vm4 = vcmp.eq.s32.totalorder %v1438_v20, %v5296_v10  ;;  %v1435_v25 = vpop.permute.xlu0 %1434 }
 0x10d   : > { %vm1529_vm10 = vcmp.eq.s32.totalorder %v1435_v25, %v5296_v10 }
 0x10e   : > { %vm5308_vm9 = vmpackc.low %vm1530_vm4, %vm1529_vm10 }
 0x10f   : > { %v1294_v34 = vpop.permute.xlu1 %1293 }
 0x110   : > { %vm1482_vm8 = vcmp.eq.s32.totalorder %v1294_v34, %v5296_v10  ;;  %v1291_v35 = vpop.permute.xlu0 %1290  ;;  %v6462_v34 = vmov 0 }
 0x111   : > { %vm1481_vm7 = vcmp.eq.s32.totalorder %v1291_v35, %v5296_v10 }
 0x112   : > { %vm5314_vm5 = vmpackc.low %vm1482_vm8, %vm1481_vm7 }
 0x113   : > { %v1390_v44 = vpop.permute.xlu1 %1389 }
 0x114   : > { %vm1514_vm15 = vcmp.eq.s32.totalorder %v1390_v44, %v5296_v10  ;;  %v1387_v46 = vpop.permute.xlu0 %1386 }
 0x115   : > { %vm1513_vm6 = vcmp.eq.s32.totalorder %v1387_v46, %v5296_v10  ;;  %v6464_v46 = vmov 0 }
 0x116   : > { %vm5320_vm14 = vmpackc.low %vm1514_vm15, %vm1513_vm6 }
 0x117   : > { %v6453_v29 = vsel %vm5320_vm14, 4294967295, %v6452_v29  ;;  %v1348_v32 = vpop.permute.xlu1 %1347  ;;  %vm6494_vm14 = vcmask 130048  }
 0x118   : > { %vm1500_vm1 = vcmp.eq.s32.totalorder %v1348_v32, %v5296_v10  ;;  %v1345_v50 = vpop.permute.xlu0 %1344 }
 0x119   : > { %vm1499_vm11 = vcmp.eq.s32.totalorder %v1345_v50, %v5296_v10 }
 0x11a   : > { %vm5326_vm0 = vmpackc.low %vm1500_vm1, %vm1499_vm11 }
 0x11b   : > { %v1444_v54 = vpop.permute.xlu1 %1443 }
 0x11c   : > { %vm1532_vm12 = vcmp.eq.s32.totalorder %v1444_v54, %v5296_v10  ;;  %v1441_v55 = vpop.permute.xlu0 %1440 }
 0x11d   : > { %vm1531_vm4 = vcmp.eq.s32.totalorder %v1441_v55, %v5296_v10 }
 0x11e   : > { %vm5332_vm10 = vmpackc.low %vm1532_vm12, %vm1531_vm4 }
 0x11f   : > { %v6457_v59 = vsel %vm5332_vm10, 4294967295, %v6456_v59  ;;  %v1300_v61 = vpop.permute.xlu1 %1299  ;;  %vm6476_vm10 = vcmask 130048  }
 0x120   : > { %vm1484_vm8 = vcmp.eq.s32.totalorder %v1300_v61, %v5296_v10  ;;  %v1297_v63 = vpop.permute.xlu0 %1296 }
 0x121   : > { %vm1483_vm7 = vcmp.eq.s32.totalorder %v1297_v63, %v5296_v10 }
 0x122   : > { %vm5338_vm15 = vmpackc.low %vm1484_vm8, %vm1483_vm7 }
 0x123   : > { %v6459_v1 = vsel %vm5338_vm15, 4294967295, %v6458_v1  ;;  %v1396_v5 = vpop.permute.xlu1 %1395 }
 0x124   : > { %vm1516_vm6 = vcmp.eq.s32.totalorder %v1396_v5, %v5296_v10  ;;  %v1393_v15 = vpop.permute.xlu0 %1392 }
 0x125   : > { %vm1515_vm1 = vcmp.eq.s32.totalorder %v1393_v15, %v5296_v10 }
 0x126   : > { %vm5344_vm11 = vmpackc.low %vm1516_vm6, %vm1515_vm1  ;;  %vm6468_vm1 = vcmp.eq.s32.totalorder %v4704_v21, %v4706_v22 }
 0x127   : > { %v6461_v16 = vsel %vm5344_vm11, 4294967295, %v6460_v16  ;;  %v1354_v20 = vpop.permute.xlu1 %1353  ;;  %vm6474_vm11 = vcmp.eq.s32.totalorder %v4788_v41, %v4706_v22 }
 0x128   : > { %vm1502_vm12 = vcmp.eq.s32.totalorder %v1354_v20, %v5296_v10  ;;  %v1351_v25 = vpop.permute.xlu0 %1350 }
 0x129   : > { %vm1501_vm4 = vcmp.eq.s32.totalorder %v1351_v25, %v5296_v10 }
 0x12a   : > { %vm5350_vm8 = vmpackc.low %vm1502_vm12, %vm1501_vm4  ;;  %vm6469_vm4 = vcmp.eq.s32.totalorder %v4684_v12, %v4716_v27 }
 0x12b   : > { %v6463_v34 = vsel %vm5350_vm8, 4294967295, %v6462_v34  ;;  %v1450_v35 = vpop.permute.xlu1 %1449  ;;  %vm3913_vm12 = vmpackc.low %vm6468_vm1, %vm839_vm2  ;;  %vm6470_vm2 = vcmp.eq.s32.totalorder %v4704_v21, %v4716_v27  ;;  %vm6472_vm1 = vcmp.eq.s32.totalorder %v4684_v12, %v4733_v31  ;;  %vm6475_vm8 = vcmp.eq.s32.totalorder %v4800_v42, %v4706_v22 }
 0x12c   : > { %vm1534_vm7 = vcmp.eq.s32.totalorder %v1450_v35, %v5296_v10  ;;  %v1447_v44 = vpop.permute.xlu0 %1446  ;;  %vm3917_vm15 = vmpackc.low %vm6475_vm8, %vm6474_vm11  ;;  %vm6480_vm11 = vcmp.eq.s32.totalorder %v4800_v42, %v4716_v27 }
 0x12d   : > { %vm1533_vm3 = vcmp.eq.s32.totalorder %v1447_v44, %v5296_v10 }
 0x12e   : > { %vm5356_vm6 = vmpackc.low %vm1534_vm7, %vm1533_vm3  ;;  %vm6371_vm3 = vcmask 523264  }
 0x12f   : > { %v6465_v46 = vsel %vm5356_vm6, 4294967295, %v6464_v46  ;;  %vm3933_vm7 = vmpackc.low %vm6470_vm2, %vm6469_vm4  ;;  %vm6478_vm4 = vcmp.eq.s32.totalorder %v4704_v21, %v4761_v36 }
 0x18f   : > { %v1982_v32 = vpop.f32.mrb[0].mxu0 }
 0x190   : > { %v2142_v50 = vadd.f32 %v5219_v3, %v1982_v32  ;;  %v1984_v54 = vpop.f32.mrb[1].mxu0 }
 0x191   : > { %v2143_v55 = vadd.f32 %v5219_v3, %v1984_v54  ;;  %v1986_v61 = vpop.f32.mrb[2].mxu0 }
 0x192   : > { %v2055_v63 = vpop.f32.mrb[0].mxu1  ;;  %v2146_v5 = vadd.f32 %v5225_v9, %v1986_v61  ;;  %v1988_v15 = vpop.f32.mrb[3].mxu0  ;;  %v2174_v44 = vmax.f32 %v2142_v50, 0.0 }
 0x193   : > { %v2144_v20 = vadd.f32 %v5219_v3, %v2055_v63  ;;  %v2057_v25 = vpop.f32.mrb[1].mxu1  ;;  %v2147_v35 = vadd.f32 %v5225_v9, %v1988_v15  ;;  %v2175_v4 = vmax.f32 %v2143_v55, 0.0 }
 0x194   : > { %v2145_v7 = vadd.f32 %v5219_v3, %v2057_v25  ;;  %v2178_v38 = vmax.f32 %v2146_v5, 0.0  ;;  %v2059_v8 = vpop.f32.mrb[2].mxu1 }
 0x195   : > { %v2148_v32 = vadd.f32 %v5225_v9, %v2059_v8  ;;  %v2179_v11 = vmax.f32 %v2147_v35, 0.0  ;;  %v2061_v54 = vpop.f32.mrb[3].mxu1  ;;  %v2176_v61 = vmax.f32 %v2144_v20, 0.0 }
 0x196   : > { %v2208_v0 = vpack.c.bf16 %v2178_v38, %v2174_v44  ;;  %v2149_v58 = vadd.f32 %v5225_v9, %v2061_v54  ;;  %v2177_v53 = vmax.f32 %v2145_v7, 0.0 }
 0x197   : > { %v2180_v62 = vmax.f32 %v2148_v32, 0.0  ;;  %v2209_v56 = vpack.c.bf16 %v2179_v11, %v2175_v4  ;;  %v1992_v63 = vpop.f32.mrb[4].mxu0 }
 0x198   : > { %v2181_v48 = vmax.f32 %v2149_v58, 0.0  ;;  %v2150_v50 = vadd.f32 %v5217_v2, %v1992_v63  ;;  %v1994_v15 = vpop.f32.mrb[5].mxu0 }
 0x199   : > { %v2210_v3 = vpack.c.bf16 %v2180_v62, %v2176_v61  ;;  %v2151_v5 = vadd.f32 %v5217_v2, %v1994_v15  ;;  %v1996_v55 = vpop.f32.mrb[6].mxu0  ;;  %2245 = vmatprep.subr.bf16.mxu0 %v2209_v56 }
 0x19a   : > { %v2211_v8 = vpack.c.bf16 %v2181_v48, %v2177_v53  ;;  %v2065_v25 = vpop.f32.mrb[4].mxu1  ;;  %v2154_v38 = vadd.f32 %v5223_v6, %v1996_v55  ;;  %v1998_v35 = vpop.f32.mrb[7].mxu0  ;;  %2246 = vmatpush1.bf16.msra.mxu0 %v2208_v0  ;;  %v2182_v58 = vmax.f32 %v2150_v50, 0.0 }
 0x19b   : > { %v2152_v9 = vadd.f32 %v5217_v2, %v2065_v25  ;;  %v2067_v4 = vpop.f32.mrb[5].mxu1  ;;  %v2155_v7 = vadd.f32 %v5223_v6, %v1998_v35  ;;  %v2183_v44 = vmax.f32 %v2151_v5, 0.0 }
 0x19c   : > { %v2153_v11 = vadd.f32 %v5217_v2, %v2067_v4  ;;  %v2186_v20 = vmax.f32 %v2154_v38, 0.0  ;;  %v2069_v62 = vpop.f32.mrb[6].mxu1  ;;  %2288 = vmatprep.subr.bf16.mxu1 %v2211_v8 }
 0x19d   : > { %v2156_v56 = vadd.f32 %v5223_v6, %v2069_v62  ;;  %v2187_v48 = vmax.f32 %v2155_v7, 0.0  ;;  %v2071_v53 = vpop.f32.mrb[7].mxu1  ;;  %2289 = vmatpush1.bf16.msra.mxu1 %v2210_v3  ;;  %v2184_v54 = vmax.f32 %v2152_v9, 0.0 }
 0x19e   : > { %v2212_v32 = vpack.c.bf16 %v2186_v20, %v2182_v58  ;;  %v2157_v0 = vadd.f32 %v5223_v6, %v2071_v53  ;;  %v2185_v55 = vmax.f32 %v2153_v11, 0.0 }
 0x19f   : > { %v2188_v61 = vmax.f32 %v2156_v56, 0.0  ;;  %v2213_v63 = vpack.c.bf16 %v2187_v48, %v2183_v44  ;;  %v2002_v15 = vpop.f32.mrb[8].mxu0 }
 0x1a0   : > { %v2189_v50 = vmax.f32 %v2157_v0, 0.0  ;;  %v2158_v2 = vadd.f32 %v5233_v14, %v2002_v15  ;;  %v2004_v25 = vpop.f32.mrb[9].mxu0 }
 0x1a1   : > { %v2214_v38 = vpack.c.bf16 %v2188_v61, %v2184_v54  ;;  %v2159_v5 = vadd.f32 %v5233_v14, %v2004_v25  ;;  %v2006_v8 = vpop.f32.mrb[10].mxu0  ;;  %2247 = vmatprep.subr.bf16.mxu0 %v2213_v63 }
 0x1a2   : > { %v2215_v35 = vpack.c.bf16 %v2189_v50, %v2185_v55  ;;  %v2075_v4 = vpop.f32.mrb[8].mxu1  ;;  %v2162_v3 = vadd.f32 %v5231_v13, %v2006_v8  ;;  %v2008_v7 = vpop.f32.mrb[11].mxu0  ;;  %2248 = vmatpush1.bf16.msra.mxu0 %v2212_v32  ;;  %v2190_v11 = vmax.f32 %v2158_v2, 0.0 }
 0x1a3   : > { %v2160_v6 = vadd.f32 %v5233_v14, %v2075_v4  ;;  %v2077_v9 = vpop.f32.mrb[9].mxu1  ;;  %v2163_v58 = vadd.f32 %v5231_v13, %v2008_v7  ;;  %v2191_v56 = vmax.f32 %v2159_v5, 0.0 }
 0x1a4   : > { %v2161_v20 = vadd.f32 %v5233_v14, %v2077_v9  ;;  %v2194_v62 = vmax.f32 %v2162_v3, 0.0  ;;  %v2079_v44 = vpop.f32.mrb[10].mxu1  ;;  %2290 = vmatprep.subr.bf16.mxu1 %v2215_v35 }
 0x1a5   : > { %v2164_v48 = vadd.f32 %v5231_v13, %v2079_v44  ;;  %v2195_v53 = vmax.f32 %v2163_v58, 0.0  ;;  %v2081_v0 = vpop.f32.mrb[11].mxu1  ;;  %2291 = vmatpush1.bf16.msra.mxu1 %v2214_v38  ;;  %v2192_v61 = vmax.f32 %v2160_v6, 0.0 }
 0x1a6   : > { %v2216_v54 = vpack.c.bf16 %v2194_v62, %v2190_v11  ;;  %v2165_v32 = vadd.f32 %v5231_v13, %v2081_v0  ;;  %v2193_v50 = vmax.f32 %v2161_v20, 0.0 }
 0x1a7   : > { %v2196_v63 = vmax.f32 %v2164_v48, 0.0  ;;  %v2217_v15 = vpack.c.bf16 %v2195_v53, %v2191_v56  ;;  %v2012_v55 = vpop.f32.mrb[12].mxu0 }
 0x1a8   : > { %v2197_v2 = vmax.f32 %v2165_v32, 0.0  ;;  %v2166_v14 = vadd.f32 %v5239_v18, %v2012_v55  ;;  %v2014_v25 = vpop.f32.mrb[13].mxu0 }
 0x1a9   : > { %v2218_v8 = vpack.c.bf16 %v2196_v63, %v2192_v61  ;;  %v2167_v5 = vadd.f32 %v5239_v18, %v2014_v25  ;;  %v2016_v35 = vpop.f32.mrb[14].mxu0  ;;  %2249 = vmatprep.subr.bf16.mxu0 %v2217_v15  ;;  %v5401_v25 = vpop.permute.xlu0 %1302 }
 0x1aa   : > { %v2219_v4 = vpack.c.bf16 %v2197_v2, %v2193_v50  ;;  %v2085_v3 = vpop.f32.mrb[12].mxu1  ;;  %v2170_v38 = vadd.f32 %v5237_v17, %v2016_v35  ;;  %v2018_v7 = vpop.f32.mrb[15].mxu0  ;;  %2250 = vmatpush1.bf16.msra.mxu0 %v2216_v54  ;;  %v2198_v58 = vmax.f32 %v2166_v14, 0.0  ;;  %v6466_v14 = vmov 0  }
 0x1ab   : > { %v2168_v13 = vadd.f32 %v5239_v18, %v2085_v3  ;;  %v2087_v6 = vpop.f32.mrb[13].mxu1  ;;  %v2171_v9 = vadd.f32 %v5237_v17, %v2018_v7  ;;  %v2199_v44 = vmax.f32 %v2167_v5, 0.0 }
 0x1ac   : > { %v2169_v11 = vadd.f32 %v5239_v18, %v2087_v6  ;;  %v2202_v20 = vmax.f32 %v2170_v38, 0.0  ;;  %v2089_v62 = vpop.f32.mrb[14].mxu1  ;;  %2292 = vmatprep.subr.bf16.mxu1 %v2219_v4  ;;  %v4301_v18 = vld [vmem:[%s6285_s9] sm:$0xff]  }
 0x1ad   : > { %v2172_v56 = vadd.f32 %v5237_v17, %v2089_v62  ;;  %v2203_v48 = vmax.f32 %v2171_v9, 0.0  ;;  %v2091_v53 = vpop.f32.mrb[15].mxu1  ;;  %2293 = vmatpush1.bf16.msra.mxu1 %v2218_v8  ;;  %v2200_v32 = vmax.f32 %v2168_v13, 0.0  ;;  %v5405_v5 = vpop.permute.xlu0 %1398 }
 0x1ae   : > { %v2220_v0 = vpack.c.bf16 %v2202_v20, %v2198_v58  ;;  %v2173_v54 = vadd.f32 %v5237_v17, %v2091_v53  ;;  %v2201_v15 = vmax.f32 %v2169_v11, 0.0  ;;  %v5399_v17 = vpop.permute.xlu1 %1305 }
 0x1af   : > { %v2204_v61 = vmax.f32 %v2172_v56, 0.0  ;;  %v2221_v63 = vpack.c.bf16 %v2203_v48, %v2199_v44 }
 0x1b0   : > { %v2205_v55 = vmax.f32 %v2173_v54, 0.0 }
 0x1b1   : > { %v2222_v50 = vpack.c.bf16 %v2204_v61, %v2200_v32  ;;  %2251 = vmatprep.subr.bf16.mxu0 %v2221_v63  ;;  %v5409_v4 = vpop.permute.xlu0 %1356 }
 0x1b2   : > { %v2223_v2 = vpack.c.bf16 %v2205_v55, %v2201_v15  ;;  %2252 = vmatpush1.bf16.msra.mxu0 %v2220_v0  ;;  %v5403_v8 = vpop.permute.xlu1 %1401 }
 0x1b4   : > { %2294 = vmatprep.subr.bf16.mxu1 %v2223_v2 }
 0x1b5   : > { %2295 = vmatpush1.bf16.msra.mxu1 %v2222_v50  ;;  %3895 = vmatmul.mubr.msk.bf16.vlgmr.msra.gmra.mrb[16].mxu0 %vm6371_vm3, %v4301_v18  ;;  %v5413_v38 = vpop.permute.xlu0 %1452 }
 0x1b6   : > { %2431 = vmatprep.mubr.bf16.mxu0 %v6466_v14  ;;  %v5407_v35 = vpop.permute.xlu1 %1359 }
 0x1b8   : > { %3896 = vmatmul.mubr.msk.bf16.vlgmr.msra.gmra.mrb[16].mxu1 %vm6371_vm3, %v4301_v18  ;;  %vm6473_vm3 = vcmp.eq.s32.totalorder %v4704_v21, %v4733_v31 }
 0x1b9   : > { %2504 = vmatprep.mubr.bf16.mxu1 %v6466_v14  ;;  %v5417_v13 = vpop.permute.xlu0 %1308  ;;  %vm3915_vm6 = vmpackc.low %vm6473_vm3, %vm6472_vm1  ;;  %vm6479_vm3 = vcmp.eq.s32.totalorder %v4788_v41, %v4716_v27  ;;  %vm6482_vm1 = vcmp.eq.s32.totalorder %v4800_v42, %v4733_v31 }
 0x1ba   : > { %v5411_v3 = vpop.permute.xlu1 %1455  ;;  %vm3937_vm8 = vmpackc.low %vm6480_vm11, %vm6479_vm3  ;;  %vm6486_vm3 = vcmp.eq.s32.totalorder %v4788_v41, %v4761_v36  ;;  %vm6487_vm11 = vcmp.eq.s32.totalorder %v4800_v42, %v4761_v36 }
 0x1bd   : > { %v5421_v9 = vpop.permute.xlu0 %1404 }
 0x1be   : > { %v5415_v7 = vpop.permute.xlu1 %1311 }
 0x1c1   : > { %v5425_v11 = vpop.permute.xlu0 %1362 }
 0x1c2   : > { %v5419_v6 = vpop.permute.xlu1 %1407 }
 0x1c5   : > { %v5429_v62 = vpop.permute.xlu0 %1458 }
 0x1c6   : > { %v5423_v58 = vpop.permute.xlu1 %1365 }
 0x1c9   : > { %v5433_v56 = vpop.permute.xlu0 %1314 }
 0x1ca   : > { %v5427_v20 = vpop.permute.xlu1 %1461 }
 0x1cd   : > { %v5437_v53 = vpop.permute.xlu0 %1410 }
 0x1ce   : > { %v5431_v44 = vpop.permute.xlu1 %1317  ;;  %6467 = vst [vmem:[#allocation37_spill] sm:$0xff] %v5437_v53 }
 0x1d1   : > { %v5446_v40 = vpop.permute.xlu0 %1368 }
 0x1d2   : > { %v5435_v48 = vpop.permute.xlu1 %1413 }
 0x1d6   : > { %v5442_v2 = vpop.permute.xlu1 %1371 }
 0x288   : > { %v2279_v0 = vpop.f32.mrb[16].mxu0 }
 0x289   : > { %v2280_v54 = vadd.f32 %v2279_v0, %v5245_v24  ;;  %v2281_v32 = vpop.f32.mrb[17].mxu0 }
 0x28a   : > { %v2282_v61 = vadd.f32 %v2281_v32, %v5245_v24  ;;  %v2283_v63 = vpop.f32.mrb[18].mxu0 }
 0x28b   : > { %v2331_v15 = vmax.f32 %v2280_v54, 0.0  ;;  %v2322_v55 = vpop.f32.mrb[16].mxu1  ;;  %v2284_v50 = vadd.f32 %v2283_v63, %v5243_v23  ;;  %v2285_v18 = vpop.f32.mrb[19].mxu0 }
 0x28c   : > { %v2323_v52 = vadd.f32 %v2322_v55, %v5245_v24  ;;  %v2332_v47 = vmax.f32 %v2282_v61, 0.0  ;;  %v2324_v39 = vpop.f32.mrb[17].mxu1  ;;  %v2286_v0 = vadd.f32 %v2285_v18, %v5243_v23 }
 0x28d   : > { %2339 = vst [vmem:[%s4664_s5] sm:$0xff] %v2331_v15  ;;  %v2325_v54 = vadd.f32 %v2324_v39, %v5245_v24  ;;  %v2335_v32 = vmax.f32 %v2284_v50, 0.0  ;;  %v2326_v63 = vpop.f32.mrb[18].mxu1  ;;  %v4307_v50 = vld [vmem:[%s6508_s15 + $0x8] sm:$0xff]  }
 0x28e   : > { %v2333_v45 = vmax.f32 %v2323_v52, 0.0  ;;  %2340 = vst [vmem:[%s4664_s5 + $0x8] sm:$0xff] %v2332_v47  ;;  %v2327_v28 = vadd.f32 %v2326_v63, %v5243_v23  ;;  %v2336_v55 = vmax.f32 %v2286_v0, 0.0  ;;  %v2328_v61 = vpop.f32.mrb[19].mxu1 }
 0x28f   : > { %v2334_v30 = vmax.f32 %v2325_v54, 0.0  ;;  %2343 = vst [vmem:[%s4664_s5 + $0x20] sm:$0xff] %v2335_v32  ;;  %v2363_v18 = vpack.c.bf16 %v2335_v32, %v2331_v15  ;;  %v2329_v33 = vadd.f32 %v2328_v61, %v5243_v23  ;;  %v4302_v23 = vld [vmem:[%s6288_s12] sm:$0xff]   ;;  %v5467_v15 = vpop.permute.xlu1 %1467  ;;  %v6523_v32 = vld [vmem:[#allocation26_spill] sm:$0xff]  ;;  %v6524_v61 = vld [vmem:[#allocation25_spill] sm:$0xff] }
 0x290   : > { %2341 = vst [vmem:[%s4664_s5 + $0x10] sm:$0xff] %v2333_v45  ;;  %v2337_v53 = vmax.f32 %v2327_v28, 0.0  ;;  %2344 = vst [vmem:[%s4664_s5 + $0x28] sm:$0xff] %v2336_v55  ;;  %v2364_v24 = vpack.c.bf16 %v2336_v55, %v2332_v47  ;;  %v5469_v28 = vpop.permute.xlu0 %1464  ;;  %v4303_v47 = vld [vmem:[%s6288_s12 + $0x8] sm:$0xff]  }
 0x291   : > { %2342 = vst [vmem:[%s4664_s5 + $0x18] sm:$0xff] %v2334_v30  ;;  %v2338_v39 = vmax.f32 %v2329_v33, 0.0 }
 0x292   : > { %2345 = vst [vmem:[%s4664_s5 + $0x30] sm:$0xff] %v2337_v53  ;;  %v2365_v52 = vpack.c.bf16 %v2337_v53, %v2333_v45  ;;  %2399 = vmatprep.subr.bf16.mxu0 %v2364_v24  ;;  %v6471_v45 = vmov 1.0|1.0  }
 0x293   : > { %2346 = vst [vmem:[%s4664_s5 + $0x38] sm:$0xff] %v2338_v39  ;;  %v2366_v33 = vpack.c.bf16 %v2338_v39, %v2334_v30  ;;  %2400 = vmatpush1.bf16.msra.mxu0 %v2363_v18  ;;  %v5514_v21 = vpop.permute.xlu1 %1323 }
 0x294   : > { %3914 = vmatprep.subr.msk.bf16.mxu0 %vm3913_vm12, %v6471_v45  ;;  %vm6477_vm12 = vcmp.eq.s32.totalorder %v4684_v12, %v4761_v36  ;;  %v5516_v30 = vpop.permute.xlu0 %1320 }
 0x295   : > { %2472 = vmatprep.subr.bf16.mxu1 %v2366_v33  ;;  %vm3935_vm2 = vmpackc.low %vm6478_vm4, %vm6477_vm12 }
 0x296   : > { %2473 = vmatpush1.bf16.msra.mxu1 %v2365_v52  ;;  %3901 = vmatmul.mubr.msk.bf16.vlgmr.msra.gmra.mrb[20].mxu0 %vm6476_vm10, %v4302_v23  ;;  %vm6481_vm10 = vcmp.eq.s32.totalorder %v4788_v41, %v4733_v31 }
 0x297   : > { %3934 = vmatprep.subr.msk.bf16.mxu1 %vm3933_vm7, %v6471_v45  ;;  %3916 = vmatpush1.bf16.msk.msra.mxu0 %vm3915_vm6, %v6471_v45  ;;  %vm3919_vm12 = vmpackc.low %vm6482_vm1, %vm6481_vm10  ;;  %vm6483_vm6 = vcmask 130048   ;;  %vm6484_vm7 = vcmp.eq.s32.totalorder %v4878_v49, %v4706_v22  ;;  %vm6489_vm1 = vcmp.eq.s32.totalorder %v4893_v51, %v4716_v27  ;;  %v5565_v41 = vpop.permute.xlu1 %1419 }
 0x298   : > { %3918 = vmatprep.subr.msk.bf16.mxu0 %vm3917_vm15, %v6471_v45  ;;  %2441 = vmatprep.mubr.bf16.mxu0 %v6466_v14  ;;  %vm6485_vm15 = vcmp.eq.s32.totalorder %v4893_v51, %v4706_v22  ;;  %vm3939_vm10 = vmpackc.low %vm6487_vm11, %vm6486_vm3  ;;  %v5567_v42 = vpop.permute.xlu0 %1416 }
 0x299   : > { %3905 = vmatmul.mubr.msk.bf16.vlgmr.msra.gmra.mrb[20].mxu1 %vm6483_vm6, %v4302_v23  ;;  %vm3921_vm4 = vmpackc.low %vm6485_vm15, %vm6484_vm7  ;;  %vm6490_vm7 = vcmp.eq.s32.totalorder %v4878_v49, %v4733_v31  ;;  %vm6491_vm15 = vcmp.eq.s32.totalorder %v4893_v51, %v4733_v31 }
 0x29a   : > { %3936 = vmatpush1.bf16.msk.msra.mxu1 %vm3935_vm2, %v6471_v45  ;;  %2514 = vmatprep.mubr.bf16.mxu1 %v6466_v14  ;;  %vm6488_vm2 = vcmp.eq.s32.totalorder %v4878_v49, %v4716_v27  ;;  %vm3923_vm3 = vmpackc.low %vm6491_vm15, %vm6490_vm7  ;;  %vm6499_vm15 = vcmp.eq.s32.totalorder %v4966_v57, %v4733_v31 }
 0x29b   : > { %3938 = vmatprep.subr.msk.bf16.mxu1 %vm3937_vm8, %v6471_v45  ;;  %3920 = vmatpush1.bf16.msk.msra.mxu0 %vm3919_vm12, %v6471_v45  ;;  %vm3941_vm6 = vmpackc.low %vm6489_vm1, %vm6488_vm2  ;;  %vm6492_vm8 = vcmp.eq.s32.totalorder %v4966_v57, %v4706_v22  ;;  %vm6493_vm12 = vcmp.eq.s32.totalorder %v4984_v60, %v4706_v22  ;;  %vm6496_vm2 = vcmp.eq.s32.totalorder %v4893_v51, %v4761_v36  ;;  %v4304_v22 = vld [vmem:[%s6288_s12 + $0x10] sm:$0xff]  }
 0x29c   : > { %3922 = vmatprep.subr.msk.bf16.mxu0 %vm3921_vm4, %v6471_v45  ;;  %vm3925_vm11 = vmpackc.low %vm6493_vm12, %vm6492_vm8  ;;  %vm6495_vm4 = vcmp.eq.s32.totalorder %v4878_v49, %v4761_v36  ;;  %vm6500_vm8 = vcmp.eq.s32.totalorder %v4984_v60, %v4733_v31  ;;  %v5604_v31 = vpop.permute.xlu0 %1374 }
 0x29d   : > { %vm3943_vm1 = vmpackc.low %vm6496_vm2, %vm6495_vm4 }
 0x29e   : > { %3940 = vmatpush1.bf16.msk.msra.mxu1 %vm3939_vm10, %v6471_v45  ;;  %3902 = vmatmul.mubr.msk.bf16.gmra.mrb[24].mxu0 %vm6494_vm14, %v4303_v47  ;;  %vm6497_vm10 = vcmp.eq.s32.totalorder %v4966_v57, %v4716_v27  ;;  %vm6498_vm14 = vcmp.eq.s32.totalorder %v4984_v60, %v4716_v27  ;;  %vm3927_vm12 = vmpackc.low %vm6500_vm8, %vm6499_vm15  ;;  %v5602_v27 = vpop.permute.xlu1 %1377  ;;  %vm1485_vm15 = vcmp.eq.s32.totalorder %v5401_v25, %v5296_v10 }
 0x29f   : > { %3942 = vmatprep.subr.msk.bf16.mxu1 %vm3941_vm6, %v6471_v45  ;;  %3924 = vmatpush1.bf16.msk.msra.mxu0 %vm3923_vm3, %v6471_v45  ;;  %vm3945_vm7 = vmpackc.low %vm6498_vm14, %vm6497_vm10  ;;  %vm6501_vm6 = vcmask 130048   ;;  %vm6502_vm3 = vcmp.eq.s32.totalorder %v4966_v57, %v4761_v36  ;;  %vm6509_vm10 = vcmask 523264   ;;  %vm6513_vm8 = vnez %v6459_v1 }
 0x2a0   : > { %3926 = vmatprep.subr.msk.bf16.mxu0 %vm3925_vm11, %v6471_v45  ;;  %2451 = vmatprep.mubr.bf16.mxu0 %v6466_v14  ;;  %vm6503_vm11 = vcmp.eq.s32.totalorder %v4984_v60, %v4761_v36  ;;  %vm6504_vm2 = vmmov %vm6501_vm6  ;;  %v4305_v36 = vld [vmem:[%s6288_s12 + $0x18] sm:$0xff]   ;;  %v5619_v51 = vpop.permute.xlu0 %1470 }
 0x2a1   : > { %3906 = vmatmul.mubr.msk.bf16.gmra.mrb[24].mxu1 %vm6501_vm6, %v4303_v47  ;;  %vm3947_vm4 = vmpackc.low %vm6503_vm11, %vm6502_vm3  ;;  %vm1503_vm6 = vcmp.eq.s32.totalorder %v5409_v4, %v5296_v10  ;;  %vm6514_vm3 = vnez %v6463_v34  ;;  %vm1518_vm11 = vcmp.eq.s32.totalorder %v5403_v8, %v5296_v10  ;;  %v6521_v8 = vld [vmem:[#allocation22_spill] sm:$0xff] }
 0x2a2   : > { %3944 = vmatpush1.bf16.msk.msra.mxu1 %vm3943_vm1, %v6471_v45  ;;  %2524 = vmatprep.mubr.bf16.mxu1 %v6466_v14  ;;  %vm6505_vm1 = vmmov %vm6504_vm2  ;;  %v5617_v49 = vpop.permute.xlu1 %1473 }
 0x2a3   : > { %3946 = vmatprep.subr.msk.bf16.mxu1 %vm3945_vm7, %v6471_v45  ;;  %3928 = vmatpush1.bf16.msk.msra.mxu0 %vm3927_vm12, %v6471_v45  ;;  %vm6510_vm14 = vmmov %vm6509_vm10  ;;  %vm6511_vm7 = vnez %v6453_v29  ;;  %vm1504_vm12 = vcmp.eq.s32.totalorder %v5407_v35, %v5296_v10 }
 0x2a4   : > { %4046 = vmatprep.subr.msk.bf16.mxu0 %vm5302_vm13, %v6471_v45  ;;  %vm6506_vm13 = vmmov %vm6505_vm1  ;;  %v5625_v60 = vpop.permute.xlu0 %1326 }
 0x2a6   : > { %3948 = vmatpush1.bf16.msk.msra.mxu1 %vm3947_vm4, %v6471_v45  ;;  %3903 = vmatmul.mubr.msk.bf16.gmra.mrb[28].mxu0 %vm6504_vm2, %v4304_v22  ;;  %v5623_v57 = vpop.permute.xlu1 %1329  ;;  %vm1517_vm4 = vcmp.eq.s32.totalorder %v5405_v5, %v5296_v10 }
 0x2a7   : > { %4086 = vmatprep.subr.msk.bf16.mxu1 %vm5308_vm9, %v6471_v45  ;;  %2461 = vmatprep.mubr.bf16.mxu0 %v6466_v14  ;;  %vm6507_vm9 = vmmov %vm6505_vm1 }
 0x2a8   : > { %v5635_v53 = vpop.permute.xlu0 %1422 }
 0x2a9   : > { %3907 = vmatmul.mubr.msk.bf16.gmra.mrb[28].mxu1 %vm6505_vm1, %v4304_v22  ;;  %vm1536_vm1 = vcmp.eq.s32.totalorder %v5411_v3, %v5296_v10 }
 0x2aa   : > { %2534 = vmatprep.mubr.bf16.mxu1 %v6466_v14  ;;  %v5633_v26 = vpop.permute.xlu1 %1425 }
 0x2ac   : > { %v5675_v29 = vpop.permute.xlu0 %1380 }
 0x2ae   : > { %3904 = vmatmul.mubr.msk.bf16.gmra.mrb[32].mxu0 %vm6506_vm13, %v4305_v36  ;;  %v5673_v43 = vpop.permute.xlu1 %1383  ;;  %vm1535_vm13 = vcmp.eq.s32.totalorder %v5413_v38, %v5296_v10 }
 0x2af   : > { %2609 = vmatprep.mubr.bf16.mxu0 %v6466_v14 }
 0x2b0   : > { %v5719_v1 = vpop.permute.xlu0 %1476 }
 0x2b1   : > { %3908 = vmatmul.mubr.msk.bf16.gmra.mrb[32].mxu1 %vm6507_vm9, %v4305_v36  ;;  %vm6515_vm9 = vnez %v6461_v16  ;;  %v6517_v16 = vld [vmem:[#allocation37_spill] sm:$0xff] }
 0x2b2   : > { %2682 = vmatprep.mubr.bf16.mxu1 %v6466_v14 }
 0x2b4   : > { %v1333_v34 = vpop.permute.xlu0 %1332 }
 0x2b6   : > { %3929 = vmatmul.mubr.msk.bf16.vlgmr.msra.gmra.mrb[20].mxu0 %vm6509_vm10, %v4306_v19 }
 0x2b7   : > { %4047 = vmatpush3.bf16.msk.msra.mxu0 %vm5314_vm5, %v6471_v45  ;;  %2619 = vmatprep.mubr.bf16.mxu0 %v6466_v14  ;;  %vm1486_vm5 = vcmp.eq.s32.totalorder %v5399_v17, %v5296_v10 }
 0x2b8   : > { %4048 = vmatprep.subr.msk.bf16.mxu0 %vm5326_vm0, %v6471_v45  ;;  %vm6512_vm0 = vnez %v6457_v59  ;;  %vm3961_vm2 = vmpackc.low %vm1486_vm5, %vm1485_vm15  ;;  %vm6516_vm5 = vnez %v6465_v46  ;;  %v5717_v59 = vpop.permute.xlu1 %1479  ;;  %v4309_v46 = vld [vmem:[%s6508_s15 + $0x18] sm:$0xff]   ;;  %v1429_v17 = vpop.permute.xlu0 %1428 }
 0x2b9   : > { %3949 = vmatmul.mubr.msk.bf16.vlgmr.msra.gmra.mrb[20].mxu1 %vm6510_vm14, %v4306_v19  ;;  %vm3979_vm14 = vmpackc.low %vm1504_vm12, %vm1503_vm6  ;;  %vm1520_vm6 = vcmp.eq.s32.totalorder %v5419_v6, %v5296_v10 }
 0x2ba   : > { %4087 = vmatpush3.bf16.msk.msra.mxu1 %vm6511_vm7, %v6471_v45  ;;  %2692 = vmatprep.mubr.bf16.mxu1 %v6466_v14  ;;  %vm1488_vm7 = vcmp.eq.s32.totalorder %v5415_v7, %v5296_v10  ;;  %vm3993_vm15 = vmpackc.low %vm1518_vm11, %vm1517_vm4  ;;  %vm1538_vm4 = vcmp.eq.s32.totalorder %v5427_v20, %v5296_v10  ;;  %v6522_v7 = vld [vmem:[#allocation21_spill] sm:$0xff] }
 0x2bb   : > { %4088 = vmatprep.subr.msk.bf16.mxu1 %vm6512_vm0, %v6471_v45  ;;  %4049 = vmatpush3.bf16.msk.msra.mxu0 %vm6513_vm8, %v6471_v45  ;;  %vm1487_vm0 = vcmp.eq.s32.totalorder %v5417_v13, %v5296_v10  ;;  %vm1506_vm8 = vcmp.eq.s32.totalorder %v5423_v58, %v5296_v10  ;;  %vm4011_vm12 = vmpackc.low %vm1536_vm1, %vm1535_vm13  ;;  %vm1490_vm13 = vcmp.eq.s32.totalorder %v5431_v44, %v5296_v10 }
 0x2bc   : > { %4050 = vmatprep.subr.msk.bf16.mxu0 %vm6514_vm3, %v6471_v45  ;;  %vm1505_vm3 = vcmp.eq.s32.totalorder %v5425_v11, %v5296_v10  ;;  %vm3963_vm11 = vmpackc.low %vm1488_vm7, %vm1487_vm0  ;;  %vm1508_vm0 = vcmp.eq.s32.totalorder %v5442_v2, %v5296_v10 }
 0x2bd   : > { %vm3981_vm1 = vmpackc.low %vm1506_vm8, %vm1505_vm3  ;;  %vm1522_vm8 = vcmp.eq.s32.totalorder %v5435_v48, %v5296_v10  ;;  %vm1521_vm3 = vcmp.eq.s32.totalorder %v6517_v16, %v5296_v10 }
 0x2be   : > { %4089 = vmatpush3.bf16.msk.msra.mxu1 %vm6515_vm9, %v6471_v45  ;;  %3930 = vmatmul.mubr.msk.bf16.gmra.mrb[24].mxu0 %vm6509_vm10, %v4307_v50  ;;  %vm1519_vm9 = vcmp.eq.s32.totalorder %v5421_v9, %v5296_v10 }
 0x2bf   : > { %4090 = vmatprep.subr.msk.bf16.mxu1 %vm6516_vm5, %v6471_v45  ;;  %4051 = vmatpush3.bf16.msk.msra.mxu0 %vm3961_vm2, %v6471_v45  ;;  %vm1537_vm2 = vcmp.eq.s32.totalorder %v5429_v62, %v5296_v10  ;;  %vm3995_vm7 = vmpackc.low %vm1520_vm6, %vm1519_vm9  ;;  %vm1507_vm5 = vcmp.eq.s32.totalorder %v5446_v40, %v5296_v10  ;;  %vm1540_vm6 = vcmp.eq.s32.totalorder %v5467_v15, %v5296_v10  ;;  %v1336_v40 = vpop.permute.xlu1 %1335 }
 0x2c0   : > { %4052 = vmatprep.subr.msk.bf16.mxu0 %vm3979_vm14, %v6471_v45  ;;  %2629 = vmatprep.mubr.bf16.mxu0 %v6466_v14  ;;  %vm1489_vm14 = vcmp.eq.s32.totalorder %v5433_v56, %v5296_v10  ;;  %vm1539_vm9 = vcmp.eq.s32.totalorder %v5469_v28, %v5296_v10 }
 0x2c1   : > { %3950 = vmatmul.mubr.msk.bf16.gmra.mrb[24].mxu1 %vm6509_vm10, %v4307_v50 }
 0x2c2   : > { %4091 = vmatpush3.bf16.msk.msra.mxu1 %vm3993_vm15, %v6471_v45  ;;  %2702 = vmatprep.mubr.bf16.mxu1 %v6466_v14  ;;  %vm4013_vm15 = vmpackc.low %vm1538_vm4, %vm1537_vm2  ;;  %vm1492_vm4 = vcmp.eq.s32.totalorder %v5514_v21, %v5296_v10  ;;  %vm1491_vm2 = vcmp.eq.s32.totalorder %v5516_v30, %v5296_v10 }
 0x2c3   : > { %4092 = vmatprep.subr.msk.bf16.mxu1 %vm4011_vm12, %v6471_v45  ;;  %4053 = vmatpush3.bf16.msk.msra.mxu0 %vm3963_vm11, %v6471_v45  ;;  %vm3965_vm12 = vmpackc.low %vm1490_vm13, %vm1489_vm14  ;;  %vm1510_vm13 = vcmp.eq.s32.totalorder %v5602_v27, %v5296_v10  ;;  %vm1509_vm14 = vcmp.eq.s32.totalorder %v5604_v31, %v5296_v10 }
 0x2c4   : > { %4054 = vmatprep.subr.msk.bf16.mxu0 %vm3981_vm1, %v6471_v45  ;;  %vm3983_vm11 = vmpackc.low %vm1508_vm0, %vm1507_vm5  ;;  %vm1524_vm0 = vcmp.eq.s32.totalorder %v5565_v41, %v5296_v10  ;;  %vm1523_vm5 = vcmp.eq.s32.totalorder %v5567_v42, %v5296_v10 }
 0x2c5   : > { %vm3997_vm1 = vmpackc.low %vm1522_vm8, %vm1521_vm3  ;;  %vm1542_vm3 = vcmp.eq.s32.totalorder %v5617_v49, %v5296_v10 }
 0x2c6   : > { %4093 = vmatpush3.bf16.msk.msra.mxu1 %vm3995_vm7, %v6471_v45  ;;  %3931 = vmatmul.mubr.msk.bf16.gmra.mrb[28].mxu0 %vm6509_vm10, %v4308_v37  ;;  %vm4015_vm7 = vmpackc.low %vm1540_vm6, %vm1539_vm9  ;;  %vm1494_vm9 = vcmp.eq.s32.totalorder %v5623_v57, %v5296_v10  ;;  %v6526_v57 = vld [vmem:[#allocation23_spill] sm:$0xff] }
 0x2c7   : > { %4094 = vmatprep.subr.msk.bf16.mxu1 %vm4013_vm15, %v6471_v45  ;;  %4055 = vmatpush3.bf16.msk.msra.mxu0 %vm3965_vm12, %v6471_v45  ;;  %vm6518_vm15 = vmmov %vm6509_vm10  ;;  %vm1541_vm12 = vcmp.eq.s32.totalorder %v5619_v51, %v5296_v10  ;;  %vm1493_vm10 = vcmp.eq.s32.totalorder %v5625_v60, %v5296_v10 }
 0x2c8   : > { %4056 = vmatprep.subr.msk.bf16.mxu0 %vm3983_vm11, %v6471_v45  ;;  %2639 = vmatprep.mubr.bf16.mxu0 %v6466_v14  ;;  %vm3967_vm8 = vmpackc.low %vm1492_vm4, %vm1491_vm2  ;;  %vm1512_vm4 = vcmp.eq.s32.totalorder %v5673_v43, %v5296_v10  ;;  %vm1511_vm2 = vcmp.eq.s32.totalorder %v5675_v29, %v5296_v10 }
 0x2c9   : > { %3951 = vmatmul.mubr.msk.bf16.gmra.mrb[28].mxu1 %vm6518_vm15, %v4308_v37  ;;  %vm3985_vm6 = vmpackc.low %vm1510_vm13, %vm1509_vm14  ;;  %vm1526_vm13 = vcmp.eq.s32.totalorder %v5633_v26, %v5296_v10  ;;  %vm1525_vm14 = vcmp.eq.s32.totalorder %v5635_v53, %v5296_v10  ;;  %vm1544_vm15 = vcmp.eq.s32.totalorder %v5717_v59, %v5296_v10  ;;  %v6527_v59 = vld [vmem:[#allocation27_spill] sm:$0xff] }
 0x2ca   : > { %4095 = vmatpush3.bf16.msk.msra.mxu1 %vm3997_vm1, %v6471_v45  ;;  %2712 = vmatprep.mubr.bf16.mxu1 %v6466_v14  ;;  %vm3999_vm11 = vmpackc.low %vm1524_vm0, %vm1523_vm5  ;;  %vm1543_vm0 = vcmp.eq.s32.totalorder %v5719_v1, %v5296_v10  ;;  %vm6519_vm5 = vcmask 523264   ;;  %v1432_v14 = vpop.permute.xlu1 %1431 }
 0x2cb   : > { %4096 = vmatprep.subr.msk.bf16.mxu1 %vm4015_vm7, %v6471_v45  ;;  %4057 = vmatpush3.bf16.msk.msra.mxu0 %vm3967_vm8, %v6471_v45  ;;  %vm4017_vm1 = vmpackc.low %vm1542_vm3, %vm1541_vm12  ;;  %vm1496_vm3 = vcmp.eq.s32.totalorder %v1336_v40, %v5296_v10  ;;  %vm1495_vm12 = vcmp.eq.s32.totalorder %v1333_v34, %v5296_v10 }
 0x2cc   : > { %4058 = vmatprep.subr.msk.bf16.mxu0 %vm3985_vm6, %v6471_v45  ;;  %vm3969_vm7 = vmpackc.low %vm1494_vm9, %vm1493_vm10 }
 0x2cd   : > { %vm3987_vm8 = vmpackc.low %vm1512_vm4, %vm1511_vm2  ;;  %vm1527_vm4 = vcmp.eq.s32.totalorder %v1429_v17, %v5296_v10 }
 0x2ce   : > { %4097 = vmatpush3.bf16.msk.msra.mxu1 %vm3999_vm11, %v6471_v45  ;;  %3932 = vmatmul.mubr.msk.bf16.gmra.mrb[32].mxu0 %vm6519_vm5, %v4309_v46  ;;  %vm4001_vm6 = vmpackc.low %vm1526_vm13, %vm1525_vm14 }
 0x2cf   : > { %4098 = vmatprep.subr.msk.bf16.mxu1 %vm4017_vm1, %v6471_v45  ;;  %4059 = vmatpush3.bf16.msk.msra.mxu0 %vm3969_vm7, %v6471_v45  ;;  %vm4019_vm9 = vmpackc.low %vm1544_vm15, %vm1543_vm0 }
 0x2d0   : > { %4060 = vmatprep.subr.msk.bf16.mxu0 %vm3987_vm8, %v6471_v45  ;;  %vm6520_vm10 = vmmov %vm6519_vm5  ;;  %vm1528_vm5 = vcmp.eq.s32.totalorder %v1432_v14, %v5296_v10 }
 0x2d1   : > { %3952 = vmatmul.mubr.msk.bf16.gmra.mrb[32].mxu1 %vm6520_vm10, %v4309_v46  ;;  %vm3971_vm11 = vmpackc.low %vm1496_vm3, %vm1495_vm12 }
 0x2d2   : > { %4099 = vmatpush3.bf16.msk.msra.mxu1 %vm4001_vm6, %v6471_v45  ;;  %vm4003_vm2 = vmpackc.low %vm1528_vm5, %vm1527_vm4  ;;  %vm3357_vm6 = vcmask (!%p4021_p2), 261120  }
 0x2d3   : > { %4100 = vmatprep.subr.msk.bf16.mxu1 %vm4019_vm9, %v6471_v45  ;;  %4061 = vmatpush3.bf16.msk.msra.mxu0 %vm3971_vm11, %v6471_v45  ;;  %vm6568_vm13 = vmmov %vm6520_vm10  ;;  %vm6580_vm9 = vcmask (!%p4021_p2), 523264  }
 0x2d4   : > { %vm6569_vm14 = vmmov %vm6520_vm10 }
 0x2d5   : > { %vm6570_vm7 = vmmov %vm6520_vm10 }
 0x2d6   : > { %4101 = vmatpush3.bf16.msk.msra.mxu1 %vm4003_vm2, %v6471_v45  ;;  %v6525_v45 = vld [vmem:[#allocation24_spill] sm:$0xff]  ;;  %vm6571_vm15 = vmmov %vm6570_vm7 }
 0x2d7   : > { %vm6572_vm0 = vmmov %vm6570_vm7 }
 0x2d8   : > { %vm6573_vm8 = vmmov %vm6572_vm0 }
 0x2d9   : > { %vm6574_vm3 = vmmov %vm6572_vm0 }
 0x2da   : > { %vm6575_vm12 = vmmov %vm6572_vm0 }
 0x2db   : > { %vm6582_vm10 = vmmov (!%p4021_p2), %vm6580_vm9 }
 0x2dc   : > { %vm6583_vm11 = vmmov (!%p4021_p2), %vm6580_vm9 }
 0x2dd   : > { %vm6584_vm5 = vmmov (!%p4021_p2), %vm6580_vm9 }
 0x2de   : > { %vm6585_vm4 = vmmov (!%p4021_p2), %vm6584_vm5 }
 0x2df   : > { %vm6586_vm2 = vmmov (!%p4021_p2), %vm6585_vm4 }
 0x389   : > { %v2611_v25 = vpop.f32.mrb[20].mxu0 }
 0x38a   : > { %v5825_v5 = vadd.f32 %v6521_v8, %v2611_v25  ;;  %v2613_v35 = vpop.f32.mrb[21].mxu0 }
 0x38b   : > { %v5828_v4 = vadd.f32 %v6521_v8, %v2613_v35  ;;  %v2615_v3 = vpop.f32.mrb[22].mxu0 }
 0x38c   : > { %v2803_v10 = vmax.f32 %v5825_v5, 0.0  ;;  %v2684_v38 = vpop.f32.mrb[20].mxu1  ;;  %v5832_v13 = vadd.f32 %v6522_v7, %v2615_v3  ;;  %v2617_v6 = vpop.f32.mrb[23].mxu0 }
 0x38d   : > { %v5835_v9 = vadd.f32 %v6521_v8, %v2684_v38  ;;  %v6396_v58 = vmax.f32 %v5828_v4, 0.0  ;;  %v2686_v11 = vpop.f32.mrb[21].mxu1  ;;  %v5839_v20 = vadd.f32 %v6522_v7, %v2617_v6  ;;  %v6528_v38 = vld [vmem:[#allocation29_spill] sm:$0xff] }
 0x38e   : > { %v5842_v62 = vadd.f32 %v6521_v8, %v2686_v11  ;;  %v2807_v44 = vmax.f32 %v5832_v13, 0.0  ;;  %v2688_v56 = vpop.f32.mrb[22].mxu1  ;;  %v2883_v63 = vmul.f32 %v6523_v32, %v2803_v10 }
 0x38f   : > { %v6390_v48 = vmax.f32 %v5835_v9, 0.0  ;;  %v5847_v2 = vadd.f32 %v6522_v7, %v2688_v56  ;;  %v6395_v0 = vmax.f32 %v5839_v20, 0.0  ;;  %v2690_v54 = vpop.f32.mrb[23].mxu1  ;;  %v2884_v39 = vmul.f32 %v6523_v32, %v6396_v58 }
 0x390   : > { %v6389_v55 = vmax.f32 %v5842_v62, 0.0  ;;  %v2887_v18 = vmul.f32 %v6524_v61, %v2807_v44  ;;  %v5858_v24 = vadd.f32 %v6522_v7, %v2690_v54 }
 0x391   : > { %v6386_v52 = vmax.f32 %v5847_v2, 0.0  ;;  %v2888_v23 = vmul.f32 %v6524_v61, %v6395_v0  ;;  %v2621_v15 = vpop.f32.mrb[24].mxu0  ;;  %v2885_v47 = vmul.f32 %v6523_v32, %v6390_v48 }
 0x392   : > { %v2915_v28 = vadd.f32 %v2887_v18, %v2883_v63  ;;  %v6387_v33 = vmax.f32 %v5858_v24, 0.0  ;;  %v5869_v21 = vadd.f32 %v6525_v45, %v2621_v15  ;;  %v2623_v30 = vpop.f32.mrb[25].mxu0  ;;  %v2886_v31 = vmul.f32 %v6523_v32, %v6389_v55 }
 0x393   : > { %v2889_v41 = vmul.f32 %v6524_v61, %v6386_v52  ;;  %v2928_v42 = vadd.f32 %v2888_v23, %v2884_v39  ;;  %v5878_v22 = vadd.f32 %v6525_v45, %v2623_v30  ;;  %v2625_v27 = vpop.f32.mrb[26].mxu0  ;;  %v6529_v23 = vld [vmem:[#allocation28_spill] sm:$0xff] }
 0x394   : > { %v2890_v36 = vmul.f32 %v6524_v61, %v6387_v33  ;;  %v6399_v49 = vmax.f32 %v5869_v21, 0.0  ;;  %v2694_v51 = vpop.f32.mrb[24].mxu1  ;;  %v5888_v60 = vadd.f32 %v6526_v57, %v2625_v27  ;;  %v2627_v19 = vpop.f32.mrb[27].mxu0 }
 0x395   : > { %v2941_v26 = vadd.f32 %v2889_v41, %v2885_v47  ;;  %v5891_v53 = vadd.f32 %v6525_v45, %v2694_v51  ;;  %v6393_v50 = vmax.f32 %v5878_v22, 0.0  ;;  %v2696_v43 = vpop.f32.mrb[25].mxu1  ;;  %v5895_v29 = vadd.f32 %v6526_v57, %v2627_v19 }
 0x396   : > { %v2954_v37 = vadd.f32 %v2890_v36, %v2886_v31  ;;  %v2891_v1 = vmul.f32 %v6527_v59, %v6399_v49  ;;  %v5901_v16 = vadd.f32 %v6525_v45, %v2696_v43  ;;  %v6391_v40 = vmax.f32 %v5888_v60, 0.0  ;;  %v2698_v34 = vpop.f32.mrb[26].mxu1 }
 0x397   : > { %v6381_v46 = vmax.f32 %v5891_v53, 0.0  ;;  %v2892_v14 = vmul.f32 %v6527_v59, %v6393_v50  ;;  %v5909_v17 = vadd.f32 %v6526_v57, %v2698_v34  ;;  %v6392_v25 = vmax.f32 %v5895_v29, 0.0  ;;  %v2700_v8 = vpop.f32.mrb[27].mxu1 }
 0x398   : > { %v2916_v35 = vadd.f32 %v2915_v28, %v2891_v1  ;;  %v6385_v3 = vmax.f32 %v5901_v16, 0.0  ;;  %v2895_v7 = vmul.f32 %v6528_v38, %v6391_v40  ;;  %v5917_v6 = vadd.f32 %v6526_v57, %v2700_v8  ;;  %v6530_v57 = vld [vmem:[#allocation30_spill] sm:$0xff]  ;;  %v6531_v8 = vld [vmem:[#allocation31_spill] sm:$0xff] }
 0x399   : > { %v2893_v11 = vmul.f32 %v6527_v59, %v6381_v46  ;;  %v2929_v56 = vadd.f32 %v2928_v42, %v2892_v14  ;;  %v6377_v54 = vmax.f32 %v5909_v17, 0.0  ;;  %v2896_v32 = vmul.f32 %v6528_v38, %v6392_v25  ;;  %v2631_v63 = vpop.f32.mrb[28].mxu0 }
 0x39a   : > { %v2894_v61 = vmul.f32 %v6527_v59, %v6385_v3  ;;  %v2917_v18 = vadd.f32 %v2916_v35, %v2895_v7  ;;  %v6383_v39 = vmax.f32 %v5917_v6, 0.0  ;;  %v5931_v15 = vadd.f32 %v6529_v23, %v2631_v63  ;;  %v2633_v28 = vpop.f32.mrb[29].mxu0 }
 0x39b   : > { %v2942_v45 = vadd.f32 %v2941_v26, %v2893_v11  ;;  %v2897_v30 = vmul.f32 %v6528_v38, %v6377_v54  ;;  %v2930_v47 = vadd.f32 %v2929_v56, %v2896_v32  ;;  %v5937_v41 = vadd.f32 %v6529_v23, %v2633_v28  ;;  %v2635_v42 = vpop.f32.mrb[30].mxu0 }
 0x39c   : > { %v2955_v27 = vadd.f32 %v2954_v37, %v2894_v61  ;;  %v2898_v31 = vmul.f32 %v6528_v38, %v6383_v39  ;;  %v6373_v36 = vmax.f32 %v5931_v15, 0.0  ;;  %v2704_v51 = vpop.f32.mrb[28].mxu1  ;;  %v5944_v19 = vadd.f32 %v6530_v57, %v2635_v42  ;;  %v2637_v26 = vpop.f32.mrb[31].mxu0 }
 0x39d   : > { %v2943_v43 = vadd.f32 %v2942_v45, %v2897_v30  ;;  %v5947_v59 = vadd.f32 %v6529_v23, %v2704_v51  ;;  %v6376_v1 = vmax.f32 %v5937_v41, 0.0  ;;  %v2706_v34 = vpop.f32.mrb[29].mxu1  ;;  %v5951_v37 = vadd.f32 %v6530_v57, %v2637_v26 }
 0x39e   : > { %v2956_v14 = vadd.f32 %v2955_v27, %v2898_v31  ;;  %v2899_v35 = vmul.f32 %v6531_v8, %v6373_v36  ;;  %v5957_v38 = vadd.f32 %v6529_v23, %v2706_v34  ;;  %v6372_v7 = vmax.f32 %v5944_v19, 0.0  ;;  %v2708_v11 = vpop.f32.mrb[30].mxu1  ;;  %v6532_v23 = vld [vmem:[#allocation33_spill] sm:$0xff] }
 0x39f   : > { %v6374_v56 = vmax.f32 %v5947_v59, 0.0  ;;  %v2900_v32 = vmul.f32 %v6531_v8, %v6376_v1  ;;  %v5965_v63 = vadd.f32 %v6530_v57, %v2708_v11  ;;  %v6375_v61 = vmax.f32 %v5951_v37, 0.0  ;;  %v2710_v28 = vpop.f32.mrb[31].mxu1 }
 0x3a0   : > { %v2918_v45 = vadd.f32 %v2917_v18, %v2899_v35  ;;  %v6378_v30 = vmax.f32 %v5957_v38, 0.0  ;;  %v2903_v42 = vmul.f32 %v6532_v23, %v6372_v7  ;;  %v5973_v27 = vadd.f32 %v6530_v57, %v2710_v28  ;;  %v6533_v28 = vld [vmem:[#allocation32_spill] sm:$0xff] }
 0x3a1   : > { %v2901_v31 = vmul.f32 %v6531_v8, %v6374_v56  ;;  %v2931_v51 = vadd.f32 %v2930_v47, %v2900_v32  ;;  %v6379_v26 = vmax.f32 %v5965_v63, 0.0  ;;  %v2904_v18 = vmul.f32 %v6532_v23, %v6375_v61  ;;  %v2641_v34 = vpop.f32.mrb[32].mxu0 }
 0x3a2   : > { %v2902_v35 = vmul.f32 %v6531_v8, %v6378_v30  ;;  %v2919_v11 = vadd.f32 %v2918_v45, %v2903_v42  ;;  %v6380_v57 = vmax.f32 %v5973_v27, 0.0  ;;  %v5987_v7 = vadd.f32 %v6533_v28, %v2641_v34  ;;  %v2643_v36 = vpop.f32.mrb[33].mxu0  ;;  %v6534_v34 = vld [vmem:[#allocation34_spill] sm:$0xff] }
 0x3a3   : > { %v2944_v56 = vadd.f32 %v2943_v43, %v2901_v31  ;;  %v2905_v47 = vmul.f32 %v6532_v23, %v6379_v26  ;;  %v2932_v32 = vadd.f32 %v2931_v51, %v2904_v18  ;;  %v5993_v61 = vadd.f32 %v6533_v28, %v2643_v36  ;;  %v2645_v1 = vpop.f32.mrb[34].mxu0 }
 0x3a4   : > { %v2957_v54 = vadd.f32 %v2956_v14, %v2902_v35  ;;  %v2906_v8 = vmul.f32 %v6532_v23, %v6380_v57  ;;  %v6382_v45 = vmax.f32 %v5987_v7, 0.0  ;;  %v2714_v42 = vpop.f32.mrb[32].mxu1  ;;  %v6000_v30 = vadd.f32 %v6534_v34, %v2645_v1  ;;  %v2647_v43 = vpop.f32.mrb[35].mxu0  ;;  %v6535_v23 = vld [vmem:[#allocation36_spill] sm:$0xff] }
 0x3a5   : > { %v2945_v31 = vadd.f32 %v2944_v56, %v2905_v47  ;;  %v6003_v26 = vadd.f32 %v6533_v28, %v2714_v42  ;;  %v6384_v36 = vmax.f32 %v5993_v61, 0.0  ;;  %v2716_v51 = vpop.f32.mrb[33].mxu1  ;;  %v6007_v14 = vadd.f32 %v6534_v34, %v2647_v43 }
 0x3a6   : > { %v2958_v18 = vadd.f32 %v2957_v54, %v2906_v8  ;;  %v2907_v35 = vmul.f32 %v6535_v23, %v6382_v45  ;;  %v6013_v57 = vadd.f32 %v6533_v28, %v2716_v51  ;;  %v2831_v1 = vmax.f32 %v6000_v30, 0.0  ;;  %v2718_v56 = vpop.f32.mrb[34].mxu1  ;;  %v6536_v28 = vld [vmem:[#allocation35_spill] sm:$0xff] }
 0x3a7   : > { %v6388_v47 = vmax.f32 %v6003_v26, 0.0  ;;  %v2908_v42 = vmul.f32 %v6535_v23, %v6384_v36  ;;  %v6021_v43 = vadd.f32 %v6534_v34, %v2718_v56  ;;  %v6398_v54 = vmax.f32 %v6007_v14, 0.0  ;;  %v2720_v8 = vpop.f32.mrb[35].mxu1 }
 0x3a8   : > { %v2920_v46 = vadd.f32 %v2919_v11, %v2907_v35  ;;  %v6394_v45 = vmax.f32 %v6013_v57, 0.0  ;;  %v2911_v51 = vmul.f32 %v6536_v28, %v2831_v1  ;;  %v6029_v39 = vadd.f32 %v6534_v34, %v2720_v8 }
 0x3a9   : > { %v2909_v36 = vmul.f32 %v6535_v23, %v6388_v47  ;;  %v2933_v3 = vadd.f32 %v2932_v32, %v2908_v42  ;;  %v6397_v56 = vmax.f32 %v6021_v43, 0.0  ;;  %v2912_v11 = vmul.f32 %v6536_v28, %v6398_v54 }
 0x3aa   : > { %v2910_v35 = vmul.f32 %v6535_v23, %v6394_v45  ;;  %v2921_v52 = vadd.f32 %v2920_v46, %v2911_v51  ;;  %v2834_v33 = vmax.f32 %v6029_v39, 0.0  ;;  %v6542_v30 = vmax.f32 %v5828_v4, 0.0 }
 0x3ab   : > { %v2946_v34 = vadd.f32 %v2945_v31, %v2909_v36  ;;  %v2913_v8 = vmul.f32 %v6536_v28, %v6397_v56  ;;  %v2934_v47 = vadd.f32 %v2933_v3, %v2912_v11 }
 0x3ac   : > { %v2959_v32 = vadd.f32 %v2958_v18, %v2910_v35  ;;  %v2922_v42 = vrot.slane %v2921_v52, 4  ;;  %v2914_v55 = vmul.f32 %v6536_v28, %v2834_v33 }
 0x3ad   : > { %v2947_v48 = vadd.f32 %v2946_v34, %v2913_v8  ;;  %v2935_v40 = vrot.slane %v2934_v47, 4 }
 0x3ae   : > { %v2923_v25 = vadd.f32 %v2922_v42, %v2921_v52  ;;  %v2960_v50 = vadd.f32 %v2959_v32, %v2914_v55 }
 0x3af   : > { %v2948_v23 = vrot.slane %v2947_v48, 4  ;;  %v2936_v46 = vadd.f32 %v2935_v40, %v2934_v47 }
 0x3b0   : > { %v2924_v51 = vrot.slane %v2923_v25, 2  ;;  %v2961_v45 = vrot.slane %v2960_v50, 4 }
 0x3b1   : > { %v2949_v31 = vadd.f32 %v2948_v23, %v2947_v48  ;;  %v2937_v36 = vrot.slane %v2936_v46, 2 }
 0x3b2   : > { %v2925_v0 = vadd.f32 %v2924_v51, %v2923_v25  ;;  %v2962_v58 = vadd.f32 %v2961_v45, %v2960_v50 }
 0x3b3   : > { %v2950_v56 = vrot.slane %v2949_v31, 2  ;;  %v2938_v3 = vadd.f32 %v2937_v36, %v2936_v46 }
 0x3b4   : > { %v2926_v18 = vrot.slane %v2925_v0, 1  ;;  %v2963_v11 = vrot.slane %v2962_v58, 2 }
 0x3b5   : > { %v2951_v35 = vadd.f32 %v2950_v56, %v2949_v31  ;;  %v2939_v54 = vrot.slane %v2938_v3, 1 }
 0x3b6   : > { %v2927_v49 = vadd.f32 %v2926_v18, %v2925_v0  ;;  %v2964_v28 = vadd.f32 %v2963_v11, %v2962_v58 }
 0x3b7   : > { %v2952_v34 = vrot.slane %v2951_v35, 1  ;;  %v2940_v8 = vadd.f32 %v2939_v54, %v2938_v3 }
 0x3b8   : > { %v3953_v52 = vmul.f32 -1.442695, %v2927_v49  ;;  %v2965_v55 = vrot.slane %v2964_v28, 1  ;;  %v4463_v49 = vmov 1966171168  }
 0x3b9   : > { %v2953_v32 = vadd.f32 %v2952_v34, %v2951_v35  ;;  %v3954_v40 = vmul.f32 -1.442695, %v2940_v8  ;;  %v2998_v54 = vunpack.c.l.s4 %v4463_v49  ;;  %v6550_v49 = vmax.f32 %v5858_v24, 0.0 }
 0x3ba   : > { %4310 = vpow2.f32 %v3953_v52  ;;  %v2966_v47 = vadd.f32 %v2965_v55, %v2964_v28  ;;  %v6537_v28 = vmax.f32 %v5869_v21, 0.0  ;;  %v6538_v52 = vmax.f32 %v6007_v14, 0.0 }
 0x3bb   : > { %v3955_v48 = vmul.f32 -1.442695, %v2953_v32  ;;  %4312 = vpow2.f32 %v3954_v40  ;;  %v2999_v51 = vunpack.c.0.s8 %v2998_v54  ;;  %v6544_v21 = vmax.f32 %v5878_v22, 0.0 }
 0x3bc   : > { %v3956_v25 = vmul.f32 -1.442695, %v2966_v47  ;;  %v6545_v14 = vmax.f32 %v5895_v29, 0.0  ;;  %v6551_v54 = vmax.f32 %v5847_v2, 0.0  ;;  %v6555_v2 = vmax.f32 %v5909_v17, 0.0 }
 0x3bd   : > { %4314 = vpow2.f32 %v3955_v48  ;;  %v3002_v36 = vsub.s32 %v2999_v51, %v4684_v12  ;;  %v6539_v12 = vlaneseq  ;;  %v6546_v48 = vmax.f32 %v5888_v60, 0.0 }
 0x3be   : > { %4316 = vpow2.f32 %v3956_v25  ;;  %v6552_v51 = vmax.f32 %v5901_v16, 0.0  ;;  %v6560_v17 = vmax.f32 %v5931_v15, 0.0  ;;  %v6565_v15 = vmax.f32 %v6013_v57, 0.0 }
 0x3bf   : > { %vm6064_vm1 = vcmp.lt.s32.totalorder %v6539_v12, 512 }
 0x3c4   : > { %v4311_v50 = vpop.eup %4310 }
 0x3c5   : > { %v4313_v45 = vpop.eup %4312  ;;  %v2979_v42 = vadd.f32 1.0, %v4311_v50 }
 0x3c6   : > { %v2980_v56 = vadd.f32 1.0, %v4313_v45  ;;  %v6547_v45 = vmax.f32 %v6021_v43, 0.0 }
 0x3c7   : > { %v4315_v23 = vpop.eup %4314  ;;  %4318 = vrcp.f32 %v2979_v42 }
 0x3c8   : > { %v4317_v58 = vpop.eup %4316  ;;  %v2981_v0 = vadd.f32 1.0, %v4315_v23  ;;  %4320 = vrcp.f32 %v2980_v56 }
 0x3c9   : > { %v2982_v46 = vadd.f32 1.0, %v4317_v58 }
 0x3ca   : > { %4322 = vrcp.f32 %v2981_v0  ;;  %v6549_v0 = vmax.f32 %v5842_v62, 0.0  ;;  %v6554_v62 = vmax.f32 %v5891_v53, 0.0  ;;  %v6559_v53 = vmax.f32 %v5973_v27, 0.0 }
 0x3cb   : > { %4324 = vrcp.f32 %v2982_v46 }
 0x3d1   : > { %v4319_v31 = vpop.eup %4318 }
 0x3d2   : > { %v4321_v3 = vpop.eup %4320  ;;  %v6051_v18 = vmul.f32 %v4319_v31, %v2831_v1  ;;  %v3025_v11 = vmul.f32 %v4319_v31, %v2803_v10  ;;  %v3029_v35 = vmul.f32 %v4319_v31, %v2807_v44  ;;  %v3033_v34 = vmul.f32 %v4319_v31, %v6537_v28 }
 0x3d3   : > { %v2995_v8 = vcombine.low %v4319_v31, %v4321_v3  ;;  %v6061_v55 = vmul.f32 %v4321_v3, %v6538_v52  ;;  %v3026_v5 = vmul.f32 %v4321_v3, %v6542_v30  ;;  %v6543_v10 = vmax.f32 %v5839_v20, 0.0 }
 0x3d4   : > { %v4323_v44 = vpop.eup %4322  ;;  %v3057_v1 = vpack.c.bf16 %v3029_v35, %v3025_v11  ;;  %v3034_v40 = vmul.f32 %v4321_v3, %v6544_v21  ;;  %v3038_v47 = vmul.f32 %v4321_v3, %v6545_v14  ;;  %v3037_v25 = vmul.f32 %v4319_v31, %v6546_v48 }
 0x3d5   : > { %v3030_v13 = vmul.f32 %v4321_v3, %v6543_v10  ;;  %v4325_v50 = vpop.eup %4324  ;;  %v3055_v42 = vmul.f32 %v4323_v44, %v6547_v45  ;;  %v3003_v4 = vrot.slane %v2995_v8, %v3002_v36  ;;  %v6548_v20 = vmax.f32 %v5835_v9, 0.0 }
 0x3d6   : > { %v2996_v58 = vcombine.low %v4323_v44, %v4325_v50  ;;  %v3056_v22 = vmul.f32 %v4325_v50, %v2834_v33  ;;  %v3028_v29 = vmul.f32 %v4325_v50, %v6549_v0  ;;  %v3032_v60 = vmul.f32 %v4325_v50, %v6550_v49 }
 0x3d7   : > { %v3058_v56 = vpack.c.bf16 %v3030_v13, %v3026_v5  ;;  %v3027_v23 = vmul.f32 %v4323_v44, %v6548_v20  ;;  %v3031_v43 = vmul.f32 %v4323_v44, %v6551_v54  ;;  %v3062_v46 = vpack.c.bf16 %v3038_v47, %v3034_v40 }
 0x3d8   : > { %v3036_v11 = vmul.f32 %v4325_v50, %v6552_v51  ;;  %v6553_v9 = vmax.f32 %v5917_v6, 0.0  ;;  %v3010_v28 = vrot.slane %v2996_v58, %v3002_v36  ;;  %v3060_v39 = vpack.c.bf16 %v3032_v60, %v3028_v29 }
 0x3d9   : > { %3113 = vmatprep.mubr.bf16.mxu0 %v3058_v56  ;;  %v3061_v33 = vpack.c.bf16 %v3037_v25, %v3033_v34  ;;  %v3035_v8 = vmul.f32 %v4323_v44, %v6554_v62  ;;  %v3059_v24 = vpack.c.bf16 %v3031_v43, %v3027_v23  ;;  %v3039_v12 = vmul.f32 %v4323_v44, %v6555_v2  ;;  %v3074_v43 = vld [vmem:[#allocation2 + $0x8] sm:$0xff] }
 0x3da   : > { %v3040_v35 = vmul.f32 %v4325_v50, %v6553_v9  ;;  %3114 = vmatmul.mubr.bf16.vlgmr.msra.gmra.mrb[36].mxu0 %v3057_v1  ;;  %v6556_v30 = vmax.f32 %v5937_v41, 0.0  ;;  %v3011_v5 = vcombine.low %v3003_v4, %v3010_v28  ;;  %3178 = vmatprep.mubr.bf16.mxu1 %v3060_v39  ;;  %v6557_v6 = vmax.f32 %v5951_v37, 0.0 }
 0x3db   : > { %3121 = vmatprep.mubr.bf16.mxu0 %v3062_v46  ;;  %v6558_v13 = vmax.f32 %v5957_v38, 0.0  ;;  %v3048_v1 = vmul.f32 %v4325_v50, %v6559_v53  ;;  %3179 = vmatmul.mubr.bf16.vlgmr.msra.gmra.mrb[36].mxu1 %v3059_v24  ;;  %v3063_v21 = vpack.c.bf16 %v3039_v12, %v3035_v8  ;;  %v3041_v40 = vmul.f32 %v4319_v31, %v6560_v17  ;;  %v3075_v12 = vld [vmem:[#allocation2 + $0x10] sm:$0xff] }
 0x3dc   : > { %v3064_v52 = vpack.c.bf16 %v3040_v35, %v3036_v11  ;;  %v3042_v16 = vmul.f32 %v4321_v3, %v6556_v30  ;;  %v3046_v10 = vmul.f32 %v4321_v3, %v6557_v6  ;;  %v6561_v41 = vmax.f32 %v5944_v19, 0.0  ;;  %v3076_v6 = vld [vmem:[#allocation2 + $0x18] sm:$0xff] }
 0x3dd   : > { %v3044_v34 = vmul.f32 %v4325_v50, %v6558_v13  ;;  %v6562_v47 = vmax.f32 %v5947_v59, 0.0  ;;  %v3018_v37 = vrot.slane %v3011_v5, %v3002_v36  ;;  %v6563_v45 = vmax.f32 %v5965_v63, 0.0 }
 0x3de   : > { %v3045_v14 = vmul.f32 %v4319_v31, %v6561_v41  ;;  %3186 = vmatprep.mubr.bf16.mxu1 %v3064_v52  ;;  %v3066_v25 = vpack.c.bf16 %v3046_v10, %v3042_v16  ;;  %v6564_v56 = vmax.f32 %v5993_v61, 0.0  ;;  %v3052_v23 = vmul.f32 %v4325_v50, %v6565_v15 }
 0x3df   : > { %v3043_v48 = vmul.f32 %v4323_v44, %v6562_v47  ;;  %v3068_v38 = vpack.c.bf16 %v3048_v1, %v3044_v34  ;;  %v3047_v27 = vmul.f32 %v4323_v44, %v6563_v45  ;;  %v6566_v19 = vmax.f32 %v5987_v7, 0.0  ;;  %3024 = vst.msk [vmem:[%s4666_s11] sm:$0xf] %vm6064_vm1, %v3018_v37 }
 0x3e0   : > { %v3065_v4 = vpack.c.bf16 %v3045_v14, %v3041_v40  ;;  %v3050_v20 = vmul.f32 %v4321_v3, %v6564_v56  ;;  %v6567_v36 = vmax.f32 %v6003_v26, 0.0  ;;  %v3072_v29 = vpack.c.bf16 %v3056_v22, %v3052_v23 }
 0x3e1   : > { %v3049_v58 = vmul.f32 %v4319_v31, %v6566_v19  ;;  %v3067_v59 = vpack.c.bf16 %v3047_v27, %v3043_v48 }
 0x3e2   : > { %v3051_v0 = vmul.f32 %v4323_v44, %v6567_v36  ;;  %v3070_v63 = vpack.c.bf16 %v6061_v55, %v3050_v20  ;;  %3122 = vmatmul.mubr.bf16.gmra.mrb[40].mxu0 %v3061_v33 }
 0x3e3   : > { %v3069_v49 = vpack.c.bf16 %v6051_v18, %v3049_v58  ;;  %3129 = vmatprep.mubr.bf16.mxu0 %v3066_v25  ;;  %3187 = vmatmul.mubr.bf16.gmra.mrb[40].mxu1 %v3063_v21  ;;  %v3077_v25 = vld [vmem:[#allocation2 + $0x20] sm:$0xff] }
 0x3e4   : > { %v3071_v61 = vpack.c.bf16 %v3055_v42, %v3051_v0  ;;  %3194 = vmatprep.mubr.bf16.mxu1 %v3068_v38  ;;  %v3073_v42 = vld [vmem:[#allocation2] sm:$0xff] }
 0x3ea   : > { %3130 = vmatmul.mubr.bf16.gmra.mrb[44].mxu0 %v3065_v4  ;;  %v3078_v4 = vld [vmem:[#allocation2 + $0x28] sm:$0xff] }
 0x3eb   : > { %3137 = vmatprep.mubr.bf16.mxu0 %v3070_v63  ;;  %3195 = vmatmul.mubr.bf16.gmra.mrb[44].mxu1 %v3067_v59 }
 0x3ec   : > { %3202 = vmatprep.mubr.bf16.mxu1 %v3072_v29 }
 0x3f2   : > { %3138 = vmatmul.mubr.bf16.gmra.mrb[48].mxu0 %v3069_v49 }
 0x3f3   : > { %3203 = vmatmul.mubr.bf16.gmra.mrb[48].mxu1 %v3071_v61 }
 0x4ad   : > { %v4062_v7 = vpop.f32.mrb[36].mxu0 }
 0x4ae   : > { %v4063_v57 = vpop.f32.mrb[37].mxu0  ;;  %v4102_v3 = vpop.f32.mrb[36].mxu1 }
 0x4af   : > { %v4064_v26 = vadd.f32 %v4063_v57, %v4062_v7  ;;  %v4065_v31 = vpop.f32.mrb[38].mxu0  ;;  %v4103_v32 = vpop.f32.mrb[37].mxu1  ;;  %v3079_v7 = vld [vmem:[#allocation2 + $0x30] sm:$0xff] }
 0x4b0   : > { %v4066_v55 = vpop.f32.mrb[39].mxu0  ;;  %v4104_v18 = vadd.f32 %v4103_v32, %v4102_v3  ;;  %v4105_v50 = vpop.f32.mrb[38].mxu1  ;;  %v3080_v3 = vld [vmem:[#allocation2 + $0x38] sm:$0xff] }
 0x4b1   : > { %v4067_v44 = vadd.f32 %v4066_v55, %v4065_v31  ;;  %v4106_v22 = vpop.f32.mrb[39].mxu1 }
 0x4b2   : > { %v3181_v60 = vadd.f32 %v4104_v18, %v4064_v26  ;;  %v4107_v54 = vadd.f32 %v4106_v22, %v4105_v50 }
 0x4b4   : > { %v3211_v51 = vadd.f32 %v3181_v60, %v3073_v42  ;;  %v3184_v11 = vadd.f32 %v4107_v54, %v4067_v44  ;;  %v4022_v42 = vld [vmem:[%s6576_s30] ss:$0 sm:$0xff] (!%p4021_p2) }
 0x4b5   : > { %v4068_v46 = vpop.f32.mrb[40].mxu0 }
 0x4b6   : > { %v4069_v9 = vpop.f32.mrb[41].mxu0  ;;  %3219 = vst.msk [vmem:[#allocation2] sm:$0xff] %vm6568_vm13, %v3211_v51  ;;  %v3212_v39 = vadd.f32 %v3184_v11, %v3074_v43  ;;  %v4108_v33 = vpop.f32.mrb[40].mxu1 }
 0x4b7   : > { %v4070_v35 = vadd.f32 %v4069_v9, %v4068_v46  ;;  %v4071_v28 = vpop.f32.mrb[42].mxu0  ;;  %v4109_v8 = vpop.f32.mrb[41].mxu1  ;;  %v4464_v46 = vmov (!%p4021_p2), 0   ;;  %v4328_v9 = vld [vmem:[%s6577_s4] sm:$0xff] (!%p4021_p2)  }
 0x4b8   : > { %v4072_v62 = vpop.f32.mrb[43].mxu0  ;;  %3220 = vst.msk [vmem:[#allocation2 + $0x8] sm:$0xff] %vm6569_vm14, %v3212_v39  ;;  %v4110_v52 = vadd.f32 %v4109_v8, %v4108_v33  ;;  %v4111_v2 = vpop.f32.mrb[42].mxu1  ;;  %4327 = vset.pattern.permute.xlu1 (!%p4021_p2), %v4464_v46  ;;  %4326 = vset.pattern.permute.xlu0 (!%p4021_p2), %v4464_v46 }
 0x4b9   : > { %v4073_v24 = vadd.f32 %v4072_v62, %v4071_v28  ;;  %v4112_v30 = vpop.f32.mrb[43].mxu1  ;;  %4148 = vmatprep.subr.bf16.mxu0 (!%p4021_p2), %v4328_v9 }
 0x4ba   : > { %v3189_v16 = vadd.f32 %v4110_v52, %v4070_v35  ;;  %v4113_v5 = vadd.f32 %v4112_v30, %v4111_v2  ;;  %4149 = vmatpush3.bf16.msra.mxu0 (!%p4021_p2), %v4328_v9 }
 0x4bc   : > { %v3213_v13 = vadd.f32 %v3189_v16, %v3075_v12  ;;  %v3192_v34 = vadd.f32 %v4113_v5, %v4073_v24  ;;  %v4329_v24 = vld [vmem:[%s6577_s4 + $0x8] sm:$0xff] (!%p4021_p2)   ;;  %v4330_v12 = vld [vmem:[%s6578_s25] sm:$0xff] (!%p4021_p2)  }
 0x4bd   : > { %v4074_v10 = vpop.f32.mrb[44].mxu0  ;;  %v3231_v18 = vld [vmem:[#allocation2] sm:$0xff] (!%p4021_p2)  ;;  %4150 = vmatprep.subr.bf16.mxu0 (!%p4021_p2), %v4329_v24  ;;  %4152 = vmatprep.mubr.msk.bf16.mxu0 (!%p4021_p2), %vm3357_vm6, %v4330_v12 }
 0x4be   : > { %v4075_v53 = vpop.f32.mrb[45].mxu0  ;;  %3221 = vst.msk [vmem:[#allocation2 + $0x10] sm:$0xff] %vm6570_vm7, %v3213_v13  ;;  %v3214_v17 = vadd.f32 %v3192_v34, %v3076_v6  ;;  %v4114_v40 = vpop.f32.mrb[44].mxu1  ;;  %v3246_v22 = vmul.f32 (!%p4021_p2), %v4022_v42, %v3231_v18  ;;  %v4332_v6 = vld [vmem:[%s6579_s17] sm:$0xff] (!%p4021_p2)   ;;  %4151 = vmatpush3.bf16.msra.mxu0 (!%p4021_p2), %v4329_v24  ;;  %v3415_v13 = vld [vmem:[%s6581_s16 + $0x10] sm:$0xff] (!%p4021_p2) }
 0x4bf   : > { %v4076_v1 = vadd.f32 %v4075_v53, %v4074_v10  ;;  %v4077_v21 = vpop.f32.mrb[46].mxu0  ;;  %v4115_v14 = vpop.f32.mrb[45].mxu1  ;;  %v3232_v50 = vld [vmem:[#allocation2 + $0x8] sm:$0xff] (!%p4021_p2)  ;;  %4144 = vmatprep.mubr.msk.bf16.mxu1 (!%p4021_p2), %vm6580_vm9, %v4332_v6  ;;  %v3413_v34 = vld [vmem:[%s6581_s16] sm:$0xff] (!%p4021_p2)  ;;  %3429 = vperm.xlu1 (!%p4021_p2), %4327, %v3415_v13  }
 0x4c0   : > { %v4078_v41 = vpop.f32.mrb[47].mxu0  ;;  %3222 = vst.msk [vmem:[#allocation2 + $0x18] sm:$0xff] %vm6571_vm15, %v3214_v17  ;;  %v4116_v48 = vadd.f32 %v4115_v14, %v4114_v40  ;;  %v4117_v37 = vpop.f32.mrb[46].mxu1  ;;  %v3247_v60 = vmul.f32 (!%p4021_p2), %v4022_v42, %v3232_v50  ;;  %v4331_v10 = vld [vmem:[%s6578_s25 + $0x8] sm:$0xff] (!%p4021_p2)   ;;  %3419 = vperm.xlu0 (!%p4021_p2), %4326, %v3413_v34  }
 0x4c1   : > { %v4079_v47 = vadd.f32 %v4078_v41, %v4077_v21  ;;  %v4118_v38 = vpop.f32.mrb[47].mxu1  ;;  %4153 = vmatmul.mubr.msk.bf16.vlgmr.msra.gmra.mrb[0].mxu0 (!%p4021_p2), %vm3357_vm6, %v4331_v10  ;;  %v3414_v21 = vld [vmem:[%s6581_s16 + $0x8] sm:$0xff] (!%p4021_p2) }
 0x4c2   : > { %v3197_v45 = vadd.f32 %v4116_v48, %v4076_v1  ;;  %v4119_v27 = vadd.f32 %v4118_v38, %v4117_v37  ;;  %v3254_v28 = vpack.c.bf16 (!%p4021_p2), %v3247_v60, %v3246_v22  ;;  %v3416_v1 = vld [vmem:[%s6581_s16 + $0x18] sm:$0xff] (!%p4021_p2)  ;;  %v4333_v17 = vld [vmem:[%s6579_s17 + $0x8] sm:$0xff] (!%p4021_p2)  }
 0x4c3   : > { %3434 = vperm.xlu1 (!%p4021_p2), %4327, %v3416_v1  }
 0x4c4   : > { %v3215_v20 = vadd.f32 %v3197_v45, %v3077_v25  ;;  %v3200_v15 = vadd.f32 %v4119_v27, %v4079_v47  ;;  %4136 = vmatprep.subr.bf16.mxu1 (!%p4021_p2), %v3254_v28  ;;  %3424 = vperm.xlu0 (!%p4021_p2), %4326, %v3414_v21  }
 0x4c5   : > { %v4080_v56 = vpop.f32.mrb[48].mxu0  ;;  %v3233_v54 = vld [vmem:[#allocation2 + $0x10] sm:$0xff] (!%p4021_p2)  ;;  %4137 = vmatpush3.bf16.msra.mxu1 (!%p4021_p2), %v3254_v28 }
 0x4c6   : > { %v4081_v23 = vpop.f32.mrb[49].mxu0  ;;  %3223 = vst.msk [vmem:[#allocation2 + $0x20] sm:$0xff] %vm6572_vm0, %v3215_v20  ;;  %v3216_v59 = vadd.f32 %v3200_v15, %v3078_v4  ;;  %v4120_v36 = vpop.f32.mrb[48].mxu1  ;;  %v3248_v51 = vmul.f32 (!%p4021_p2), %v4022_v42, %v3233_v54 }
 0x4c7   : > { %v4082_v19 = vadd.f32 %v4081_v23, %v4080_v56  ;;  %v4083_v58 = vpop.f32.mrb[50].mxu0  ;;  %v4121_v63 = vpop.f32.mrb[49].mxu1  ;;  %v3234_v43 = vld [vmem:[#allocation2 + $0x18] sm:$0xff] (!%p4021_p2) }
 0x4c8   : > { %v4084_v0 = vpop.f32.mrb[51].mxu0  ;;  %3224 = vst.msk [vmem:[#allocation2 + $0x28] sm:$0xff] %vm6573_vm8, %v3216_v59  ;;  %v4122_v49 = vadd.f32 %v4121_v63, %v4120_v36  ;;  %v4123_v61 = vpop.f32.mrb[50].mxu1  ;;  %v3249_v11 = vmul.f32 (!%p4021_p2), %v4022_v42, %v3234_v43 }
 0x4c9   : > { %v4085_v29 = vadd.f32 %v4084_v0, %v4083_v58  ;;  %v4124_v57 = vpop.f32.mrb[51].mxu1 }
 0x4ca   : > { %v3205_v26 = vadd.f32 %v4122_v49, %v4082_v19  ;;  %v4125_v31 = vadd.f32 %v4124_v57, %v4123_v61  ;;  %3230 = sbr.rel (%p4021_p2) target bundleno = 1470 (0x5be), region = 123  ;;  %v3255_v62 = vpack.c.bf16 (!%p4021_p2), %v3249_v11, %v3248_v51 }
 0x4cc   : > { %v3217_v55 = vadd.f32 %v3205_v26, %v3079_v7  ;;  %v3208_v32 = vadd.f32 %v4125_v31, %v4085_v29  ;;  %4138 = vmatprep.subr.bf16.mxu1 (!%p4021_p2), %v3255_v62 }
 0x4cd   : > { %v3235_v35 = vld [vmem:[#allocation2 + $0x20] sm:$0xff] (!%p4021_p2)  ;;  %4139 = vmatpush3.bf16.msra.mxu1 (!%p4021_p2), %v3255_v62 }
 0x4ce   : > { %3225 = vst.msk [vmem:[#allocation2 + $0x30] sm:$0xff] %vm6574_vm3, %v3217_v55  ;;  %v3218_v44 = vadd.f32 %v3208_v32, %v3080_v3  ;;  %v3250_v33 = vmul.f32 (!%p4021_p2), %v4022_v42, %v3235_v35 }
 0x4cf   : > { %v3236_v39 = vld [vmem:[#allocation2 + $0x28] sm:$0xff] (!%p4021_p2) }
 0x4d0   : > { %3226 = vst.msk [vmem:[#allocation2 + $0x38] sm:$0xff] %vm6575_vm12, %v3218_v44  ;;  %v3251_v8 = vmul.f32 (!%p4021_p2), %v4022_v42, %v3236_v39 }
 0x4d2   : > { %v3256_v30 = vpack.c.bf16 %v3251_v8, %v3250_v33 }
 0x4d4   : > { %4140 = vmatprep.subr.bf16.mxu1 %v3256_v30 }
 0x4d5   : > { %v3237_v52 = vld [vmem:[#allocation2 + $0x30] sm:$0xff]  ;;  %4141 = vmatpush3.bf16.msra.mxu1 %v3256_v30 }
 0x4d6   : > { %v3252_v16 = vmul.f32 %v4022_v42, %v3237_v52 }
 0x4d7   : > { %v3238_v2 = vld [vmem:[#allocation2 + $0x38] sm:$0xff] }
 0x4d8   : > { %v3253_v5 = vmul.f32 %v4022_v42, %v3238_v2 }
 0x4da   : > { %v3257_v53 = vpack.c.bf16 %v3253_v5, %v3252_v16 }
 0x4dc   : > { %4142 = vmatprep.subr.bf16.mxu1 %v3257_v53 }
 0x4dd   : > { %4143 = vmatpush3.bf16.msra.mxu1 %v3257_v53 }
 0x4e0   : > { %4145 = vmatmul.mubr.msk.bf16.vlgmr.msra.gmra.mrb[0].mxu1 %vm6582_vm10, %v4333_v17 }
 0x53e   : > { %v3430_v48 = vpop.permute.xlu1 %3429 }
 0x53f   : > { %v3420_v37 = vpop.permute.xlu0 %3419 }
 0x542   : > { %v3435_v23 = vpop.permute.xlu1 %3434 }
 0x543   : > { %v3425_v36 = vpop.permute.xlu0 %3424 }
 0x594   : > { %v4154_v40 = vpop.f32.mrb[0].mxu0 }
 0x595   : > { %v3398_v41 = vpop.f32.mrb[1].mxu0 }
 0x596   : > { %v4155_v14 = vpop.f32.mrb[2].mxu0 }
 0x597   : > { %v3401_v47 = vpop.f32.mrb[3].mxu0 }
 0x5b3   : > { %v4146_v25 = vpop.f32.mrb[0].mxu1 }
 0x5b4   : > { %v3407_v38 = vadd.f32 %v4154_v40, %v4146_v25  ;;  %v3320_v45 = vpop.f32.mrb[1].mxu1 }
 0x5b5   : > { %v3399_v27 = vadd.f32 %v3398_v41, %v3320_v45  ;;  %v4147_v4 = vpop.f32.mrb[2].mxu1 }
 0x5b6   : > { %v3439_v56 = vadd.f32 %v3430_v48, %v3407_v38  ;;  %v3410_v20 = vadd.f32 %v4155_v14, %v4147_v4  ;;  %v3323_v15 = vpop.f32.mrb[3].mxu1 }
 0x5b7   : > { %v3437_v19 = vadd.f32 %v3420_v37, %v3399_v27  ;;  %v3402_v58 = vadd.f32 %v3401_v47, %v3323_v15 }
 0x5b8   : > { %v3443_v59 = vmax.f32 %v3439_v56, 0.0  ;;  %v3440_v0 = vadd.f32 %v3435_v23, %v3410_v20 }
 0x5b9   : > { %v3441_v63 = vmax.f32 %v3437_v19, 0.0  ;;  %v3438_v29 = vadd.f32 %v3425_v36, %v3402_v58 }
 0x5ba   : > { %3447 = vst.msk [vmem:[#allocation8 + $0x10] sm:$0xff] %vm6583_vm11, %v3443_v59  ;;  %v3444_v49 = vmax.f32 %v3440_v0, 0.0 }
 0x5bb   : > { %3445 = vst.msk [vmem:[#allocation8] sm:$0xff] %vm6584_vm5, %v3441_v63  ;;  %v3442_v61 = vmax.f32 %v3438_v29, 0.0 }
 0x5bc   : > { %3448 = vst.msk [vmem:[#allocation8 + $0x18] sm:$0xff] %vm6585_vm4, %v3444_v49 }
 0x5bd   : > { %3446 = vst.msk [vmem:[#allocation8 + $0x8] sm:$0xff] %vm6586_vm2, %v3442_v61 }
 0x5be PF: > { %s3454_s27 = sand.u32 1, %s4599_s2   ;;  %s6588_s22 = sld [smem:[#allocation49_spill]] }
 0x5bf   : > { %s3485_s30 = sshll.u32 %s4666_s11, 4  ;;  %s3455_s23 = scalar_lea.sflag [#allocation7], %s3454_s27  ;;  %s3486_s30 = int_to_ptr.vmem [resolvable:$true] %s3485_s30 }
 0x5c0   : > { %s4334_s24 = scalar_lea.vmem %s3486_s30, 64  ;;  %s4465_s29 = smov [#allocation6]  }
 0x5c1   : > { %p4335_p4 = scmp.ne.s32.totalorder %s3486_s30, %s4334_s24  ;;  %s4338_s28 = sshll.u32 %s4465_s29, 4  ;;  %s4339_s28 = int_to_ptr.vmem [resolvable:$false] %s4338_s28 }
 0x5c2   : > { %s4340_s0 = scalar_lea.vmem %s4339_s28, 128  ;;  %p4341_p9 = scmp.lt.s32.totalorder %s3486_s30, %s4339_s28 }
 0x5c3   : > { %p4336_p5 = pnand %p4335_p4, %p4619_p6  ;;  %p4342_p10 = scmp.lt.s32.totalorder %s4340_s0, %s4334_s24 }
 0x5c4   : > { %s6589_s20 = smov %s6588_s22  ;;  %s6182_s1 = scalar_lea.hbm %s6588_s22, %s4645_s21 }
 0x5c5   : > { %p4337_p7 = pneg %p4336_p5  ;;  %p4343_p11 = por %p4342_p10, %p4341_p9 }
 0x5c7   : > { %p4344_p12 = pnand %p4343_p11, %p4337_p7 }
 0x5c9   : > { %4347 = shalt.err (!%p4344_p12)
}
 0x5ca   : > { %s4348_s11 = scalar_lea.hbm %s6182_s1, 64  ;;  %s4352_s27 = scalar_lea.hbm %s6589_s20, 192 }
 0x5cb   : > { %p4349_p13 = scmp.ne.s32.totalorder %s6182_s1, %s4348_s11  ;;  %p4353_p2 = scmp.lt.u32.totalorder %s6182_s1, %s6589_s20 }
 0x5cc   : > { %p4354_p4 = scmp.lt.u32.totalorder %s4352_s27, %s4348_s11  ;;  %p4356_p7 = scmp.lt.u32.totalorder %s4348_s11, %s6182_s1 }
 0x5cd   : > { %p4350_p0 = pnand %p4349_p13, %p4619_p6 }
 0x5ce   : > { %p4355_p5 = por %p4354_p4, %p4353_p2 }
 0x5cf   : > { %p4351_p1 = pneg %p4350_p0 }
 0x5d0   : > { %p4357_p9 = por %p4356_p7, %p4355_p5 }
 0x5d2   : > { %p4358_p10 = pnand %p4357_p9, %p4351_p1 }
 0x5d4   : > { %4361 = shalt.err (!%p4358_p10)
}
 0x5d5   : > { %s6590_s22 = sld [smem:[#allocation20_spill]]  ;;  %s4044_s24 = sshll.u32 %s4599_s2, 9 }
 0x5d6   : > { %4225 = dma.vmem_to_hbm [thread:$0]  (%p4619_p6), %s3486_s30, 64, %s6182_s1, %s3455_s23  }
 0x5d7   : > { %s3468_s29 = sshll.u32 %s4664_s5, 4  ;;  %s6591_s21 = sld [smem:[#allocation48_spill]]  ;;  %s6209_s29 = int_to_ptr.vmem [resolvable:$true] %s3468_s29 }
 0x5d8   : > { %s4362_s27 = scalar_lea.vmem %s6209_s29, 1024  ;;  %s4466_s18 = smov [#allocation4]  }
 0x5d9   : > { %p4363_p11 = scmp.ne.s32.totalorder %s6209_s29, %s4362_s27  ;;  %s4366_s1 = sshll.u32 %s4466_s18, 4  ;;  %s4367_s1 = int_to_ptr.vmem [resolvable:$false] %s4366_s1 }
 0x5da   : > { %s4368_s5 = scalar_lea.vmem %s4367_s1, 2048  ;;  %p4369_p0 = scmp.lt.s32.totalorder %s6209_s29, %s4367_s1 }
 0x5db   : > { %s3450_s11 = scalar_lea.sflag [#allocation5], %s6590_s22  ;;  %p4364_p12 = pnand %p4363_p11, %p4619_p6 }
 0x5dc   : > { %p4370_p1 = scmp.lt.s32.totalorder %s4368_s5, %s4362_s27 }
 0x5dd   : > { %s6207_s3 = scalar_lea.hbm %s6591_s21, %s4044_s24  ;;  %p4365_p13 = pneg %p4364_p12 }
 0x5de   : > { %p4371_p2 = por %p4370_p1, %p4369_p0 }
 0x5e0   : > { %p4372_p4 = pnand %p4371_p2, %p4365_p13 }
 0x5e2   : > { %4375 = shalt.err (!%p4372_p4)
}
 0x5e3   : > { %s4376_s30 = scalar_lea.hbm %s6207_s3, 1024  ;;  %s4380_s24 = scalar_lea.hbm %s6591_s21, 3072 }
 0x5e4   : > { %p4377_p5 = scmp.ne.s32.totalorder %s6207_s3, %s4376_s30  ;;  %p4381_p10 = scmp.lt.u32.totalorder %s6207_s3, %s6591_s21 }
 0x5e5   : > { %p4382_p11 = scmp.lt.u32.totalorder %s4380_s24, %s4376_s30  ;;  %p4384_p13 = scmp.lt.u32.totalorder %s4376_s30, %s6207_s3 }
 0x5e6   : > { %p4378_p7 = pnand %p4377_p5, %p4619_p6 }
 0x5e7   : > { %p4383_p12 = por %p4382_p11, %p4381_p10 }
 0x5e8   : > { %p4379_p9 = pneg %p4378_p7 }
 0x5e9   : > { %p4385_p0 = por %p4384_p13, %p4383_p12 }
 0x5eb   : > { %p4386_p1 = pnand %p4385_p0, %p4379_p9 }
 0x5ed   : > { %4389 = shalt.err (!%p4386_p1)
}
 0x5ee   : > { %s4467_s27 = smov 512   ;;  %s4468_s18 = smov 1536  }
 0x5ef   : > { %s4469_s1 = smov 32   ;;  %s4470_s5 = smov [#allocation8]  }
 0x5f0   : > { %4224 = dma.vmem_to_hbm [thread:$0]  (%p4619_p6), %s6209_s29, 1024, %s6207_s3, %s3450_s11, %s4467_s27, %s4468_s18, %s4469_s1  }
 0x5f1   : > { %s3495_s23 = sshll.u32 %s4470_s5, 4  ;;  %s3496_s23 = int_to_ptr.vmem [resolvable:$true] %s3495_s23 }
 0x5f2   : > { %s4390_s19 = scalar_lea.vmem %s3496_s23, 512  ;;  %p4397_p7 = scmp.lt.s32.totalorder %s3496_s23, %s3496_s23 }
 0x5f3   : > { %p4391_p2 = scmp.ne.s32.totalorder %s3496_s23, %s4390_s19  ;;  %p4398_p9 = scmp.lt.s32.totalorder %s4390_s19, %s4390_s19 }
 0x5f5   : > { %p4392_p4 = pnand %p4391_p2, %p453_p3  ;;  %p4399_p10 = por %p4398_p9, %p4397_p7 }
 0x5f7   : > { %p4393_p5 = pneg %p4392_p4 }
 0x5f9   : > { %p4400_p11 = pnand %p4399_p10, %p4393_p5 }
 0x5fb   : > { %4403 = shalt.err (!%p4400_p11)
}
 0x5fc   : > { %s6592_s28 = sld [smem:[#allocation50_spill]] }
 0x602   : > { %s4404_s26 = scalar_lea.hbm %s6592_s28, 512 }
 0x603   : > { %p4405_p6 = scmp.ne.s32.totalorder %s6592_s28, %s4404_s26  ;;  %p4410_p0 = scmp.lt.u32.totalorder %s4404_s26, %s6592_s28 }
 0x605   : > { %p4406_p12 = pnand %p4405_p6, %p453_p3 }
 0x607   : > { %p4407_p13 = pneg %p4406_p12 }
 0x609   : > { %p4412_p1 = pnand %p4410_p0, %p4407_p13 }
 0x60b   : > { %4415 = shalt.err (!%p4412_p1)
}
 0x60c   : > { %s4471_s0 = smov 128   ;;  %s4472_s27 = smov 8  }
 0x60d   : > { %4227 = dma.vmem_to_hbm [thread:$0]  (%p453_p3), %s3496_s23, 512, %s6592_s28, [#allocation7], %s4471_s0, %s4471_s0, %s4472_s27  }
 0x60e   : > { %4433 = dma.done.wait (%p453_p3), [#allocation7], 512  }
 0x60f   : > { %4435 = vsyncadd (%p453_p3), [#allocation7], 4294966784 }
 0x610 PF: > { %s6593_s5 = sld [smem:[#allocation15_spill]]  ;;  %s6594_s19 = sld [smem:[#allocation12_spill]] }
 0x616   : > { %p4241_p2 = scmp.ge.s32.totalorder %s6593_s5, 2  ;;  %s3514_s24 = sand.u32 1, %s6594_s19  }
 0x617   : > { %s3515_s26 = scalar_lea.sflag [#allocation5], %s3514_s24 }
 0x618   : > { %p4233_p4 = pnand %p4241_p2, %p4625_p8 }
 0x61a   : > { %4437 = dma.done.wait (!%p4233_p4), %s3515_s26, 1024  }
 0x61b   : > { %4439 = vsyncadd (!%p4233_p4), %s3515_s26, 4294966272  ;;  %s6596_s22 = sadd.s32 4294967294, %s6593_s5  }
 0x61c   : > { %s3523_s29 = sand.u32 1, %s6596_s22  }
 0x61d   : > { %s3524_s23 = scalar_lea.sflag [#allocation7], %s3523_s29 }
 0x61e   : > { %4441 = dma.done.wait (!%p4233_p4), %s3524_s23, 64  }
 0x61f   : > { %4443 = vsyncadd (!%p4233_p4), %s3524_s23, 4294967232  ;;  %s6597_s24 = sld [smem:[#allocation16_spill]]  ;;  %s6598_s1 = sld [smem:[#allocation13_spill]] }
 0x620   : > { %s6599_s22 = sld [smem:[#allocation14_spill]]  ;;  %s6600_s23 = sld [smem:[#allocation17_spill]] }
 0x625   : > { %p34_p3 = scmp.ge.s32.totalorder %s6597_s24, 5  }
 0x627   :  { %36 = sbr.rel (!%p34_p3) target bundleno = 19 (0x13), region = 197 }
 0x62e   :  { %3529 = vsyncpa [#allocation5], 1 }
 0x62f   :  { %3531 = vsyncpa [#allocation5 + $0x1], 1 }
 0x630   :  { %3532 = vsyncpa [#allocation7], 1 }
 0x631   :  { %3534 = vsyncpa [#allocation7 + $0x1], 1 }

</bundles_post_ra>
